<compile_context>
chip_gen: v6e
topology: v6e:2x2x1
jax: 0.10.0
libtpu: 0.0.40
codegen_flags: <defaults>
</compile_context>

<pallas_src>
import jax
import jax.numpy as jnp
from jax import lax
from jax.experimental import pallas as pl
from jax.experimental.pallas import tpu as pltpu


def _round_up(x, m):
    return (x + m - 1) // m * m


# ----------------------------------------------------------------------------
# Fused Pallas kernel: all LSTM layers + final Linear
# ----------------------------------------------------------------------------
def _make_fused_lstm_kernel(num_layers, seq, bp, hp):
    """Kernel factory.

    Ref order (as passed by pallas_call):
      x_flat (seq*bp, dp)                                  -- time-major, flat
      [w_ih_t (in_pad, 4*hp), w_hh_t (hp, 4*hp), b (1, 4*hp)] * num_layers
      fc_w_t (hp, op), fc_b (1, op)
      out (bp, op)
      scratch: xproj (seq*bp, 4*hp), hseq (seq*bp, hp), h (bp, hp), c (bp, hp)
    """
    n_w = 3 * num_layers

    def kernel(*refs):
        x_ref = refs[0]
        layer_refs = [refs[1 + 3 * l: 1 + 3 * (l + 1)] for l in range(num_layers)]
        fc_w_ref = refs[1 + n_w]
        fc_b_ref = refs[2 + n_w]
        out_ref = refs[3 + n_w]
        xproj_scr, hseq_scr, h_scr, c_scr = refs[4 + n_w:]

        cur_in = x_ref                       # input sequence of the current layer
        for l in range(num_layers):
            w_ih_ref, w_hh_ref, b_ref = layer_refs[l]
            last_layer = (l == num_layers - 1)

            # Hoisted input projection for the WHOLE sequence (+ bias folded in):
            # one well-shaped MXU matmul instead of `seq` tiny ones.
            xproj_scr[...] = (
                jnp.dot(cur_in[...], w_ih_ref[...],
                        preferred_element_type=jnp.float32)
                + b_ref[...]
            )

            # h0 = c0 = 0 (matches torch.zeros in forward()).
            h_scr[...] = jnp.zeros_like(h_scr)
            c_scr[...] = jnp.zeros_like(c_scr)

            def step(t, carry, _w_hh=w_hh_ref, _last=last_layer):
                base = pl.multiple_of(t * bp, bp)        # sublane-aligned start
                gates = xproj_scr[pl.ds(base, bp), :] + jnp.dot(
                    h_scr[...], _w_hh[...], preferred_element_type=jnp.float32)
                # Lane-dense gate slices (each gate occupies hp = 128 lanes),
                # PyTorch gate order i | f | g | o.
                i_g = jax.nn.sigmoid(gates[:, 0 * hp:1 * hp])
                f_g = jax.nn.sigmoid(gates[:, 1 * hp:2 * hp])
                g_g = jnp.tanh(gates[:, 2 * hp:3 * hp])
                o_g = jax.nn.sigmoid(gates[:, 3 * hp:4 * hp])
                c_new = f_g * c_scr[...] + i_g * g_g
                h_new = o_g * jnp.tanh(c_new)
                c_scr[...] = c_new
                h_scr[...] = h_new
                if not _last:
                    # Hidden sequence is only needed as the next layer's input;
                    # for the top layer we skip it entirely (only last h used).
                    hseq_scr[pl.ds(base, bp), :] = h_new
                return carry

            # Fully unrolled short recurrence -> cross-timestep scheduling slack.
            lax.fori_loop(0, seq, step, 0, unroll=True)
            cur_in = hseq_scr

        # Final Linear on the last hidden state; single lane-dense (bp, op) store.
        out_ref[...] = (
            jnp.dot(h_scr[...], fc_w_ref[...],
                    preferred_element_type=jnp.float32)
            + fc_b_ref[...]
        )

    return kernel


# ----------------------------------------------------------------------------
# Wrapper
# ----------------------------------------------------------------------------
def lstm_model_forward(x, params):
    """Equivalent of LSTMModel.forward. x: (batch, seq, input_dim), batch_first."""
    B, S, D = x.shape
    hp, dp, op = params["hp"], params["dp"], params["op"]
    out_dim = params["output_dim"]
    num_layers = len(params["layers"])
    bp = _round_up(max(B, 8), 8)                 # pad batch to full sublanes

    # Pad batch + input dim, go time-major and flatten to (seq*bp, dp) so the
    # per-layer input projection is a single big matmul inside the kernel.
    xp = jnp.zeros((bp, S, dp), jnp.float32).at[:B, :, :D].set(
        x.astype(jnp.float32))
    x_flat = jnp.transpose(xp, (1, 0, 2)).reshape(S * bp, dp)

    args = [x_flat]
    for lyr in params["layers"]:
        args.extend([lyr["w_ih_t"], lyr["w_hh_t"], lyr["b"]])
    args.extend([params["fc_w_t"], params["fc_b"]])

    kernel = _make_fused_lstm_kernel(num_layers, S, bp, hp)

    out_padded = pl.pallas_call(
        kernel,
        out_shape=jax.ShapeDtypeStruct((bp, op), jnp.float32),
        grid=(1,),
        in_specs=[pl.BlockSpec(a.shape, lambda i: (0, 0)) for a in args],
        out_specs=pl.BlockSpec((bp, op), lambda i: (0, 0)),
        scratch_shapes=[
            pltpu.VMEM((S * bp, 4 * hp), jnp.float32),   # hoisted input proj
            pltpu.VMEM((S * bp, hp), jnp.float32),       # inter-layer hidden seq
            pltpu.VMEM((bp, hp), jnp.float32),           # h
            pltpu.VMEM((bp, hp), jnp.float32),           # c
        ],
        compiler_params=pltpu.CompilerParams(
            dimension_semantics=("arbitrary",)),
    )(*args)

    return out_padded[:B, :out_dim]


# ----------------------------------------------------------------------------
# Parameters: raw (PyTorch-shaped) + padded/transposed kernel layout
# ----------------------------------------------------------------------------
def init_params(key, input_dim, hidden_dim, num_layers, output_dim):
    """Raw weights with nn.LSTM / nn.Linear shapes (gate order i|f|g|o)."""
    raw = {"input_dim": input_dim, "hidden_dim": hidden_dim,
           "output_dim": output_dim, "layers": []}
    scale = 1.0 / float(jnp.sqrt(hidden_dim))
    for l in range(num_layers):
        in_dim = input_dim if l == 0 else hidden_dim
        key, k1, k2, k3, k4 = jax.random.split(key, 5)
        raw["layers"].append({
            "w_ih": jax.random.uniform(k1, (4 * hidden_dim, in_dim), jnp.float32, -scale, scale),
            "w_hh": jax.random.uniform(k2, (4 * hidden_dim, hidden_dim), jnp.float32, -scale, scale),
            "b_ih": jax.random.uniform(k3, (4 * hidden_dim,), jnp.float32, -scale, scale),
            "b_hh": jax.random.uniform(k4, (4 * hidden_dim,), jnp.float32, -scale, scale),
        })
    key, k5, k6 = jax.random.split(key, 3)
    raw["fc_w"] = jax.random.uniform(k5, (output_dim, hidden_dim), jnp.float32, -scale, scale)
    raw["fc_b"] = jax.random.uniform(k6, (output_dim,), jnp.float32, -scale, scale)
    return raw


def pack_params_for_kernel(raw):
    """Pad per-gate hidden dim / input dim / output dim to lane multiples and
    pre-transpose so the kernel does plain x @ W matmuls with no relayouts."""
    H, D, O = raw["hidden_dim"], raw["input_dim"], raw["output_dim"]
    hp = _round_up(H, 128)
    dp = _round_up(D, 128)
    op = _round_up(O, 128)

    def pad_gates_t(w, in_dim, in_pad):
        # w: (4*H, in_dim), gates stacked i|f|g|o. Pad each gate block to hp and
        # the input dim to in_pad; return (in_pad, 4*hp).
        w4 = w.reshape(4, H, in_dim)
        w4p = jnp.zeros((4, hp, in_pad), jnp.float32).at[:, :H, :in_dim].set(w4)
        return w4p.reshape(4 * hp, in_pad).T

    def pad_bias(b_ih, b_hh):
        b = (b_ih + b_hh).reshape(4, H)
        bpad = jnp.zeros((4, hp), jnp.float32).at[:, :H].set(b)
        return bpad.reshape(1, 4 * hp)

    layers = []
    for l, lyr in enumerate(raw["layers"]):
        in_dim = D if l == 0 else H
        in_pad = dp if l == 0 else hp
        layers.append({
            "w_ih_t": pad_gates_t(lyr["w_ih"], in_dim, in_pad),
            "w_hh_t": pad_gates_t(lyr["w_hh"], H, hp),
            "b": pad_bias(lyr["b_ih"], lyr["b_hh"]),
        })

    fc_w_t = jnp.zeros((hp, op), jnp.float32).at[:H, :O].set(raw["fc_w"].T)
    fc_b = jnp.zeros((1, op), jnp.float32).at[0, :O].set(raw["fc_b"])

    return {"layers": layers, "fc_w_t": fc_w_t, "fc_b": fc_b,
            "hp": hp, "dp": dp, "op": op,
            "hidden_dim": H, "input_dim": D, "output_dim": O}


# ----------------------------------------------------------------------------
# Pure-JAX reference (mirrors the PyTorch LSTM equations) for a sanity check
# ----------------------------------------------------------------------------
def lstm_model_reference(x, raw):
    H = raw["hidden_dim"]
    B = x.shape[0]
    out = jnp.transpose(x, (1, 0, 2))
    for lyr in raw["layers"]:
        w_ih_t, w_hh_t = lyr["w_ih"].T, lyr["w_hh"].T
        b = (lyr["b_ih"] + lyr["b_hh"])[None, :]
        h = jnp.zeros((B, H), jnp.float32)
        c = jnp.zeros((B, H), jnp.float32)
        hs = []
        for t in range(out.shape[0]):
            g = out[t] @ w_ih_t + h @ w_hh_t + b
            i = jax.nn.sigmoid(g[:, 0 * H:1 * H])
            f = jax.nn.sigmoid(g[:, 1 * H:2 * H])
            gg = jnp.tanh(g[:, 2 * H:3 * H])
            o = jax.nn.sigmoid(g[:, 3 * H:4 * H])
            c = f * c + i * gg
            h = o * jnp.tanh(c)
            hs.append(h)
        out = jnp.stack(hs, axis=0)
    return out[-1] @ raw["fc_w"].T + raw["fc_b"][None, :]


if __name__ == "__main__":
    # Small shapes implied by the module: x is (batch, seq, input_dim).
    batch, seq, input_dim = 2, 8, 16
    hidden_dim, num_layers, output_dim = 32, 2, 8

    key = jax.random.PRNGKey(0)
    key, kx = jax.random.split(key)
    x = jax.random.normal(kx, (batch, seq, input_dim), jnp.float32)

    raw = init_params(key, input_dim, hidden_dim, num_layers, output_dim)
    packed = pack_params_for_kernel(raw)

    out = lstm_model_forward(x, packed)
    out = jax.block_until_ready(out)

    ref = lstm_model_reference(x, raw)
    assert out.shape == (batch, output_dim)
    assert jnp.allclose(out, ref, atol=1e-5, rtol=1e-5), "mismatch vs reference"

    print("KERNEL_OK")
</pallas_src>

<mosaic_0001>
module attributes {stable_mosaic.version = 11 : i64} {
  func.func @kernel(%arg0: i32, %arg1: memref<64x128xf32, #tpu.memory_space<vmem>>, %arg2: memref<128x512xf32, #tpu.memory_space<vmem>>, %arg3: memref<128x512xf32, #tpu.memory_space<vmem>>, %arg4: memref<1x512xf32, #tpu.memory_space<vmem>>, %arg5: memref<128x512xf32, #tpu.memory_space<vmem>>, %arg6: memref<128x512xf32, #tpu.memory_space<vmem>>, %arg7: memref<1x512xf32, #tpu.memory_space<vmem>>, %arg8: memref<128x128xf32, #tpu.memory_space<vmem>>, %arg9: memref<1x128xf32, #tpu.memory_space<vmem>>, %arg10: memref<8x128xf32, #tpu.memory_space<vmem>>, %arg11: memref<64x512xf32, #tpu.memory_space<vmem>>, %arg12: memref<64x128xf32, #tpu.memory_space<vmem>>, %arg13: memref<8x128xf32, #tpu.memory_space<vmem>>, %arg14: memref<8x128xf32, #tpu.memory_space<vmem>>) attributes {dimension_semantics = [#tpu.dimension_semantics<arbitrary>], iteration_bounds = array<i64: 1>, scalar_prefetch = 0 : i64, scratch_operands = 4 : i64, tpu.core_type = #tpu.core_type<tc>, window_params = [{pipeline_mode = #tpu.pipeline_mode<synchronous>, transform_indices = @transform_0, window_bounds = array<i64: 64, 128>}, {pipeline_mode = #tpu.pipeline_mode<synchronous>, transform_indices = @transform_1, window_bounds = array<i64: 128, 512>}, {pipeline_mode = #tpu.pipeline_mode<synchronous>, transform_indices = @transform_2, window_bounds = array<i64: 128, 512>}, {pipeline_mode = #tpu.pipeline_mode<synchronous>, transform_indices = @transform_3, window_bounds = array<i64: 1, 512>}, {pipeline_mode = #tpu.pipeline_mode<synchronous>, transform_indices = @transform_4, window_bounds = array<i64: 128, 512>}, {pipeline_mode = #tpu.pipeline_mode<synchronous>, transform_indices = @transform_5, window_bounds = array<i64: 128, 512>}, {pipeline_mode = #tpu.pipeline_mode<synchronous>, transform_indices = @transform_6, window_bounds = array<i64: 1, 512>}, {pipeline_mode = #tpu.pipeline_mode<synchronous>, transform_indices = @transform_7, window_bounds = array<i64: 128, 128>}, {pipeline_mode = #tpu.pipeline_mode<synchronous>, transform_indices = @transform_8, window_bounds = array<i64: 1, 128>}, {pipeline_mode = #tpu.pipeline_mode<synchronous>, transform_indices = @transform_9, window_bounds = array<i64: 8, 128>}]} {
    %c0 = arith.constant 0 : index
    %c0_0 = arith.constant 0 : index
    %0 = vector.load %arg1[%c0, %c0_0] : memref<64x128xf32, #tpu.memory_space<vmem>>, vector<64x128xf32>
    %c0_1 = arith.constant 0 : index
    %c0_2 = arith.constant 0 : index
    %1 = vector.load %arg2[%c0_1, %c0_2] : memref<128x512xf32, #tpu.memory_space<vmem>>, vector<128x512xf32>
    %cst = arith.constant dense<0.000000e+00> : vector<64x512xf32>
    %2 = tpu.matmul %0, %1, %cst {dimension_numbers = #tpu.dot_dimension_numbers<[1], [0], [0], [1], [0, 0, 1, 1], [], []>} : vector<64x128xf32>, vector<128x512xf32>, vector<64x512xf32> -> vector<64x512xf32>
    %c0_3 = arith.constant 0 : index
    %c0_4 = arith.constant 0 : index
    %3 = vector.load %arg4[%c0_3, %c0_4] : memref<1x512xf32, #tpu.memory_space<vmem>>, vector<1x512xf32>
    %4 = vector.broadcast %3 : vector<1x512xf32> to vector<64x512xf32>
    %5 = arith.addf %2, %4 : vector<64x512xf32>
    %c0_5 = arith.constant 0 : index
    %c0_6 = arith.constant 0 : index
    %6 = vector.load %arg11[%c0_5, %c0_6] : memref<64x512xf32, #tpu.memory_space<vmem>>, vector<64x512xf32>
    tpu.vector_store %arg11[%c0_5, %c0_6], %5 {strides = array<i32>} : memref<64x512xf32, #tpu.memory_space<vmem>>, vector<64x512xf32>,
    %cst_7 = arith.constant 0.000000e+00 : f32
    %7 = vector.broadcast %cst_7 : f32 to vector<8x128xf32>
    %c0_8 = arith.constant 0 : index
    %c0_9 = arith.constant 0 : index
    %8 = vector.load %arg13[%c0_8, %c0_9] : memref<8x128xf32, #tpu.memory_space<vmem>>, vector<8x128xf32>
    tpu.vector_store %arg13[%c0_8, %c0_9], %7 {strides = array<i32>} : memref<8x128xf32, #tpu.memory_space<vmem>>, vector<8x128xf32>,
    %cst_10 = arith.constant 0.000000e+00 : f32
    %9 = vector.broadcast %cst_10 : f32 to vector<8x128xf32>
    %c0_11 = arith.constant 0 : index
    %c0_12 = arith.constant 0 : index
    %10 = vector.load %arg14[%c0_11, %c0_12] : memref<8x128xf32, #tpu.memory_space<vmem>>, vector<8x128xf32>
    tpu.vector_store %arg14[%c0_11, %c0_12], %9 {strides = array<i32>} : memref<8x128xf32, #tpu.memory_space<vmem>>, vector<8x128xf32>,
    %c0_i32 = arith.constant 0 : i32
    %c8_i32 = arith.constant 8 : i32
    %11 = arith.muli %c0_i32, %c8_i32 : i32
    %12 = tpu.assume_multiple %11, 8 : i32
    %13 = arith.index_cast %12 : i32 to index
    %c0_13 = arith.constant 0 : index
    %14 = vector.load %arg11[%13, %c0_13] : memref<64x512xf32, #tpu.memory_space<vmem>>, vector<8x512xf32>
    %c0_14 = arith.constant 0 : index
    %c0_15 = arith.constant 0 : index
    %15 = vector.load %arg13[%c0_14, %c0_15] : memref<8x128xf32, #tpu.memory_space<vmem>>, vector<8x128xf32>
    %c0_16 = arith.constant 0 : index
    %c0_17 = arith.constant 0 : index
    %16 = vector.load %arg3[%c0_16, %c0_17] : memref<128x512xf32, #tpu.memory_space<vmem>>, vector<128x512xf32>
    %cst_18 = arith.constant dense<0.000000e+00> : vector<8x512xf32>
    %17 = tpu.matmul %15, %16, %cst_18 {dimension_numbers = #tpu.dot_dimension_numbers<[1], [0], [0], [1], [0, 0, 1, 1], [], []>} : vector<8x128xf32>, vector<128x512xf32>, vector<8x512xf32> -> vector<8x512xf32>
    %18 = arith.addf %14, %17 : vector<8x512xf32>
    %19 = vector.extract_strided_slice %18 {offsets = [0, 0], sizes = [8, 128], strides = [1, 1]} : vector<8x512xf32> to vector<8x128xf32>
    %20 = arith.negf %19 : vector<8x128xf32>
    %21 = math.exp %20 : vector<8x128xf32>
    %cst_19 = arith.constant 1.000000e+00 : f32
    %22 = vector.broadcast %cst_19 : f32 to vector<8x128xf32>
    %23 = arith.addf %22, %21 : vector<8x128xf32>
    %24 = arith.divf %22, %23 : vector<8x128xf32>
    %25 = vector.extract_strided_slice %18 {offsets = [0, 128], sizes = [8, 128], strides = [1, 1]} : vector<8x512xf32> to vector<8x128xf32>
    %26 = arith.negf %25 : vector<8x128xf32>
    %27 = math.exp %26 : vector<8x128xf32>
    %cst_20 = arith.constant 1.000000e+00 : f32
    %28 = vector.broadcast %cst_20 : f32 to vector<8x128xf32>
    %29 = arith.addf %28, %27 : vector<8x128xf32>
    %30 = arith.divf %28, %29 : vector<8x128xf32>
    %31 = vector.extract_strided_slice %18 {offsets = [0, 256], sizes = [8, 128], strides = [1, 1]} : vector<8x512xf32> to vector<8x128xf32>
    %32 = math.tanh %31 : vector<8x128xf32>
    %33 = vector.extract_strided_slice %18 {offsets = [0, 384], sizes = [8, 128], strides = [1, 1]} : vector<8x512xf32> to vector<8x128xf32>
    %34 = arith.negf %33 : vector<8x128xf32>
    %35 = math.exp %34 : vector<8x128xf32>
    %cst_21 = arith.constant 1.000000e+00 : f32
    %36 = vector.broadcast %cst_21 : f32 to vector<8x128xf32>
    %37 = arith.addf %36, %35 : vector<8x128xf32>
    %38 = arith.divf %36, %37 : vector<8x128xf32>
    %c0_22 = arith.constant 0 : index
    %c0_23 = arith.constant 0 : index
    %39 = vector.load %arg14[%c0_22, %c0_23] : memref<8x128xf32, #tpu.memory_space<vmem>>, vector<8x128xf32>
    %40 = arith.mulf %30, %39 : vector<8x128xf32>
    %41 = arith.mulf %24, %32 : vector<8x128xf32>
    %42 = arith.addf %40, %41 : vector<8x128xf32>
    %43 = math.tanh %42 : vector<8x128xf32>
    %44 = arith.mulf %38, %43 : vector<8x128xf32>
    %c0_24 = arith.constant 0 : index
    %c0_25 = arith.constant 0 : index
    %45 = vector.load %arg14[%c0_24, %c0_25] : memref<8x128xf32, #tpu.memory_space<vmem>>, vector<8x128xf32>
    tpu.vector_store %arg14[%c0_24, %c0_25], %42 {strides = array<i32>} : memref<8x128xf32, #tpu.memory_space<vmem>>, vector<8x128xf32>,
    %c0_26 = arith.constant 0 : index
    %c0_27 = arith.constant 0 : index
    %46 = vector.load %arg13[%c0_26, %c0_27] : memref<8x128xf32, #tpu.memory_space<vmem>>, vector<8x128xf32>
    tpu.vector_store %arg13[%c0_26, %c0_27], %44 {strides = array<i32>} : memref<8x128xf32, #tpu.memory_space<vmem>>, vector<8x128xf32>,
    %47 = arith.index_cast %12 : i32 to index
    %c0_28 = arith.constant 0 : index
    %48 = vector.load %arg12[%47, %c0_28] : memref<64x128xf32, #tpu.memory_space<vmem>>, vector<8x128xf32>
    tpu.vector_store %arg12[%47, %c0_28], %44 {strides = array<i32>} : memref<64x128xf32, #tpu.memory_space<vmem>>, vector<8x128xf32>,
    %c1_i32 = arith.constant 1 : i32
    %c8_i32_29 = arith.constant 8 : i32
    %49 = arith.muli %c1_i32, %c8_i32_29 : i32
    %50 = tpu.assume_multiple %49, 8 : i32
    %51 = arith.index_cast %50 : i32 to index
    %c0_30 = arith.constant 0 : index
    %52 = vector.load %arg11[%51, %c0_30] : memref<64x512xf32, #tpu.memory_space<vmem>>, vector<8x512xf32>
    %c0_31 = arith.constant 0 : index
    %c0_32 = arith.constant 0 : index
    %53 = vector.load %arg13[%c0_31, %c0_32] : memref<8x128xf32, #tpu.memory_space<vmem>>, vector<8x128xf32>
    %c0_33 = arith.constant 0 : index
    %c0_34 = arith.constant 0 : index
    %54 = vector.load %arg3[%c0_33, %c0_34] : memref<128x512xf32, #tpu.memory_space<vmem>>, vector<128x512xf32>
    %cst_35 = arith.constant dense<0.000000e+00> : vector<8x512xf32>
    %55 = tpu.matmul %53, %54, %cst_35 {dimension_numbers = #tpu.dot_dimension_numbers<[1], [0], [0], [1], [0, 0, 1, 1], [], []>} : vector<8x128xf32>, vector<128x512xf32>, vector<8x512xf32> -> vector<8x512xf32>
    %56 = arith.addf %52, %55 : vector<8x512xf32>
    %57 = vector.extract_strided_slice %56 {offsets = [0, 0], sizes = [8, 128], strides = [1, 1]} : vector<8x512xf32> to vector<8x128xf32>
    %58 = arith.negf %57 : vector<8x128xf32>
    %59 = math.exp %58 : vector<8x128xf32>
    %cst_36 = arith.constant 1.000000e+00 : f32
    %60 = vector.broadcast %cst_36 : f32 to vector<8x128xf32>
    %61 = arith.addf %60, %59 : vector<8x128xf32>
    %62 = arith.divf %60, %61 : vector<8x128xf32>
    %63 = vector.extract_strided_slice %56 {offsets = [0, 128], sizes = [8, 128], strides = [1, 1]} : vector<8x512xf32> to vector<8x128xf32>
    %64 = arith.negf %63 : vector<8x128xf32>
    %65 = math.exp %64 : vector<8x128xf32>
    %cst_37 = arith.constant 1.000000e+00 : f32
    %66 = vector.broadcast %cst_37 : f32 to vector<8x128xf32>
    %67 = arith.addf %66, %65 : vector<8x128xf32>
    %68 = arith.divf %66, %67 : vector<8x128xf32>
    %69 = vector.extract_strided_slice %56 {offsets = [0, 256], sizes = [8, 128], strides = [1, 1]} : vector<8x512xf32> to vector<8x128xf32>
    %70 = math.tanh %69 : vector<8x128xf32>
    %71 = vector.extract_strided_slice %56 {offsets = [0, 384], sizes = [8, 128], strides = [1, 1]} : vector<8x512xf32> to vector<8x128xf32>
    %72 = arith.negf %71 : vector<8x128xf32>
    %73 = math.exp %72 : vector<8x128xf32>
    %cst_38 = arith.constant 1.000000e+00 : f32
    %74 = vector.broadcast %cst_38 : f32 to vector<8x128xf32>
    %75 = arith.addf %74, %73 : vector<8x128xf32>
    %76 = arith.divf %74, %75 : vector<8x128xf32>
    %c0_39 = arith.constant 0 : index
    %c0_40 = arith.constant 0 : index
    %77 = vector.load %arg14[%c0_39, %c0_40] : memref<8x128xf32, #tpu.memory_space<vmem>>, vector<8x128xf32>
    %78 = arith.mulf %68, %77 : vector<8x128xf32>
    %79 = arith.mulf %62, %70 : vector<8x128xf32>
    %80 = arith.addf %78, %79 : vector<8x128xf32>
    %81 = math.tanh %80 : vector<8x128xf32>
    %82 = arith.mulf %76, %81 : vector<8x128xf32>
    %c0_41 = arith.constant 0 : index
    %c0_42 = arith.constant 0 : index
    %83 = vector.load %arg14[%c0_41, %c0_42] : memref<8x128xf32, #tpu.memory_space<vmem>>, vector<8x128xf32>
    tpu.vector_store %arg14[%c0_41, %c0_42], %80 {strides = array<i32>} : memref<8x128xf32, #tpu.memory_space<vmem>>, vector<8x128xf32>,
    %c0_43 = arith.constant 0 : index
    %c0_44 = arith.constant 0 : index
    %84 = vector.load %arg13[%c0_43, %c0_44] : memref<8x128xf32, #tpu.memory_space<vmem>>, vector<8x128xf32>
    tpu.vector_store %arg13[%c0_43, %c0_44], %82 {strides = array<i32>} : memref<8x128xf32, #tpu.memory_space<vmem>>, vector<8x128xf32>,
    %85 = arith.index_cast %50 : i32 to index
    %c0_45 = arith.constant 0 : index
    %86 = vector.load %arg12[%85, %c0_45] : memref<64x128xf32, #tpu.memory_space<vmem>>, vector<8x128xf32>
    tpu.vector_store %arg12[%85, %c0_45], %82 {strides = array<i32>} : memref<64x128xf32, #tpu.memory_space<vmem>>, vector<8x128xf32>,
    %c2_i32 = arith.constant 2 : i32
    %c8_i32_46 = arith.constant 8 : i32
    %87 = arith.muli %c2_i32, %c8_i32_46 : i32
    %88 = tpu.assume_multiple %87, 8 : i32
    %89 = arith.index_cast %88 : i32 to index
    %c0_47 = arith.constant 0 : index
    %90 = vector.load %arg11[%89, %c0_47] : memref<64x512xf32, #tpu.memory_space<vmem>>, vector<8x512xf32>
    %c0_48 = arith.constant 0 : index
    %c0_49 = arith.constant 0 : index
    %91 = vector.load %arg13[%c0_48, %c0_49] : memref<8x128xf32, #tpu.memory_space<vmem>>, vector<8x128xf32>
    %c0_50 = arith.constant 0 : index
    %c0_51 = arith.constant 0 : index
    %92 = vector.load %arg3[%c0_50, %c0_51] : memref<128x512xf32, #tpu.memory_space<vmem>>, vector<128x512xf32>
    %cst_52 = arith.constant dense<0.000000e+00> : vector<8x512xf32>
    %93 = tpu.matmul %91, %92, %cst_52 {dimension_numbers = #tpu.dot_dimension_numbers<[1], [0], [0], [1], [0, 0, 1, 1], [], []>} : vector<8x128xf32>, vector<128x512xf32>, vector<8x512xf32> -> vector<8x512xf32>
    %94 = arith.addf %90, %93 : vector<8x512xf32>
    %95 = vector.extract_strided_slice %94 {offsets = [0, 0], sizes = [8, 128], strides = [1, 1]} : vector<8x512xf32> to vector<8x128xf32>
    %96 = arith.negf %95 : vector<8x128xf32>
    %97 = math.exp %96 : vector<8x128xf32>
    %cst_53 = arith.constant 1.000000e+00 : f32
    %98 = vector.broadcast %cst_53 : f32 to vector<8x128xf32>
    %99 = arith.addf %98, %97 : vector<8x128xf32>
    %100 = arith.divf %98, %99 : vector<8x128xf32>
    %101 = vector.extract_strided_slice %94 {offsets = [0, 128], sizes = [8, 128], strides = [1, 1]} : vector<8x512xf32> to vector<8x128xf32>
    %102 = arith.negf %101 : vector<8x128xf32>
    %103 = math.exp %102 : vector<8x128xf32>
    %cst_54 = arith.constant 1.000000e+00 : f32
    %104 = vector.broadcast %cst_54 : f32 to vector<8x128xf32>
    %105 = arith.addf %104, %103 : vector<8x128xf32>
    %106 = arith.divf %104, %105 : vector<8x128xf32>
    %107 = vector.extract_strided_slice %94 {offsets = [0, 256], sizes = [8, 128], strides = [1, 1]} : vector<8x512xf32> to vector<8x128xf32>
    %108 = math.tanh %107 : vector<8x128xf32>
    %109 = vector.extract_strided_slice %94 {offsets = [0, 384], sizes = [8, 128], strides = [1, 1]} : vector<8x512xf32> to vector<8x128xf32>
    %110 = arith.negf %109 : vector<8x128xf32>
    %111 = math.exp %110 : vector<8x128xf32>
    %cst_55 = arith.constant 1.000000e+00 : f32
    %112 = vector.broadcast %cst_55 : f32 to vector<8x128xf32>
    %113 = arith.addf %112, %111 : vector<8x128xf32>
    %114 = arith.divf %112, %113 : vector<8x128xf32>
    %c0_56 = arith.constant 0 : index
    %c0_57 = arith.constant 0 : index
    %115 = vector.load %arg14[%c0_56, %c0_57] : memref<8x128xf32, #tpu.memory_space<vmem>>, vector<8x128xf32>
    %116 = arith.mulf %106, %115 : vector<8x128xf32>
    %117 = arith.mulf %100, %108 : vector<8x128xf32>
    %118 = arith.addf %116, %117 : vector<8x128xf32>
    %119 = math.tanh %118 : vector<8x128xf32>
    %120 = arith.mulf %114, %119 : vector<8x128xf32>
    %c0_58 = arith.constant 0 : index
    %c0_59 = arith.constant 0 : index
    %121 = vector.load %arg14[%c0_58, %c0_59] : memref<8x128xf32, #tpu.memory_space<vmem>>, vector<8x128xf32>
    tpu.vector_store %arg14[%c0_58, %c0_59], %118 {strides = array<i32>} : memref<8x128xf32, #tpu.memory_space<vmem>>, vector<8x128xf32>,
    %c0_60 = arith.constant 0 : index
    %c0_61 = arith.constant 0 : index
    %122 = vector.load %arg13[%c0_60, %c0_61] : memref<8x128xf32, #tpu.memory_space<vmem>>, vector<8x128xf32>
    tpu.vector_store %arg13[%c0_60, %c0_61], %120 {strides = array<i32>} : memref<8x128xf32, #tpu.memory_space<vmem>>, vector<8x128xf32>,
    %123 = arith.index_cast %88 : i32 to index
    %c0_62 = arith.constant 0 : index
    %124 = vector.load %arg12[%123, %c0_62] : memref<64x128xf32, #tpu.memory_space<vmem>>, vector<8x128xf32>
    tpu.vector_store %arg12[%123, %c0_62], %120 {strides = array<i32>} : memref<64x128xf32, #tpu.memory_space<vmem>>, vector<8x128xf32>,
    %c3_i32 = arith.constant 3 : i32
    %c8_i32_63 = arith.constant 8 : i32
    %125 = arith.muli %c3_i32, %c8_i32_63 : i32
    %126 = tpu.assume_multiple %125, 8 : i32
    %127 = arith.index_cast %126 : i32 to index
    %c0_64 = arith.constant 0 : index
    %128 = vector.load %arg11[%127, %c0_64] : memref<64x512xf32, #tpu.memory_space<vmem>>, vector<8x512xf32>
    %c0_65 = arith.constant 0 : index
    %c0_66 = arith.constant 0 : index
    %129 = vector.load %arg13[%c0_65, %c0_66] : memref<8x128xf32, #tpu.memory_space<vmem>>, vector<8x128xf32>
    %c0_67 = arith.constant 0 : index
    %c0_68 = arith.constant 0 : index
    %130 = vector.load %arg3[%c0_67, %c0_68] : memref<128x512xf32, #tpu.memory_space<vmem>>, vector<128x512xf32>
    %cst_69 = arith.constant dense<0.000000e+00> : vector<8x512xf32>
    %131 = tpu.matmul %129, %130, %cst_69 {dimension_numbers = #tpu.dot_dimension_numbers<[1], [0], [0], [1], [0, 0, 1, 1], [], []>} : vector<8x128xf32>, vector<128x512xf32>, vector<8x512xf32> -> vector<8x512xf32>
    %132 = arith.addf %128, %131 : vector<8x512xf32>
    %133 = vector.extract_strided_slice %132 {offsets = [0, 0], sizes = [8, 128], strides = [1, 1]} : vector<8x512xf32> to vector<8x128xf32>
    %134 = arith.negf %133 : vector<8x128xf32>
    %135 = math.exp %134 : vector<8x128xf32>
    %cst_70 = arith.constant 1.000000e+00 : f32
    %136 = vector.broadcast %cst_70 : f32 to vector<8x128xf32>
    %137 = arith.addf %136, %135 : vector<8x128xf32>
    %138 = arith.divf %136, %137 : vector<8x128xf32>
    %139 = vector.extract_strided_slice %132 {offsets = [0, 128], sizes = [8, 128], strides = [1, 1]} : vector<8x512xf32> to vector<8x128xf32>
    %140 = arith.negf %139 : vector<8x128xf32>
    %141 = math.exp %140 : vector<8x128xf32>
    %cst_71 = arith.constant 1.000000e+00 : f32
    %142 = vector.broadcast %cst_71 : f32 to vector<8x128xf32>
    %143 = arith.addf %142, %141 : vector<8x128xf32>
    %144 = arith.divf %142, %143 : vector<8x128xf32>
    %145 = vector.extract_strided_slice %132 {offsets = [0, 256], sizes = [8, 128], strides = [1, 1]} : vector<8x512xf32> to vector<8x128xf32>
    %146 = math.tanh %145 : vector<8x128xf32>
    %147 = vector.extract_strided_slice %132 {offsets = [0, 384], sizes = [8, 128], strides = [1, 1]} : vector<8x512xf32> to vector<8x128xf32>
    %148 = arith.negf %147 : vector<8x128xf32>
    %149 = math.exp %148 : vector<8x128xf32>
    %cst_72 = arith.constant 1.000000e+00 : f32
    %150 = vector.broadcast %cst_72 : f32 to vector<8x128xf32>
    %151 = arith.addf %150, %149 : vector<8x128xf32>
    %152 = arith.divf %150, %151 : vector<8x128xf32>
    %c0_73 = arith.constant 0 : index
    %c0_74 = arith.constant 0 : index
    %153 = vector.load %arg14[%c0_73, %c0_74] : memref<8x128xf32, #tpu.memory_space<vmem>>, vector<8x128xf32>
    %154 = arith.mulf %144, %153 : vector<8x128xf32>
    %155 = arith.mulf %138, %146 : vector<8x128xf32>
    %156 = arith.addf %154, %155 : vector<8x128xf32>
    %157 = math.tanh %156 : vector<8x128xf32>
    %158 = arith.mulf %152, %157 : vector<8x128xf32>
    %c0_75 = arith.constant 0 : index
    %c0_76 = arith.constant 0 : index
    %159 = vector.load %arg14[%c0_75, %c0_76] : memref<8x128xf32, #tpu.memory_space<vmem>>, vector<8x128xf32>
    tpu.vector_store %arg14[%c0_75, %c0_76], %156 {strides = array<i32>} : memref<8x128xf32, #tpu.memory_space<vmem>>, vector<8x128xf32>,
    %c0_77 = arith.constant 0 : index
    %c0_78 = arith.constant 0 : index
    %160 = vector.load %arg13[%c0_77, %c0_78] : memref<8x128xf32, #tpu.memory_space<vmem>>, vector<8x128xf32>
    tpu.vector_store %arg13[%c0_77, %c0_78], %158 {strides = array<i32>} : memref<8x128xf32, #tpu.memory_space<vmem>>, vector<8x128xf32>,
    %161 = arith.index_cast %126 : i32 to index
    %c0_79 = arith.constant 0 : index
    %162 = vector.load %arg12[%161, %c0_79] : memref<64x128xf32, #tpu.memory_space<vmem>>, vector<8x128xf32>
    tpu.vector_store %arg12[%161, %c0_79], %158 {strides = array<i32>} : memref<64x128xf32, #tpu.memory_space<vmem>>, vector<8x128xf32>,
    %c4_i32 = arith.constant 4 : i32
    %c8_i32_80 = arith.constant 8 : i32
    %163 = arith.muli %c4_i32, %c8_i32_80 : i32
    %164 = tpu.assume_multiple %163, 8 : i32
    %165 = arith.index_cast %164 : i32 to index
    %c0_81 = arith.constant 0 : index
    %166 = vector.load %arg11[%165, %c0_81] : memref<64x512xf32, #tpu.memory_space<vmem>>, vector<8x512xf32>
    %c0_82 = arith.constant 0 : index
    %c0_83 = arith.constant 0 : index
    %167 = vector.load %arg13[%c0_82, %c0_83] : memref<8x128xf32, #tpu.memory_space<vmem>>, vector<8x128xf32>
    %c0_84 = arith.constant 0 : index
    %c0_85 = arith.constant 0 : index
    %168 = vector.load %arg3[%c0_84, %c0_85] : memref<128x512xf32, #tpu.memory_space<vmem>>, vector<128x512xf32>
    %cst_86 = arith.constant dense<0.000000e+00> : vector<8x512xf32>
    %169 = tpu.matmul %167, %168, %cst_86 {dimension_numbers = #tpu.dot_dimension_numbers<[1], [0], [0], [1], [0, 0, 1, 1], [], []>} : vector<8x128xf32>, vector<128x512xf32>, vector<8x512xf32> -> vector<8x512xf32>
    %170 = arith.addf %166, %169 : vector<8x512xf32>
    %171 = vector.extract_strided_slice %170 {offsets = [0, 0], sizes = [8, 128], strides = [1, 1]} : vector<8x512xf32> to vector<8x128xf32>
    %172 = arith.negf %171 : vector<8x128xf32>
    %173 = math.exp %172 : vector<8x128xf32>
    %cst_87 = arith.constant 1.000000e+00 : f32
    %174 = vector.broadcast %cst_87 : f32 to vector<8x128xf32>
    %175 = arith.addf %174, %173 : vector<8x128xf32>
    %176 = arith.divf %174, %175 : vector<8x128xf32>
    %177 = vector.extract_strided_slice %170 {offsets = [0, 128], sizes = [8, 128], strides = [1, 1]} : vector<8x512xf32> to vector<8x128xf32>
    %178 = arith.negf %177 : vector<8x128xf32>
    %179 = math.exp %178 : vector<8x128xf32>
    %cst_88 = arith.constant 1.000000e+00 : f32
    %180 = vector.broadcast %cst_88 : f32 to vector<8x128xf32>
    %181 = arith.addf %180, %179 : vector<8x128xf32>
    %182 = arith.divf %180, %181 : vector<8x128xf32>
    %183 = vector.extract_strided_slice %170 {offsets = [0, 256], sizes = [8, 128], strides = [1, 1]} : vector<8x512xf32> to vector<8x128xf32>
    %184 = math.tanh %183 : vector<8x128xf32>
    %185 = vector.extract_strided_slice %170 {offsets = [0, 384], sizes = [8, 128], strides = [1, 1]} : vector<8x512xf32> to vector<8x128xf32>
    %186 = arith.negf %185 : vector<8x128xf32>
    %187 = math.exp %186 : vector<8x128xf32>
    %cst_89 = arith.constant 1.000000e+00 : f32
    %188 = vector.broadcast %cst_89 : f32 to vector<8x128xf32>
    %189 = arith.addf %188, %187 : vector<8x128xf32>
    %190 = arith.divf %188, %189 : vector<8x128xf32>
    %c0_90 = arith.constant 0 : index
    %c0_91 = arith.constant 0 : index
    %191 = vector.load %arg14[%c0_90, %c0_91] : memref<8x128xf32, #tpu.memory_space<vmem>>, vector<8x128xf32>
    %192 = arith.mulf %182, %191 : vector<8x128xf32>
    %193 = arith.mulf %176, %184 : vector<8x128xf32>
    %194 = arith.addf %192, %193 : vector<8x128xf32>
    %195 = math.tanh %194 : vector<8x128xf32>
    %196 = arith.mulf %190, %195 : vector<8x128xf32>
    %c0_92 = arith.constant 0 : index
    %c0_93 = arith.constant 0 : index
    %197 = vector.load %arg14[%c0_92, %c0_93] : memref<8x128xf32, #tpu.memory_space<vmem>>, vector<8x128xf32>
    tpu.vector_store %arg14[%c0_92, %c0_93], %194 {strides = array<i32>} : memref<8x128xf32, #tpu.memory_space<vmem>>, vector<8x128xf32>,
    %c0_94 = arith.constant 0 : index
    %c0_95 = arith.constant 0 : index
    %198 = vector.load %arg13[%c0_94, %c0_95] : memref<8x128xf32, #tpu.memory_space<vmem>>, vector<8x128xf32>
    tpu.vector_store %arg13[%c0_94, %c0_95], %196 {strides = array<i32>} : memref<8x128xf32, #tpu.memory_space<vmem>>, vector<8x128xf32>,
    %199 = arith.index_cast %164 : i32 to index
    %c0_96 = arith.constant 0 : index
    %200 = vector.load %arg12[%199, %c0_96] : memref<64x128xf32, #tpu.memory_space<vmem>>, vector<8x128xf32>
    tpu.vector_store %arg12[%199, %c0_96], %196 {strides = array<i32>} : memref<64x128xf32, #tpu.memory_space<vmem>>, vector<8x128xf32>,
    %c5_i32 = arith.constant 5 : i32
    %c8_i32_97 = arith.constant 8 : i32
    %201 = arith.muli %c5_i32, %c8_i32_97 : i32
    %202 = tpu.assume_multiple %201, 8 : i32
    %203 = arith.index_cast %202 : i32 to index
    %c0_98 = arith.constant 0 : index
    %204 = vector.load %arg11[%203, %c0_98] : memref<64x512xf32, #tpu.memory_space<vmem>>, vector<8x512xf32>
    %c0_99 = arith.constant 0 : index
    %c0_100 = arith.constant 0 : index
    %205 = vector.load %arg13[%c0_99, %c0_100] : memref<8x128xf32, #tpu.memory_space<vmem>>, vector<8x128xf32>
    %c0_101 = arith.constant 0 : index
    %c0_102 = arith.constant 0 : index
    %206 = vector.load %arg3[%c0_101, %c0_102] : memref<128x512xf32, #tpu.memory_space<vmem>>, vector<128x512xf32>
    %cst_103 = arith.constant dense<0.000000e+00> : vector<8x512xf32>
    %207 = tpu.matmul %205, %206, %cst_103 {dimension_numbers = #tpu.dot_dimension_numbers<[1], [0], [0], [1], [0, 0, 1, 1], [], []>} : vector<8x128xf32>, vector<128x512xf32>, vector<8x512xf32> -> vector<8x512xf32>
    %208 = arith.addf %204, %207 : vector<8x512xf32>
    %209 = vector.extract_strided_slice %208 {offsets = [0, 0], sizes = [8, 128], strides = [1, 1]} : vector<8x512xf32> to vector<8x128xf32>
    %210 = arith.negf %209 : vector<8x128xf32>
    %211 = math.exp %210 : vector<8x128xf32>
    %cst_104 = arith.constant 1.000000e+00 : f32
    %212 = vector.broadcast %cst_104 : f32 to vector<8x128xf32>
    %213 = arith.addf %212, %211 : vector<8x128xf32>
    %214 = arith.divf %212, %213 : vector<8x128xf32>
    %215 = vector.extract_strided_slice %208 {offsets = [0, 128], sizes = [8, 128], strides = [1, 1]} : vector<8x512xf32> to vector<8x128xf32>
    %216 = arith.negf %215 : vector<8x128xf32>
    %217 = math.exp %216 : vector<8x128xf32>
    %cst_105 = arith.constant 1.000000e+00 : f32
    %218 = vector.broadcast %cst_105 : f32 to vector<8x128xf32>
    %219 = arith.addf %218, %217 : vector<8x128xf32>
    %220 = arith.divf %218, %219 : vector<8x128xf32>
    %221 = vector.extract_strided_slice %208 {offsets = [0, 256], sizes = [8, 128], strides = [1, 1]} : vector<8x512xf32> to vector<8x128xf32>
    %222 = math.tanh %221 : vector<8x128xf32>
    %223 = vector.extract_strided_slice %208 {offsets = [0, 384], sizes = [8, 128], strides = [1, 1]} : vector<8x512xf32> to vector<8x128xf32>
    %224 = arith.negf %223 : vector<8x128xf32>
    %225 = math.exp %224 : vector<8x128xf32>
    %cst_106 = arith.constant 1.000000e+00 : f32
    %226 = vector.broadcast %cst_106 : f32 to vector<8x128xf32>
    %227 = arith.addf %226, %225 : vector<8x128xf32>
    %228 = arith.divf %226, %227 : vector<8x128xf32>
    %c0_107 = arith.constant 0 : index
    %c0_108 = arith.constant 0 : index
    %229 = vector.load %arg14[%c0_107, %c0_108] : memref<8x128xf32, #tpu.memory_space<vmem>>, vector<8x128xf32>
    %230 = arith.mulf %220, %229 : vector<8x128xf32>
    %231 = arith.mulf %214, %222 : vector<8x128xf32>
    %232 = arith.addf %230, %231 : vector<8x128xf32>
    %233 = math.tanh %232 : vector<8x128xf32>
    %234 = arith.mulf %228, %233 : vector<8x128xf32>
    %c0_109 = arith.constant 0 : index
    %c0_110 = arith.constant 0 : index
    %235 = vector.load %arg14[%c0_109, %c0_110] : memref<8x128xf32, #tpu.memory_space<vmem>>, vector<8x128xf32>
    tpu.vector_store %arg14[%c0_109, %c0_110], %232 {strides = array<i32>} : memref<8x128xf32, #tpu.memory_space<vmem>>, vector<8x128xf32>,
    %c0_111 = arith.constant 0 : index
    %c0_112 = arith.constant 0 : index
    %236 = vector.load %arg13[%c0_111, %c0_112] : memref<8x128xf32, #tpu.memory_space<vmem>>, vector<8x128xf32>
    tpu.vector_store %arg13[%c0_111, %c0_112], %234 {strides = array<i32>} : memref<8x128xf32, #tpu.memory_space<vmem>>, vector<8x128xf32>,
    %237 = arith.index_cast %202 : i32 to index
    %c0_113 = arith.constant 0 : index
    %238 = vector.load %arg12[%237, %c0_113] : memref<64x128xf32, #tpu.memory_space<vmem>>, vector<8x128xf32>
    tpu.vector_store %arg12[%237, %c0_113], %234 {strides = array<i32>} : memref<64x128xf32, #tpu.memory_space<vmem>>, vector<8x128xf32>,
    %c6_i32 = arith.constant 6 : i32
    %c8_i32_114 = arith.constant 8 : i32
    %239 = arith.muli %c6_i32, %c8_i32_114 : i32
    %240 = tpu.assume_multiple %239, 8 : i32
    %241 = arith.index_cast %240 : i32 to index
    %c0_115 = arith.constant 0 : index
    %242 = vector.load %arg11[%241, %c0_115] : memref<64x512xf32, #tpu.memory_space<vmem>>, vector<8x512xf32>
    %c0_116 = arith.constant 0 : index
    %c0_117 = arith.constant 0 : index
    %243 = vector.load %arg13[%c0_116, %c0_117] : memref<8x128xf32, #tpu.memory_space<vmem>>, vector<8x128xf32>
    %c0_118 = arith.constant 0 : index
    %c0_119 = arith.constant 0 : index
    %244 = vector.load %arg3[%c0_118, %c0_119] : memref<128x512xf32, #tpu.memory_space<vmem>>, vector<128x512xf32>
    %cst_120 = arith.constant dense<0.000000e+00> : vector<8x512xf32>
    %245 = tpu.matmul %243, %244, %cst_120 {dimension_numbers = #tpu.dot_dimension_numbers<[1], [0], [0], [1], [0, 0, 1, 1], [], []>} : vector<8x128xf32>, vector<128x512xf32>, vector<8x512xf32> -> vector<8x512xf32>
    %246 = arith.addf %242, %245 : vector<8x512xf32>
    %247 = vector.extract_strided_slice %246 {offsets = [0, 0], sizes = [8, 128], strides = [1, 1]} : vector<8x512xf32> to vector<8x128xf32>
    %248 = arith.negf %247 : vector<8x128xf32>
    %249 = math.exp %248 : vector<8x128xf32>
    %cst_121 = arith.constant 1.000000e+00 : f32
    %250 = vector.broadcast %cst_121 : f32 to vector<8x128xf32>
    %251 = arith.addf %250, %249 : vector<8x128xf32>
    %252 = arith.divf %250, %251 : vector<8x128xf32>
    %253 = vector.extract_strided_slice %246 {offsets = [0, 128], sizes = [8, 128], strides = [1, 1]} : vector<8x512xf32> to vector<8x128xf32>
    %254 = arith.negf %253 : vector<8x128xf32>
    %255 = math.exp %254 : vector<8x128xf32>
    %cst_122 = arith.constant 1.000000e+00 : f32
    %256 = vector.broadcast %cst_122 : f32 to vector<8x128xf32>
    %257 = arith.addf %256, %255 : vector<8x128xf32>
    %258 = arith.divf %256, %257 : vector<8x128xf32>
    %259 = vector.extract_strided_slice %246 {offsets = [0, 256], sizes = [8, 128], strides = [1, 1]} : vector<8x512xf32> to vector<8x128xf32>
    %260 = math.tanh %259 : vector<8x128xf32>
    %261 = vector.extract_strided_slice %246 {offsets = [0, 384], sizes = [8, 128], strides = [1, 1]} : vector<8x512xf32> to vector<8x128xf32>
    %262 = arith.negf %261 : vector<8x128xf32>
    %263 = math.exp %262 : vector<8x128xf32>
    %cst_123 = arith.constant 1.000000e+00 : f32
    %264 = vector.broadcast %cst_123 : f32 to vector<8x128xf32>
    %265 = arith.addf %264, %263 : vector<8x128xf32>
    %266 = arith.divf %264, %265 : vector<8x128xf32>
    %c0_124 = arith.constant 0 : index
    %c0_125 = arith.constant 0 : index
    %267 = vector.load %arg14[%c0_124, %c0_125] : memref<8x128xf32, #tpu.memory_space<vmem>>, vector<8x128xf32>
    %268 = arith.mulf %258, %267 : vector<8x128xf32>
    %269 = arith.mulf %252, %260 : vector<8x128xf32>
    %270 = arith.addf %268, %269 : vector<8x128xf32>
    %271 = math.tanh %270 : vector<8x128xf32>
    %272 = arith.mulf %266, %271 : vector<8x128xf32>
    %c0_126 = arith.constant 0 : index
    %c0_127 = arith.constant 0 : index
    %273 = vector.load %arg14[%c0_126, %c0_127] : memref<8x128xf32, #tpu.memory_space<vmem>>, vector<8x128xf32>
    tpu.vector_store %arg14[%c0_126, %c0_127], %270 {strides = array<i32>} : memref<8x128xf32, #tpu.memory_space<vmem>>, vector<8x128xf32>,
    %c0_128 = arith.constant 0 : index
    %c0_129 = arith.constant 0 : index
    %274 = vector.load %arg13[%c0_128, %c0_129] : memref<8x128xf32, #tpu.memory_space<vmem>>, vector<8x128xf32>
    tpu.vector_store %arg13[%c0_128, %c0_129], %272 {strides = array<i32>} : memref<8x128xf32, #tpu.memory_space<vmem>>, vector<8x128xf32>,
    %275 = arith.index_cast %240 : i32 to index
    %c0_130 = arith.constant 0 : index
    %276 = vector.load %arg12[%275, %c0_130] : memref<64x128xf32, #tpu.memory_space<vmem>>, vector<8x128xf32>
    tpu.vector_store %arg12[%275, %c0_130], %272 {strides = array<i32>} : memref<64x128xf32, #tpu.memory_space<vmem>>, vector<8x128xf32>,
    %c7_i32 = arith.constant 7 : i32
    %c8_i32_131 = arith.constant 8 : i32
    %277 = arith.muli %c7_i32, %c8_i32_131 : i32
    %278 = tpu.assume_multiple %277, 8 : i32
    %279 = arith.index_cast %278 : i32 to index
    %c0_132 = arith.constant 0 : index
    %280 = vector.load %arg11[%279, %c0_132] : memref<64x512xf32, #tpu.memory_space<vmem>>, vector<8x512xf32>
    %c0_133 = arith.constant 0 : index
    %c0_134 = arith.constant 0 : index
    %281 = vector.load %arg13[%c0_133, %c0_134] : memref<8x128xf32, #tpu.memory_space<vmem>>, vector<8x128xf32>
    %c0_135 = arith.constant 0 : index
    %c0_136 = arith.constant 0 : index
    %282 = vector.load %arg3[%c0_135, %c0_136] : memref<128x512xf32, #tpu.memory_space<vmem>>, vector<128x512xf32>
    %cst_137 = arith.constant dense<0.000000e+00> : vector<8x512xf32>
    %283 = tpu.matmul %281, %282, %cst_137 {dimension_numbers = #tpu.dot_dimension_numbers<[1], [0], [0], [1], [0, 0, 1, 1], [], []>} : vector<8x128xf32>, vector<128x512xf32>, vector<8x512xf32> -> vector<8x512xf32>
    %284 = arith.addf %280, %283 : vector<8x512xf32>
    %285 = vector.extract_strided_slice %284 {offsets = [0, 0], sizes = [8, 128], strides = [1, 1]} : vector<8x512xf32> to vector<8x128xf32>
    %286 = arith.negf %285 : vector<8x128xf32>
    %287 = math.exp %286 : vector<8x128xf32>
    %cst_138 = arith.constant 1.000000e+00 : f32
    %288 = vector.broadcast %cst_138 : f32 to vector<8x128xf32>
    %289 = arith.addf %288, %287 : vector<8x128xf32>
    %290 = arith.divf %288, %289 : vector<8x128xf32>
    %291 = vector.extract_strided_slice %284 {offsets = [0, 128], sizes = [8, 128], strides = [1, 1]} : vector<8x512xf32> to vector<8x128xf32>
    %292 = arith.negf %291 : vector<8x128xf32>
    %293 = math.exp %292 : vector<8x128xf32>
    %cst_139 = arith.constant 1.000000e+00 : f32
    %294 = vector.broadcast %cst_139 : f32 to vector<8x128xf32>
    %295 = arith.addf %294, %293 : vector<8x128xf32>
    %296 = arith.divf %294, %295 : vector<8x128xf32>
    %297 = vector.extract_strided_slice %284 {offsets = [0, 256], sizes = [8, 128], strides = [1, 1]} : vector<8x512xf32> to vector<8x128xf32>
    %298 = math.tanh %297 : vector<8x128xf32>
    %299 = vector.extract_strided_slice %284 {offsets = [0, 384], sizes = [8, 128], strides = [1, 1]} : vector<8x512xf32> to vector<8x128xf32>
    %300 = arith.negf %299 : vector<8x128xf32>
    %301 = math.exp %300 : vector<8x128xf32>
    %cst_140 = arith.constant 1.000000e+00 : f32
    %302 = vector.broadcast %cst_140 : f32 to vector<8x128xf32>
    %303 = arith.addf %302, %301 : vector<8x128xf32>
    %304 = arith.divf %302, %303 : vector<8x128xf32>
    %c0_141 = arith.constant 0 : index
    %c0_142 = arith.constant 0 : index
    %305 = vector.load %arg14[%c0_141, %c0_142] : memref<8x128xf32, #tpu.memory_space<vmem>>, vector<8x128xf32>
    %306 = arith.mulf %296, %305 : vector<8x128xf32>
    %307 = arith.mulf %290, %298 : vector<8x128xf32>
    %308 = arith.addf %306, %307 : vector<8x128xf32>
    %309 = math.tanh %308 : vector<8x128xf32>
    %310 = arith.mulf %304, %309 : vector<8x128xf32>
    %c0_143 = arith.constant 0 : index
    %c0_144 = arith.constant 0 : index
    %311 = vector.load %arg14[%c0_143, %c0_144] : memref<8x128xf32, #tpu.memory_space<vmem>>, vector<8x128xf32>
    tpu.vector_store %arg14[%c0_143, %c0_144], %308 {strides = array<i32>} : memref<8x128xf32, #tpu.memory_space<vmem>>, vector<8x128xf32>,
    %c0_145 = arith.constant 0 : index
    %c0_146 = arith.constant 0 : index
    %312 = vector.load %arg13[%c0_145, %c0_146] : memref<8x128xf32, #tpu.memory_space<vmem>>, vector<8x128xf32>
    tpu.vector_store %arg13[%c0_145, %c0_146], %310 {strides = array<i32>} : memref<8x128xf32, #tpu.memory_space<vmem>>, vector<8x128xf32>,
    %313 = arith.index_cast %278 : i32 to index
    %c0_147 = arith.constant 0 : index
    %314 = vector.load %arg12[%313, %c0_147] : memref<64x128xf32, #tpu.memory_space<vmem>>, vector<8x128xf32>
    tpu.vector_store %arg12[%313, %c0_147], %310 {strides = array<i32>} : memref<64x128xf32, #tpu.memory_space<vmem>>, vector<8x128xf32>,
    %c8_i32_148 = arith.constant 8 : i32
    %c0_149 = arith.constant 0 : index
    %c0_150 = arith.constant 0 : index
    %315 = vector.load %arg12[%c0_149, %c0_150] : memref<64x128xf32, #tpu.memory_space<vmem>>, vector<64x128xf32>
    %c0_151 = arith.constant 0 : index
    %c0_152 = arith.constant 0 : index
    %316 = vector.load %arg5[%c0_151, %c0_152] : memref<128x512xf32, #tpu.memory_space<vmem>>, vector<128x512xf32>
    %cst_153 = arith.constant dense<0.000000e+00> : vector<64x512xf32>
    %317 = tpu.matmul %315, %316, %cst_153 {dimension_numbers = #tpu.dot_dimension_numbers<[1], [0], [0], [1], [0, 0, 1, 1], [], []>} : vector<64x128xf32>, vector<128x512xf32>, vector<64x512xf32> -> vector<64x512xf32>
    %c0_154 = arith.constant 0 : index
    %c0_155 = arith.constant 0 : index
    %318 = vector.load %arg7[%c0_154, %c0_155] : memref<1x512xf32, #tpu.memory_space<vmem>>, vector<1x512xf32>
    %319 = vector.broadcast %318 : vector<1x512xf32> to vector<64x512xf32>
    %320 = arith.addf %317, %319 : vector<64x512xf32>
    %c0_156 = arith.constant 0 : index
    %c0_157 = arith.constant 0 : index
    %321 = vector.load %arg11[%c0_156, %c0_157] : memref<64x512xf32, #tpu.memory_space<vmem>>, vector<64x512xf32>
    tpu.vector_store %arg11[%c0_156, %c0_157], %320 {strides = array<i32>} : memref<64x512xf32, #tpu.memory_space<vmem>>, vector<64x512xf32>,
    %cst_158 = arith.constant 0.000000e+00 : f32
    %322 = vector.broadcast %cst_158 : f32 to vector<8x128xf32>
    %c0_159 = arith.constant 0 : index
    %c0_160 = arith.constant 0 : index
    %323 = vector.load %arg13[%c0_159, %c0_160] : memref<8x128xf32, #tpu.memory_space<vmem>>, vector<8x128xf32>
    tpu.vector_store %arg13[%c0_159, %c0_160], %322 {strides = array<i32>} : memref<8x128xf32, #tpu.memory_space<vmem>>, vector<8x128xf32>,
    %cst_161 = arith.constant 0.000000e+00 : f32
    %324 = vector.broadcast %cst_161 : f32 to vector<8x128xf32>
    %c0_162 = arith.constant 0 : index
    %c0_163 = arith.constant 0 : index
    %325 = vector.load %arg14[%c0_162, %c0_163] : memref<8x128xf32, #tpu.memory_space<vmem>>, vector<8x128xf32>
    tpu.vector_store %arg14[%c0_162, %c0_163], %324 {strides = array<i32>} : memref<8x128xf32, #tpu.memory_space<vmem>>, vector<8x128xf32>,
    %c0_i32_164 = arith.constant 0 : i32
    %c8_i32_165 = arith.constant 8 : i32
    %326 = arith.muli %c0_i32_164, %c8_i32_165 : i32
    %327 = tpu.assume_multiple %326, 8 : i32
    %328 = arith.index_cast %327 : i32 to index
    %c0_166 = arith.constant 0 : index
    %329 = vector.load %arg11[%328, %c0_166] : memref<64x512xf32, #tpu.memory_space<vmem>>, vector<8x512xf32>
    %c0_167 = arith.constant 0 : index
    %c0_168 = arith.constant 0 : index
    %330 = vector.load %arg13[%c0_167, %c0_168] : memref<8x128xf32, #tpu.memory_space<vmem>>, vector<8x128xf32>
    %c0_169 = arith.constant 0 : index
    %c0_170 = arith.constant 0 : index
    %331 = vector.load %arg6[%c0_169, %c0_170] : memref<128x512xf32, #tpu.memory_space<vmem>>, vector<128x512xf32>
    %cst_171 = arith.constant dense<0.000000e+00> : vector<8x512xf32>
    %332 = tpu.matmul %330, %331, %cst_171 {dimension_numbers = #tpu.dot_dimension_numbers<[1], [0], [0], [1], [0, 0, 1, 1], [], []>} : vector<8x128xf32>, vector<128x512xf32>, vector<8x512xf32> -> vector<8x512xf32>
    %333 = arith.addf %329, %332 : vector<8x512xf32>
    %334 = vector.extract_strided_slice %333 {offsets = [0, 0], sizes = [8, 128], strides = [1, 1]} : vector<8x512xf32> to vector<8x128xf32>
    %335 = arith.negf %334 : vector<8x128xf32>
    %336 = math.exp %335 : vector<8x128xf32>
    %cst_172 = arith.constant 1.000000e+00 : f32
    %337 = vector.broadcast %cst_172 : f32 to vector<8x128xf32>
    %338 = arith.addf %337, %336 : vector<8x128xf32>
    %339 = arith.divf %337, %338 : vector<8x128xf32>
    %340 = vector.extract_strided_slice %333 {offsets = [0, 128], sizes = [8, 128], strides = [1, 1]} : vector<8x512xf32> to vector<8x128xf32>
    %341 = arith.negf %340 : vector<8x128xf32>
    %342 = math.exp %341 : vector<8x128xf32>
    %cst_173 = arith.constant 1.000000e+00 : f32
    %343 = vector.broadcast %cst_173 : f32 to vector<8x128xf32>
    %344 = arith.addf %343, %342 : vector<8x128xf32>
    %345 = arith.divf %343, %344 : vector<8x128xf32>
    %346 = vector.extract_strided_slice %333 {offsets = [0, 256], sizes = [8, 128], strides = [1, 1]} : vector<8x512xf32> to vector<8x128xf32>
    %347 = math.tanh %346 : vector<8x128xf32>
    %348 = vector.extract_strided_slice %333 {offsets = [0, 384], sizes = [8, 128], strides = [1, 1]} : vector<8x512xf32> to vector<8x128xf32>
    %349 = arith.negf %348 : vector<8x128xf32>
    %350 = math.exp %349 : vector<8x128xf32>
    %cst_174 = arith.constant 1.000000e+00 : f32
    %351 = vector.broadcast %cst_174 : f32 to vector<8x128xf32>
    %352 = arith.addf %351, %350 : vector<8x128xf32>
    %353 = arith.divf %351, %352 : vector<8x128xf32>
    %c0_175 = arith.constant 0 : index
    %c0_176 = arith.constant 0 : index
    %354 = vector.load %arg14[%c0_175, %c0_176] : memref<8x128xf32, #tpu.memory_space<vmem>>, vector<8x128xf32>
    %355 = arith.mulf %345, %354 : vector<8x128xf32>
    %356 = arith.mulf %339, %347 : vector<8x128xf32>
    %357 = arith.addf %355, %356 : vector<8x128xf32>
    %358 = math.tanh %357 : vector<8x128xf32>
    %359 = arith.mulf %353, %358 : vector<8x128xf32>
    %c0_177 = arith.constant 0 : index
    %c0_178 = arith.constant 0 : index
    %360 = vector.load %arg14[%c0_177, %c0_178] : memref<8x128xf32, #tpu.memory_space<vmem>>, vector<8x128xf32>
    tpu.vector_store %arg14[%c0_177, %c0_178], %357 {strides = array<i32>} : memref<8x128xf32, #tpu.memory_space<vmem>>, vector<8x128xf32>,
    %c0_179 = arith.constant 0 : index
    %c0_180 = arith.constant 0 : index
    %361 = vector.load %arg13[%c0_179, %c0_180] : memref<8x128xf32, #tpu.memory_space<vmem>>, vector<8x128xf32>
    tpu.vector_store %arg13[%c0_179, %c0_180], %359 {strides = array<i32>} : memref<8x128xf32, #tpu.memory_space<vmem>>, vector<8x128xf32>,
    %c1_i32_181 = arith.constant 1 : i32
    %c8_i32_182 = arith.constant 8 : i32
    %362 = arith.muli %c1_i32_181, %c8_i32_182 : i32
    %363 = tpu.assume_multiple %362, 8 : i32
    %364 = arith.index_cast %363 : i32 to index
    %c0_183 = arith.constant 0 : index
    %365 = vector.load %arg11[%364, %c0_183] : memref<64x512xf32, #tpu.memory_space<vmem>>, vector<8x512xf32>
    %c0_184 = arith.constant 0 : index
    %c0_185 = arith.constant 0 : index
    %366 = vector.load %arg13[%c0_184, %c0_185] : memref<8x128xf32, #tpu.memory_space<vmem>>, vector<8x128xf32>
    %c0_186 = arith.constant 0 : index
    %c0_187 = arith.constant 0 : index
    %367 = vector.load %arg6[%c0_186, %c0_187] : memref<128x512xf32, #tpu.memory_space<vmem>>, vector<128x512xf32>
    %cst_188 = arith.constant dense<0.000000e+00> : vector<8x512xf32>
    %368 = tpu.matmul %366, %367, %cst_188 {dimension_numbers = #tpu.dot_dimension_numbers<[1], [0], [0], [1], [0, 0, 1, 1], [], []>} : vector<8x128xf32>, vector<128x512xf32>, vector<8x512xf32> -> vector<8x512xf32>
    %369 = arith.addf %365, %368 : vector<8x512xf32>
    %370 = vector.extract_strided_slice %369 {offsets = [0, 0], sizes = [8, 128], strides = [1, 1]} : vector<8x512xf32> to vector<8x128xf32>
    %371 = arith.negf %370 : vector<8x128xf32>
    %372 = math.exp %371 : vector<8x128xf32>
    %cst_189 = arith.constant 1.000000e+00 : f32
    %373 = vector.broadcast %cst_189 : f32 to vector<8x128xf32>
    %374 = arith.addf %373, %372 : vector<8x128xf32>
    %375 = arith.divf %373, %374 : vector<8x128xf32>
    %376 = vector.extract_strided_slice %369 {offsets = [0, 128], sizes = [8, 128], strides = [1, 1]} : vector<8x512xf32> to vector<8x128xf32>
    %377 = arith.negf %376 : vector<8x128xf32>
    %378 = math.exp %377 : vector<8x128xf32>
    %cst_190 = arith.constant 1.000000e+00 : f32
    %379 = vector.broadcast %cst_190 : f32 to vector<8x128xf32>
    %380 = arith.addf %379, %378 : vector<8x128xf32>
    %381 = arith.divf %379, %380 : vector<8x128xf32>
    %382 = vector.extract_strided_slice %369 {offsets = [0, 256], sizes = [8, 128], strides = [1, 1]} : vector<8x512xf32> to vector<8x128xf32>
    %383 = math.tanh %382 : vector<8x128xf32>
    %384 = vector.extract_strided_slice %369 {offsets = [0, 384], sizes = [8, 128], strides = [1, 1]} : vector<8x512xf32> to vector<8x128xf32>
    %385 = arith.negf %384 : vector<8x128xf32>
    %386 = math.exp %385 : vector<8x128xf32>
    %cst_191 = arith.constant 1.000000e+00 : f32
    %387 = vector.broadcast %cst_191 : f32 to vector<8x128xf32>
    %388 = arith.addf %387, %386 : vector<8x128xf32>
    %389 = arith.divf %387, %388 : vector<8x128xf32>
    %c0_192 = arith.constant 0 : index
    %c0_193 = arith.constant 0 : index
    %390 = vector.load %arg14[%c0_192, %c0_193] : memref<8x128xf32, #tpu.memory_space<vmem>>, vector<8x128xf32>
    %391 = arith.mulf %381, %390 : vector<8x128xf32>
    %392 = arith.mulf %375, %383 : vector<8x128xf32>
    %393 = arith.addf %391, %392 : vector<8x128xf32>
    %394 = math.tanh %393 : vector<8x128xf32>
    %395 = arith.mulf %389, %394 : vector<8x128xf32>
    %c0_194 = arith.constant 0 : index
    %c0_195 = arith.constant 0 : index
    %396 = vector.load %arg14[%c0_194, %c0_195] : memref<8x128xf32, #tpu.memory_space<vmem>>, vector<8x128xf32>
    tpu.vector_store %arg14[%c0_194, %c0_195], %393 {strides = array<i32>} : memref<8x128xf32, #tpu.memory_space<vmem>>, vector<8x128xf32>,
    %c0_196 = arith.constant 0 : index
    %c0_197 = arith.constant 0 : index
    %397 = vector.load %arg13[%c0_196, %c0_197] : memref<8x128xf32, #tpu.memory_space<vmem>>, vector<8x128xf32>
    tpu.vector_store %arg13[%c0_196, %c0_197], %395 {strides = array<i32>} : memref<8x128xf32, #tpu.memory_space<vmem>>, vector<8x128xf32>,
    %c2_i32_198 = arith.constant 2 : i32
    %c8_i32_199 = arith.constant 8 : i32
    %398 = arith.muli %c2_i32_198, %c8_i32_199 : i32
    %399 = tpu.assume_multiple %398, 8 : i32
    %400 = arith.index_cast %399 : i32 to index
    %c0_200 = arith.constant 0 : index
    %401 = vector.load %arg11[%400, %c0_200] : memref<64x512xf32, #tpu.memory_space<vmem>>, vector<8x512xf32>
    %c0_201 = arith.constant 0 : index
    %c0_202 = arith.constant 0 : index
    %402 = vector.load %arg13[%c0_201, %c0_202] : memref<8x128xf32, #tpu.memory_space<vmem>>, vector<8x128xf32>
    %c0_203 = arith.constant 0 : index
    %c0_204 = arith.constant 0 : index
    %403 = vector.load %arg6[%c0_203, %c0_204] : memref<128x512xf32, #tpu.memory_space<vmem>>, vector<128x512xf32>
    %cst_205 = arith.constant dense<0.000000e+00> : vector<8x512xf32>
    %404 = tpu.matmul %402, %403, %cst_205 {dimension_numbers = #tpu.dot_dimension_numbers<[1], [0], [0], [1], [0, 0, 1, 1], [], []>} : vector<8x128xf32>, vector<128x512xf32>, vector<8x512xf32> -> vector<8x512xf32>
    %405 = arith.addf %401, %404 : vector<8x512xf32>
    %406 = vector.extract_strided_slice %405 {offsets = [0, 0], sizes = [8, 128], strides = [1, 1]} : vector<8x512xf32> to vector<8x128xf32>
    %407 = arith.negf %406 : vector<8x128xf32>
    %408 = math.exp %407 : vector<8x128xf32>
    %cst_206 = arith.constant 1.000000e+00 : f32
    %409 = vector.broadcast %cst_206 : f32 to vector<8x128xf32>
    %410 = arith.addf %409, %408 : vector<8x128xf32>
    %411 = arith.divf %409, %410 : vector<8x128xf32>
    %412 = vector.extract_strided_slice %405 {offsets = [0, 128], sizes = [8, 128], strides = [1, 1]} : vector<8x512xf32> to vector<8x128xf32>
    %413 = arith.negf %412 : vector<8x128xf32>
    %414 = math.exp %413 : vector<8x128xf32>
    %cst_207 = arith.constant 1.000000e+00 : f32
    %415 = vector.broadcast %cst_207 : f32 to vector<8x128xf32>
    %416 = arith.addf %415, %414 : vector<8x128xf32>
    %417 = arith.divf %415, %416 : vector<8x128xf32>
    %418 = vector.extract_strided_slice %405 {offsets = [0, 256], sizes = [8, 128], strides = [1, 1]} : vector<8x512xf32> to vector<8x128xf32>
    %419 = math.tanh %418 : vector<8x128xf32>
    %420 = vector.extract_strided_slice %405 {offsets = [0, 384], sizes = [8, 128], strides = [1, 1]} : vector<8x512xf32> to vector<8x128xf32>
    %421 = arith.negf %420 : vector<8x128xf32>
    %422 = math.exp %421 : vector<8x128xf32>
    %cst_208 = arith.constant 1.000000e+00 : f32
    %423 = vector.broadcast %cst_208 : f32 to vector<8x128xf32>
    %424 = arith.addf %423, %422 : vector<8x128xf32>
    %425 = arith.divf %423, %424 : vector<8x128xf32>
    %c0_209 = arith.constant 0 : index
    %c0_210 = arith.constant 0 : index
    %426 = vector.load %arg14[%c0_209, %c0_210] : memref<8x128xf32, #tpu.memory_space<vmem>>, vector<8x128xf32>
    %427 = arith.mulf %417, %426 : vector<8x128xf32>
    %428 = arith.mulf %411, %419 : vector<8x128xf32>
    %429 = arith.addf %427, %428 : vector<8x128xf32>
    %430 = math.tanh %429 : vector<8x128xf32>
    %431 = arith.mulf %425, %430 : vector<8x128xf32>
    %c0_211 = arith.constant 0 : index
    %c0_212 = arith.constant 0 : index
    %432 = vector.load %arg14[%c0_211, %c0_212] : memref<8x128xf32, #tpu.memory_space<vmem>>, vector<8x128xf32>
    tpu.vector_store %arg14[%c0_211, %c0_212], %429 {strides = array<i32>} : memref<8x128xf32, #tpu.memory_space<vmem>>, vector<8x128xf32>,
    %c0_213 = arith.constant 0 : index
    %c0_214 = arith.constant 0 : index
    %433 = vector.load %arg13[%c0_213, %c0_214] : memref<8x128xf32, #tpu.memory_space<vmem>>, vector<8x128xf32>
    tpu.vector_store %arg13[%c0_213, %c0_214], %431 {strides = array<i32>} : memref<8x128xf32, #tpu.memory_space<vmem>>, vector<8x128xf32>,
    %c3_i32_215 = arith.constant 3 : i32
    %c8_i32_216 = arith.constant 8 : i32
    %434 = arith.muli %c3_i32_215, %c8_i32_216 : i32
    %435 = tpu.assume_multiple %434, 8 : i32
    %436 = arith.index_cast %435 : i32 to index
    %c0_217 = arith.constant 0 : index
    %437 = vector.load %arg11[%436, %c0_217] : memref<64x512xf32, #tpu.memory_space<vmem>>, vector<8x512xf32>
    %c0_218 = arith.constant 0 : index
    %c0_219 = arith.constant 0 : index
    %438 = vector.load %arg13[%c0_218, %c0_219] : memref<8x128xf32, #tpu.memory_space<vmem>>, vector<8x128xf32>
    %c0_220 = arith.constant 0 : index
    %c0_221 = arith.constant 0 : index
    %439 = vector.load %arg6[%c0_220, %c0_221] : memref<128x512xf32, #tpu.memory_space<vmem>>, vector<128x512xf32>
    %cst_222 = arith.constant dense<0.000000e+00> : vector<8x512xf32>
    %440 = tpu.matmul %438, %439, %cst_222 {dimension_numbers = #tpu.dot_dimension_numbers<[1], [0], [0], [1], [0, 0, 1, 1], [], []>} : vector<8x128xf32>, vector<128x512xf32>, vector<8x512xf32> -> vector<8x512xf32>
    %441 = arith.addf %437, %440 : vector<8x512xf32>
    %442 = vector.extract_strided_slice %441 {offsets = [0, 0], sizes = [8, 128], strides = [1, 1]} : vector<8x512xf32> to vector<8x128xf32>
    %443 = arith.negf %442 : vector<8x128xf32>
    %444 = math.exp %443 : vector<8x128xf32>
    %cst_223 = arith.constant 1.000000e+00 : f32
    %445 = vector.broadcast %cst_223 : f32 to vector<8x128xf32>
    %446 = arith.addf %445, %444 : vector<8x128xf32>
    %447 = arith.divf %445, %446 : vector<8x128xf32>
    %448 = vector.extract_strided_slice %441 {offsets = [0, 128], sizes = [8, 128], strides = [1, 1]} : vector<8x512xf32> to vector<8x128xf32>
    %449 = arith.negf %448 : vector<8x128xf32>
    %450 = math.exp %449 : vector<8x128xf32>
    %cst_224 = arith.constant 1.000000e+00 : f32
    %451 = vector.broadcast %cst_224 : f32 to vector<8x128xf32>
    %452 = arith.addf %451, %450 : vector<8x128xf32>
    %453 = arith.divf %451, %452 : vector<8x128xf32>
    %454 = vector.extract_strided_slice %441 {offsets = [0, 256], sizes = [8, 128], strides = [1, 1]} : vector<8x512xf32> to vector<8x128xf32>
    %455 = math.tanh %454 : vector<8x128xf32>
    %456 = vector.extract_strided_slice %441 {offsets = [0, 384], sizes = [8, 128], strides = [1, 1]} : vector<8x512xf32> to vector<8x128xf32>
    %457 = arith.negf %456 : vector<8x128xf32>
    %458 = math.exp %457 : vector<8x128xf32>
    %cst_225 = arith.constant 1.000000e+00 : f32
    %459 = vector.broadcast %cst_225 : f32 to vector<8x128xf32>
    %460 = arith.addf %459, %458 : vector<8x128xf32>
    %461 = arith.divf %459, %460 : vector<8x128xf32>
    %c0_226 = arith.constant 0 : index
    %c0_227 = arith.constant 0 : index
    %462 = vector.load %arg14[%c0_226, %c0_227] : memref<8x128xf32, #tpu.memory_space<vmem>>, vector<8x128xf32>
    %463 = arith.mulf %453, %462 : vector<8x128xf32>
    %464 = arith.mulf %447, %455 : vector<8x128xf32>
    %465 = arith.addf %463, %464 : vector<8x128xf32>
    %466 = math.tanh %465 : vector<8x128xf32>
    %467 = arith.mulf %461, %466 : vector<8x128xf32>
    %c0_228 = arith.constant 0 : index
    %c0_229 = arith.constant 0 : index
    %468 = vector.load %arg14[%c0_228, %c0_229] : memref<8x128xf32, #tpu.memory_space<vmem>>, vector<8x128xf32>
    tpu.vector_store %arg14[%c0_228, %c0_229], %465 {strides = array<i32>} : memref<8x128xf32, #tpu.memory_space<vmem>>, vector<8x128xf32>,
    %c0_230 = arith.constant 0 : index
    %c0_231 = arith.constant 0 : index
    %469 = vector.load %arg13[%c0_230, %c0_231] : memref<8x128xf32, #tpu.memory_space<vmem>>, vector<8x128xf32>
    tpu.vector_store %arg13[%c0_230, %c0_231], %467 {strides = array<i32>} : memref<8x128xf32, #tpu.memory_space<vmem>>, vector<8x128xf32>,
    %c4_i32_232 = arith.constant 4 : i32
    %c8_i32_233 = arith.constant 8 : i32
    %470 = arith.muli %c4_i32_232, %c8_i32_233 : i32
    %471 = tpu.assume_multiple %470, 8 : i32
    %472 = arith.index_cast %471 : i32 to index
    %c0_234 = arith.constant 0 : index
    %473 = vector.load %arg11[%472, %c0_234] : memref<64x512xf32, #tpu.memory_space<vmem>>, vector<8x512xf32>
    %c0_235 = arith.constant 0 : index
    %c0_236 = arith.constant 0 : index
    %474 = vector.load %arg13[%c0_235, %c0_236] : memref<8x128xf32, #tpu.memory_space<vmem>>, vector<8x128xf32>
    %c0_237 = arith.constant 0 : index
    %c0_238 = arith.constant 0 : index
    %475 = vector.load %arg6[%c0_237, %c0_238] : memref<128x512xf32, #tpu.memory_space<vmem>>, vector<128x512xf32>
    %cst_239 = arith.constant dense<0.000000e+00> : vector<8x512xf32>
    %476 = tpu.matmul %474, %475, %cst_239 {dimension_numbers = #tpu.dot_dimension_numbers<[1], [0], [0], [1], [0, 0, 1, 1], [], []>} : vector<8x128xf32>, vector<128x512xf32>, vector<8x512xf32> -> vector<8x512xf32>
    %477 = arith.addf %473, %476 : vector<8x512xf32>
    %478 = vector.extract_strided_slice %477 {offsets = [0, 0], sizes = [8, 128], strides = [1, 1]} : vector<8x512xf32> to vector<8x128xf32>
    %479 = arith.negf %478 : vector<8x128xf32>
    %480 = math.exp %479 : vector<8x128xf32>
    %cst_240 = arith.constant 1.000000e+00 : f32
    %481 = vector.broadcast %cst_240 : f32 to vector<8x128xf32>
    %482 = arith.addf %481, %480 : vector<8x128xf32>
    %483 = arith.divf %481, %482 : vector<8x128xf32>
    %484 = vector.extract_strided_slice %477 {offsets = [0, 128], sizes = [8, 128], strides = [1, 1]} : vector<8x512xf32> to vector<8x128xf32>
    %485 = arith.negf %484 : vector<8x128xf32>
    %486 = math.exp %485 : vector<8x128xf32>
    %cst_241 = arith.constant 1.000000e+00 : f32
    %487 = vector.broadcast %cst_241 : f32 to vector<8x128xf32>
    %488 = arith.addf %487, %486 : vector<8x128xf32>
    %489 = arith.divf %487, %488 : vector<8x128xf32>
    %490 = vector.extract_strided_slice %477 {offsets = [0, 256], sizes = [8, 128], strides = [1, 1]} : vector<8x512xf32> to vector<8x128xf32>
    %491 = math.tanh %490 : vector<8x128xf32>
    %492 = vector.extract_strided_slice %477 {offsets = [0, 384], sizes = [8, 128], strides = [1, 1]} : vector<8x512xf32> to vector<8x128xf32>
    %493 = arith.negf %492 : vector<8x128xf32>
    %494 = math.exp %493 : vector<8x128xf32>
    %cst_242 = arith.constant 1.000000e+00 : f32
    %495 = vector.broadcast %cst_242 : f32 to vector<8x128xf32>
    %496 = arith.addf %495, %494 : vector<8x128xf32>
    %497 = arith.divf %495, %496 : vector<8x128xf32>
    %c0_243 = arith.constant 0 : index
    %c0_244 = arith.constant 0 : index
    %498 = vector.load %arg14[%c0_243, %c0_244] : memref<8x128xf32, #tpu.memory_space<vmem>>, vector<8x128xf32>
    %499 = arith.mulf %489, %498 : vector<8x128xf32>
    %500 = arith.mulf %483, %491 : vector<8x128xf32>
    %501 = arith.addf %499, %500 : vector<8x128xf32>
    %502 = math.tanh %501 : vector<8x128xf32>
    %503 = arith.mulf %497, %502 : vector<8x128xf32>
    %c0_245 = arith.constant 0 : index
    %c0_246 = arith.constant 0 : index
    %504 = vector.load %arg14[%c0_245, %c0_246] : memref<8x128xf32, #tpu.memory_space<vmem>>, vector<8x128xf32>
    tpu.vector_store %arg14[%c0_245, %c0_246], %501 {strides = array<i32>} : memref<8x128xf32, #tpu.memory_space<vmem>>, vector<8x128xf32>,
    %c0_247 = arith.constant 0 : index
    %c0_248 = arith.constant 0 : index
    %505 = vector.load %arg13[%c0_247, %c0_248] : memref<8x128xf32, #tpu.memory_space<vmem>>, vector<8x128xf32>
    tpu.vector_store %arg13[%c0_247, %c0_248], %503 {strides = array<i32>} : memref<8x128xf32, #tpu.memory_space<vmem>>, vector<8x128xf32>,
    %c5_i32_249 = arith.constant 5 : i32
    %c8_i32_250 = arith.constant 8 : i32
    %506 = arith.muli %c5_i32_249, %c8_i32_250 : i32
    %507 = tpu.assume_multiple %506, 8 : i32
    %508 = arith.index_cast %507 : i32 to index
    %c0_251 = arith.constant 0 : index
    %509 = vector.load %arg11[%508, %c0_251] : memref<64x512xf32, #tpu.memory_space<vmem>>, vector<8x512xf32>
    %c0_252 = arith.constant 0 : index
    %c0_253 = arith.constant 0 : index
    %510 = vector.load %arg13[%c0_252, %c0_253] : memref<8x128xf32, #tpu.memory_space<vmem>>, vector<8x128xf32>
    %c0_254 = arith.constant 0 : index
    %c0_255 = arith.constant 0 : index
    %511 = vector.load %arg6[%c0_254, %c0_255] : memref<128x512xf32, #tpu.memory_space<vmem>>, vector<128x512xf32>
    %cst_256 = arith.constant dense<0.000000e+00> : vector<8x512xf32>
    %512 = tpu.matmul %510, %511, %cst_256 {dimension_numbers = #tpu.dot_dimension_numbers<[1], [0], [0], [1], [0, 0, 1, 1], [], []>} : vector<8x128xf32>, vector<128x512xf32>, vector<8x512xf32> -> vector<8x512xf32>
    %513 = arith.addf %509, %512 : vector<8x512xf32>
    %514 = vector.extract_strided_slice %513 {offsets = [0, 0], sizes = [8, 128], strides = [1, 1]} : vector<8x512xf32> to vector<8x128xf32>
    %515 = arith.negf %514 : vector<8x128xf32>
    %516 = math.exp %515 : vector<8x128xf32>
    %cst_257 = arith.constant 1.000000e+00 : f32
    %517 = vector.broadcast %cst_257 : f32 to vector<8x128xf32>
    %518 = arith.addf %517, %516 : vector<8x128xf32>
    %519 = arith.divf %517, %518 : vector<8x128xf32>
    %520 = vector.extract_strided_slice %513 {offsets = [0, 128], sizes = [8, 128], strides = [1, 1]} : vector<8x512xf32> to vector<8x128xf32>
    %521 = arith.negf %520 : vector<8x128xf32>
    %522 = math.exp %521 : vector<8x128xf32>
    %cst_258 = arith.constant 1.000000e+00 : f32
    %523 = vector.broadcast %cst_258 : f32 to vector<8x128xf32>
    %524 = arith.addf %523, %522 : vector<8x128xf32>
    %525 = arith.divf %523, %524 : vector<8x128xf32>
    %526 = vector.extract_strided_slice %513 {offsets = [0, 256], sizes = [8, 128], strides = [1, 1]} : vector<8x512xf32> to vector<8x128xf32>
    %527 = math.tanh %526 : vector<8x128xf32>
    %528 = vector.extract_strided_slice %513 {offsets = [0, 384], sizes = [8, 128], strides = [1, 1]} : vector<8x512xf32> to vector<8x128xf32>
    %529 = arith.negf %528 : vector<8x128xf32>
    %530 = math.exp %529 : vector<8x128xf32>
    %cst_259 = arith.constant 1.000000e+00 : f32
    %531 = vector.broadcast %cst_259 : f32 to vector<8x128xf32>
    %532 = arith.addf %531, %530 : vector<8x128xf32>
    %533 = arith.divf %531, %532 : vector<8x128xf32>
    %c0_260 = arith.constant 0 : index
    %c0_261 = arith.constant 0 : index
    %534 = vector.load %arg14[%c0_260, %c0_261] : memref<8x128xf32, #tpu.memory_space<vmem>>, vector<8x128xf32>
    %535 = arith.mulf %525, %534 : vector<8x128xf32>
    %536 = arith.mulf %519, %527 : vector<8x128xf32>
    %537 = arith.addf %535, %536 : vector<8x128xf32>
    %538 = math.tanh %537 : vector<8x128xf32>
    %539 = arith.mulf %533, %538 : vector<8x128xf32>
    %c0_262 = arith.constant 0 : index
    %c0_263 = arith.constant 0 : index
    %540 = vector.load %arg14[%c0_262, %c0_263] : memref<8x128xf32, #tpu.memory_space<vmem>>, vector<8x128xf32>
    tpu.vector_store %arg14[%c0_262, %c0_263], %537 {strides = array<i32>} : memref<8x128xf32, #tpu.memory_space<vmem>>, vector<8x128xf32>,
    %c0_264 = arith.constant 0 : index
    %c0_265 = arith.constant 0 : index
    %541 = vector.load %arg13[%c0_264, %c0_265] : memref<8x128xf32, #tpu.memory_space<vmem>>, vector<8x128xf32>
    tpu.vector_store %arg13[%c0_264, %c0_265], %539 {strides = array<i32>} : memref<8x128xf32, #tpu.memory_space<vmem>>, vector<8x128xf32>,
    %c6_i32_266 = arith.constant 6 : i32
    %c8_i32_267 = arith.constant 8 : i32
    %542 = arith.muli %c6_i32_266, %c8_i32_267 : i32
    %543 = tpu.assume_multiple %542, 8 : i32
    %544 = arith.index_cast %543 : i32 to index
    %c0_268 = arith.constant 0 : index
    %545 = vector.load %arg11[%544, %c0_268] : memref<64x512xf32, #tpu.memory_space<vmem>>, vector<8x512xf32>
    %c0_269 = arith.constant 0 : index
    %c0_270 = arith.constant 0 : index
    %546 = vector.load %arg13[%c0_269, %c0_270] : memref<8x128xf32, #tpu.memory_space<vmem>>, vector<8x128xf32>
    %c0_271 = arith.constant 0 : index
    %c0_272 = arith.constant 0 : index
    %547 = vector.load %arg6[%c0_271, %c0_272] : memref<128x512xf32, #tpu.memory_space<vmem>>, vector<128x512xf32>
    %cst_273 = arith.constant dense<0.000000e+00> : vector<8x512xf32>
    %548 = tpu.matmul %546, %547, %cst_273 {dimension_numbers = #tpu.dot_dimension_numbers<[1], [0], [0], [1], [0, 0, 1, 1], [], []>} : vector<8x128xf32>, vector<128x512xf32>, vector<8x512xf32> -> vector<8x512xf32>
    %549 = arith.addf %545, %548 : vector<8x512xf32>
    %550 = vector.extract_strided_slice %549 {offsets = [0, 0], sizes = [8, 128], strides = [1, 1]} : vector<8x512xf32> to vector<8x128xf32>
    %551 = arith.negf %550 : vector<8x128xf32>
    %552 = math.exp %551 : vector<8x128xf32>
    %cst_274 = arith.constant 1.000000e+00 : f32
    %553 = vector.broadcast %cst_274 : f32 to vector<8x128xf32>
    %554 = arith.addf %553, %552 : vector<8x128xf32>
    %555 = arith.divf %553, %554 : vector<8x128xf32>
    %556 = vector.extract_strided_slice %549 {offsets = [0, 128], sizes = [8, 128], strides = [1, 1]} : vector<8x512xf32> to vector<8x128xf32>
    %557 = arith.negf %556 : vector<8x128xf32>
    %558 = math.exp %557 : vector<8x128xf32>
    %cst_275 = arith.constant 1.000000e+00 : f32
    %559 = vector.broadcast %cst_275 : f32 to vector<8x128xf32>
    %560 = arith.addf %559, %558 : vector<8x128xf32>
    %561 = arith.divf %559, %560 : vector<8x128xf32>
    %562 = vector.extract_strided_slice %549 {offsets = [0, 256], sizes = [8, 128], strides = [1, 1]} : vector<8x512xf32> to vector<8x128xf32>
    %563 = math.tanh %562 : vector<8x128xf32>
    %564 = vector.extract_strided_slice %549 {offsets = [0, 384], sizes = [8, 128], strides = [1, 1]} : vector<8x512xf32> to vector<8x128xf32>
    %565 = arith.negf %564 : vector<8x128xf32>
    %566 = math.exp %565 : vector<8x128xf32>
    %cst_276 = arith.constant 1.000000e+00 : f32
    %567 = vector.broadcast %cst_276 : f32 to vector<8x128xf32>
    %568 = arith.addf %567, %566 : vector<8x128xf32>
    %569 = arith.divf %567, %568 : vector<8x128xf32>
    %c0_277 = arith.constant 0 : index
    %c0_278 = arith.constant 0 : index
    %570 = vector.load %arg14[%c0_277, %c0_278] : memref<8x128xf32, #tpu.memory_space<vmem>>, vector<8x128xf32>
    %571 = arith.mulf %561, %570 : vector<8x128xf32>
    %572 = arith.mulf %555, %563 : vector<8x128xf32>
    %573 = arith.addf %571, %572 : vector<8x128xf32>
    %574 = math.tanh %573 : vector<8x128xf32>
    %575 = arith.mulf %569, %574 : vector<8x128xf32>
    %c0_279 = arith.constant 0 : index
    %c0_280 = arith.constant 0 : index
    %576 = vector.load %arg14[%c0_279, %c0_280] : memref<8x128xf32, #tpu.memory_space<vmem>>, vector<8x128xf32>
    tpu.vector_store %arg14[%c0_279, %c0_280], %573 {strides = array<i32>} : memref<8x128xf32, #tpu.memory_space<vmem>>, vector<8x128xf32>,
    %c0_281 = arith.constant 0 : index
    %c0_282 = arith.constant 0 : index
    %577 = vector.load %arg13[%c0_281, %c0_282] : memref<8x128xf32, #tpu.memory_space<vmem>>, vector<8x128xf32>
    tpu.vector_store %arg13[%c0_281, %c0_282], %575 {strides = array<i32>} : memref<8x128xf32, #tpu.memory_space<vmem>>, vector<8x128xf32>,
    %c7_i32_283 = arith.constant 7 : i32
    %c8_i32_284 = arith.constant 8 : i32
    %578 = arith.muli %c7_i32_283, %c8_i32_284 : i32
    %579 = tpu.assume_multiple %578, 8 : i32
    %580 = arith.index_cast %579 : i32 to index
    %c0_285 = arith.constant 0 : index
    %581 = vector.load %arg11[%580, %c0_285] : memref<64x512xf32, #tpu.memory_space<vmem>>, vector<8x512xf32>
    %c0_286 = arith.constant 0 : index
    %c0_287 = arith.constant 0 : index
    %582 = vector.load %arg13[%c0_286, %c0_287] : memref<8x128xf32, #tpu.memory_space<vmem>>, vector<8x128xf32>
    %c0_288 = arith.constant 0 : index
    %c0_289 = arith.constant 0 : index
    %583 = vector.load %arg6[%c0_288, %c0_289] : memref<128x512xf32, #tpu.memory_space<vmem>>, vector<128x512xf32>
    %cst_290 = arith.constant dense<0.000000e+00> : vector<8x512xf32>
    %584 = tpu.matmul %582, %583, %cst_290 {dimension_numbers = #tpu.dot_dimension_numbers<[1], [0], [0], [1], [0, 0, 1, 1], [], []>} : vector<8x128xf32>, vector<128x512xf32>, vector<8x512xf32> -> vector<8x512xf32>
    %585 = arith.addf %581, %584 : vector<8x512xf32>
    %586 = vector.extract_strided_slice %585 {offsets = [0, 0], sizes = [8, 128], strides = [1, 1]} : vector<8x512xf32> to vector<8x128xf32>
    %587 = arith.negf %586 : vector<8x128xf32>
    %588 = math.exp %587 : vector<8x128xf32>
    %cst_291 = arith.constant 1.000000e+00 : f32
    %589 = vector.broadcast %cst_291 : f32 to vector<8x128xf32>
    %590 = arith.addf %589, %588 : vector<8x128xf32>
    %591 = arith.divf %589, %590 : vector<8x128xf32>
    %592 = vector.extract_strided_slice %585 {offsets = [0, 128], sizes = [8, 128], strides = [1, 1]} : vector<8x512xf32> to vector<8x128xf32>
    %593 = arith.negf %592 : vector<8x128xf32>
    %594 = math.exp %593 : vector<8x128xf32>
    %cst_292 = arith.constant 1.000000e+00 : f32
    %595 = vector.broadcast %cst_292 : f32 to vector<8x128xf32>
    %596 = arith.addf %595, %594 : vector<8x128xf32>
    %597 = arith.divf %595, %596 : vector<8x128xf32>
    %598 = vector.extract_strided_slice %585 {offsets = [0, 256], sizes = [8, 128], strides = [1, 1]} : vector<8x512xf32> to vector<8x128xf32>
    %599 = math.tanh %598 : vector<8x128xf32>
    %600 = vector.extract_strided_slice %585 {offsets = [0, 384], sizes = [8, 128], strides = [1, 1]} : vector<8x512xf32> to vector<8x128xf32>
    %601 = arith.negf %600 : vector<8x128xf32>
    %602 = math.exp %601 : vector<8x128xf32>
    %cst_293 = arith.constant 1.000000e+00 : f32
    %603 = vector.broadcast %cst_293 : f32 to vector<8x128xf32>
    %604 = arith.addf %603, %602 : vector<8x128xf32>
    %605 = arith.divf %603, %604 : vector<8x128xf32>
    %c0_294 = arith.constant 0 : index
    %c0_295 = arith.constant 0 : index
    %606 = vector.load %arg14[%c0_294, %c0_295] : memref<8x128xf32, #tpu.memory_space<vmem>>, vector<8x128xf32>
    %607 = arith.mulf %597, %606 : vector<8x128xf32>
    %608 = arith.mulf %591, %599 : vector<8x128xf32>
    %609 = arith.addf %607, %608 : vector<8x128xf32>
    %610 = math.tanh %609 : vector<8x128xf32>
    %611 = arith.mulf %605, %610 : vector<8x128xf32>
    %c0_296 = arith.constant 0 : index
    %c0_297 = arith.constant 0 : index
    %612 = vector.load %arg14[%c0_296, %c0_297] : memref<8x128xf32, #tpu.memory_space<vmem>>, vector<8x128xf32>
    tpu.vector_store %arg14[%c0_296, %c0_297], %609 {strides = array<i32>} : memref<8x128xf32, #tpu.memory_space<vmem>>, vector<8x128xf32>,
    %c0_298 = arith.constant 0 : index
    %c0_299 = arith.constant 0 : index
    %613 = vector.load %arg13[%c0_298, %c0_299] : memref<8x128xf32, #tpu.memory_space<vmem>>, vector<8x128xf32>
    tpu.vector_store %arg13[%c0_298, %c0_299], %611 {strides = array<i32>} : memref<8x128xf32, #tpu.memory_space<vmem>>, vector<8x128xf32>,
    %c8_i32_300 = arith.constant 8 : i32
    %c0_301 = arith.constant 0 : index
    %c0_302 = arith.constant 0 : index
    %614 = vector.load %arg13[%c0_301, %c0_302] : memref<8x128xf32, #tpu.memory_space<vmem>>, vector<8x128xf32>
    %c0_303 = arith.constant 0 : index
    %c0_304 = arith.constant 0 : index
    %615 = vector.load %arg8[%c0_303, %c0_304] : memref<128x128xf32, #tpu.memory_space<vmem>>, vector<128x128xf32>
    %cst_305 = arith.constant dense<0.000000e+00> : vector<8x128xf32>
    %616 = tpu.matmul %614, %615, %cst_305 {dimension_numbers = #tpu.dot_dimension_numbers<[1], [0], [0], [1], [0, 0, 1, 1], [], []>} : vector<8x128xf32>, vector<128x128xf32>, vector<8x128xf32> -> vector<8x128xf32>
    %c0_306 = arith.constant 0 : index
    %c0_307 = arith.constant 0 : index
    %617 = vector.load %arg9[%c0_306, %c0_307] : memref<1x128xf32, #tpu.memory_space<vmem>>, vector<1x128xf32>
    %618 = vector.broadcast %617 : vector<1x128xf32> to vector<8x128xf32>
    %619 = arith.addf %616, %618 : vector<8x128xf32>
    %c0_308 = arith.constant 0 : index
    %c0_309 = arith.constant 0 : index
    %620 = vector.load %arg10[%c0_308, %c0_309] : memref<8x128xf32, #tpu.memory_space<vmem>>, vector<8x128xf32>
    tpu.vector_store %arg10[%c0_308, %c0_309], %619 {strides = array<i32>} : memref<8x128xf32, #tpu.memory_space<vmem>>, vector<8x128xf32>,
    return
  }
  func.func @transform_0(%arg0: i32) -> (i32, i32) {
    %c0_i32 = arith.constant 0 : i32
    %c0_i32_0 = arith.constant 0 : i32
    %c0_i32_1 = arith.constant 0 : i32
    return %c0_i32, %c0_i32_0 : i32, i32
  }
  func.func @transform_1(%arg0: i32) -> (i32, i32) {
    %c0_i32 = arith.constant 0 : i32
    %c0_i32_0 = arith.constant 0 : i32
    %c0_i32_1 = arith.constant 0 : i32
    return %c0_i32, %c0_i32_0 : i32, i32
  }
  func.func @transform_2(%arg0: i32) -> (i32, i32) {
    %c0_i32 = arith.constant 0 : i32
    %c0_i32_0 = arith.constant 0 : i32
    %c0_i32_1 = arith.constant 0 : i32
    return %c0_i32, %c0_i32_0 : i32, i32
  }
  func.func @transform_3(%arg0: i32) -> (i32, i32) {
    %c0_i32 = arith.constant 0 : i32
    %c0_i32_0 = arith.constant 0 : i32
    %c0_i32_1 = arith.constant 0 : i32
    return %c0_i32, %c0_i32_0 : i32, i32
  }
  func.func @transform_4(%arg0: i32) -> (i32, i32) {
    %c0_i32 = arith.constant 0 : i32
    %c0_i32_0 = arith.constant 0 : i32
    %c0_i32_1 = arith.constant 0 : i32
    return %c0_i32, %c0_i32_0 : i32, i32
  }
  func.func @transform_5(%arg0: i32) -> (i32, i32) {
    %c0_i32 = arith.constant 0 : i32
    %c0_i32_0 = arith.constant 0 : i32
    %c0_i32_1 = arith.constant 0 : i32
    return %c0_i32, %c0_i32_0 : i32, i32
  }
  func.func @transform_6(%arg0: i32) -> (i32, i32) {
    %c0_i32 = arith.constant 0 : i32
    %c0_i32_0 = arith.constant 0 : i32
    %c0_i32_1 = arith.constant 0 : i32
    return %c0_i32, %c0_i32_0 : i32, i32
  }
  func.func @transform_7(%arg0: i32) -> (i32, i32) {
    %c0_i32 = arith.constant 0 : i32
    %c0_i32_0 = arith.constant 0 : i32
    %c0_i32_1 = arith.constant 0 : i32
    return %c0_i32, %c0_i32_0 : i32, i32
  }
  func.func @transform_8(%arg0: i32) -> (i32, i32) {
    %c0_i32 = arith.constant 0 : i32
    %c0_i32_0 = arith.constant 0 : i32
    %c0_i32_1 = arith.constant 0 : i32
    return %c0_i32, %c0_i32_0 : i32, i32
  }
  func.func @transform_9(%arg0: i32) -> (i32, i32) {
    %c0_i32 = arith.constant 0 : i32
    %c0_i32_0 = arith.constant 0 : i32
    %c0_i32_1 = arith.constant 0 : i32
    return %c0_i32, %c0_i32_0 : i32, i32
  }
}

</mosaic_0001>

<bundles_post_ra>
// kernel: tpu_custom_call.1
= control target key start
LH: loop header
LB: loop body
LE: loop exit
PB: predicated region body
PF: predicated region fallthrough
CT: control target
= control target key end

     0   :  { %14 = vsyncpa [#allocation7], 0  ;;  %s7370_s0 = inlined_call_operand.hbm [shape: f32[64,128], index: 0, kind: input, shape index: {}]   ;;  %s7371_s1 = inlined_call_operand.hbm [shape: f32[128,512], index: 1, kind: input, shape index: {}]   ;;  %s7372_s2 = inlined_call_operand.hbm [shape: f32[128,512], index: 2, kind: input, shape index: {}]   ;;  %s7373_s3 = inlined_call_operand.vmem [shape: f32[1,512], index: 3, kind: input, shape index: {}]   ;;  %s7374_s4 = inlined_call_operand.hbm [shape: f32[128,512], index: 4, kind: input, shape index: {}]   ;;  %s7375_s5 = inlined_call_operand.hbm [shape: f32[128,512], index: 5, kind: input, shape index: {}]   ;;  %s7376_s6 = inlined_call_operand.vmem [shape: f32[1,512], index: 6, kind: input, shape index: {}]   ;;  %s7377_s7 = inlined_call_operand.hbm [shape: f32[128,128], index: 7, kind: input, shape index: {}]   ;;  %s7378_s8 = inlined_call_operand.vmem [shape: f32[1,128], index: 8, kind: input, shape index: {}]   ;;  %s7379_s9 = inlined_call_operand.hbm [shape: f32[8,128], index: 9, kind: output, shape index: {}]  }
   0x1   :  { %15 = vsyncpa [#allocation10], 0 }
   0x2   :  { %16 = vsyncpa [#allocation13], 0 }
   0x3   :  { %17 = vsyncpa [#allocation16], 0 }
   0x4   :  { %18 = vsyncpa [#allocation8], 0  ;;  %s5374_s30 = smov [#allocation9]  }
   0x5   :  { %s36_s10 = sshll.u32 %s5374_s30, 4  ;;  %s37_s10 = int_to_ptr.vmem [resolvable:$true] %s36_s10 }
   0x6   :  { %s5232_s11 = scalar_lea.vmem %s37_s10, 8192  ;;  %p5237_p1 = scmp.lt.s32.totalorder %s37_s10, %s37_s10 }
   0x7   :  { %p5233_p0 = scmp.ne.s32.totalorder %s37_s10, %s5232_s11  ;;  %p5238_p2 = scmp.lt.s32.totalorder %s5232_s11, %s5232_s11 }
   0x9   :  { %p5239_p3 = por %p5238_p2, %p5237_p1 }
   0xb   :  { %p5240_p4 = pnand %p5239_p3, %p5233_p0 }
   0xd   :  { %5243 = shalt.err (!%p5240_p4)
}
   0xe   :  { %s5375_s12 = smov 512   ;;  %s5376_s13 = smov 32  }
   0xf   :  { %42 = dma.hbm_to_vmem [thread:$0]  %s7371_s1, 8192, %s37_s10, [#allocation10], %s5375_s12, %s5375_s12, %s5376_s13  }
  0x10   :  { %s5377_s16 = smov [#allocation12]   ;;  %s5378_s18 = smov [#allocation6]  }
  0x11   :  { %s62_s17 = sshll.u32 %s5377_s16, 4  ;;  %s24_s19 = sshll.u32 %s5378_s18, 4  ;;  %s63_s17 = int_to_ptr.vmem [resolvable:$true] %s62_s17  ;;  %s25_s19 = int_to_ptr.vmem [resolvable:$true] %s24_s19 }
  0x12   :  { %s5252_s20 = scalar_lea.vmem %s63_s17, 8192  ;;  %p5257_p6 = scmp.lt.s32.totalorder %s63_s17, %s63_s17 }
  0x13   :  { %p5253_p5 = scmp.ne.s32.totalorder %s63_s17, %s5252_s20  ;;  %p5258_p7 = scmp.lt.s32.totalorder %s5252_s20, %s5252_s20 }
  0x15   :  { %p5259_p8 = por %p5258_p7, %p5257_p6 }
  0x17   :  { %p5260_p9 = pnand %p5259_p8, %p5253_p5 }
  0x19   :  { %5263 = shalt.err (!%p5260_p9)
}
  0x1a   :  { %68 = dma.hbm_to_vmem [thread:$0]  %s7374_s4, 8192, %s63_s17, [#allocation13], %s5375_s12, %s5375_s12, %s5376_s13  }
  0x1b   :  { %s5272_s1 = scalar_lea.vmem %s25_s19, 1024  ;;  %p5277_p11 = scmp.lt.s32.totalorder %s25_s19, %s25_s19 }
  0x1c   :  { %p5273_p10 = scmp.ne.s32.totalorder %s25_s19, %s5272_s1  ;;  %p5278_p12 = scmp.lt.s32.totalorder %s5272_s1, %s5272_s1 }
  0x1e   :  { %p5279_p13 = por %p5278_p12, %p5277_p11 }
  0x20   :  { %p5280_p0 = pnand %p5279_p13, %p5273_p10 }
  0x22   :  { %5283 = shalt.err (!%p5280_p0)
}
  0x23   :  { %s5379_s23 = smov 128   ;;  %s5380_s24 = smov 8  }
  0x24   :  { %30 = dma.hbm_to_vmem [thread:$0]  %s7370_s0, 1024, %s25_s19, [#allocation7], %s5379_s23, %s5379_s23, %s5380_s24  }
  0x25   :  { %s5381_s27 = smov [#allocation11]   ;;  %s5382_s4 = smov [#allocation14]  }
  0x26   :  { %s48_s28 = sshll.u32 %s5381_s27, 4  ;;  %s74_s29 = sshll.u32 %s5382_s4, 4  ;;  %s49_s28 = int_to_ptr.vmem [resolvable:$true] %s48_s28  ;;  %s75_s29 = int_to_ptr.vmem [resolvable:$true] %s74_s29 }
  0x27   :  { %s5292_s30 = scalar_lea.vmem %s49_s28, 8192  ;;  %p5297_p2 = scmp.lt.s32.totalorder %s49_s28, %s49_s28 }
  0x28   :  { %p5293_p1 = scmp.ne.s32.totalorder %s49_s28, %s5292_s30  ;;  %p5298_p3 = scmp.lt.s32.totalorder %s5292_s30, %s5292_s30 }
  0x2a   :  { %p5299_p4 = por %p5298_p3, %p5297_p2 }
  0x2c   :  { %p5300_p5 = pnand %p5299_p4, %p5293_p1 }
  0x2e   :  { %5303 = shalt.err (!%p5300_p5)
}
  0x2f   :  { %54 = dma.hbm_to_vmem [thread:$0]  %s7372_s2, 8192, %s49_s28, [#allocation10], %s5375_s12, %s5375_s12, %s5376_s13  }
  0x30   :  { %s5312_s0 = scalar_lea.vmem %s75_s29, 8192  ;;  %p5317_p7 = scmp.lt.s32.totalorder %s75_s29, %s75_s29 }
  0x31   :  { %p5313_p6 = scmp.ne.s32.totalorder %s75_s29, %s5312_s0  ;;  %p5318_p8 = scmp.lt.s32.totalorder %s5312_s0, %s5312_s0 }
  0x33   :  { %p5319_p9 = por %p5318_p8, %p5317_p7 }
  0x35   :  { %p5320_p10 = pnand %p5319_p9, %p5313_p6 }
  0x37   :  { %5323 = shalt.err (!%p5320_p10)
}
  0x38   :  { %80 = dma.hbm_to_vmem [thread:$0]  %s7375_s5, 8192, %s75_s29, [#allocation13], %s5375_s12, %s5375_s12, %s5376_s13  }
  0x39   :  { %s5383_s16 = smov [#allocation15]  }
  0x3a   :  { %s88_s17 = sshll.u32 %s5383_s16, 4  ;;  %s89_s17 = int_to_ptr.vmem [resolvable:$true] %s88_s17 }
  0x3b   :  { %s5332_s18 = scalar_lea.vmem %s89_s17, 2048  ;;  %p5337_p12 = scmp.lt.s32.totalorder %s89_s17, %s89_s17 }
  0x3c   :  { %p5333_p11 = scmp.ne.s32.totalorder %s89_s17, %s5332_s18  ;;  %p5338_p13 = scmp.lt.s32.totalorder %s5332_s18, %s5332_s18 }
  0x3e   :  { %p5339_p0 = por %p5338_p13, %p5337_p12 }
  0x40   :  { %p5340_p1 = pnand %p5339_p0, %p5333_p11 }
  0x42   :  { %5343 = shalt.err (!%p5340_p1)
}
  0x43   :  { %94 = dma.hbm_to_vmem [thread:$0]  %s7377_s7, 2048, %s89_s17, [#allocation16], %s5379_s23, %s5379_s23, %s5380_s24  }
  0x44   :  { %5364 = dma.done.wait [#allocation7], 1024  }
  0x45   :  { %5365 = vsyncadd [#allocation7], 4294966272 }
  0x46   :  { %5366 = dma.done.wait [#allocation10], 16384  }
  0x47   :  { %5367 = vsyncadd [#allocation10], 4294950912 }
  0x48   :  { %5368 = dma.done.wait [#allocation13], 16384  }
  0x49   :  { %5369 = vsyncadd [#allocation13], 4294950912 }
  0x4a   :  { %5370 = dma.done.wait [#allocation16], 2048  }
  0x4b   :  { %5371 = vsyncadd [#allocation16], 4294965248  ;;  %v7380_v0 = vmov 0.0   ;;  %v184_v1 = vld [vmem:[#allocation9 + $0x1e8] sm:$0xff]  ;;  %v186_v2 = vld [vmem:[#allocation9 + $0x1f8] sm:$0xff]  ;;  %vm5385_vm0 = vmmov 0  }
  0x4c   :  { %273 = vmatprep.mubr.f32.mxu0 %v7380_v0  ;;  %386 = vmatprep.mubr.f32.mxu1 %v7380_v0  ;;  %v183_v3 = vld [vmem:[#allocation9 + $0x1e0] sm:$0xff]  ;;  %v185_v4 = vld [vmem:[#allocation9 + $0x1f0] sm:$0xff]  ;;  %v180_v5 = vld [vmem:[#allocation9 + $0x1c8] sm:$0xff]  ;;  %s5386_s20 = smov [#allocation17]  }
  0x4d   :  { %209 = vmatprep.subr.mxu0 %v184_v1  ;;  %322 = vmatprep.subr.mxu1 %v186_v2  ;;  %v182_v6 = vld [vmem:[#allocation9 + $0x1d8] sm:$0xff]  ;;  %v179_v7 = vld [vmem:[#allocation9 + $0x1c0] sm:$0xff]  ;;  %v181_v8 = vld [vmem:[#allocation9 + $0x1d0] sm:$0xff]  ;;  %s4835_s21 = sshll.u32 %s5386_s20, 4  ;;  %s4836_s21 = int_to_ptr.vmem [resolvable:$true] %s4835_s21 }
  0x4e   :  { %210 = vmatpush1.msra.mxu0 %v183_v3  ;;  %323 = vmatpush1.msra.mxu1 %v185_v4  ;;  %v176_v9 = vld [vmem:[#allocation9 + $0x1a8] sm:$0xff]  ;;  %v178_v10 = vld [vmem:[#allocation9 + $0x1b8] sm:$0xff]  ;;  %v175_v11 = vld [vmem:[#allocation9 + $0x1a0] sm:$0xff]  ;;  %s5344_s22 = scalar_lea.vmem %s4836_s21, 128  ;;  %p5349_p3 = scmp.lt.s32.totalorder %s4836_s21, %s4836_s21 }
  0x4f   :  { %211 = vmatprep.subr.mxu0 %v180_v5  ;;  %324 = vmatprep.subr.mxu1 %v182_v6  ;;  %v177_v12 = vld [vmem:[#allocation9 + $0x1b0] sm:$0xff]  ;;  %v172_v13 = vld [vmem:[#allocation9 + $0x188] sm:$0xff]  ;;  %v174_v14 = vld [vmem:[#allocation9 + $0x198] sm:$0xff]  ;;  %p5345_p2 = scmp.ne.s32.totalorder %s4836_s21, %s5344_s22  ;;  %p5350_p4 = scmp.lt.s32.totalorder %s5344_s22, %s5344_s22 }
  0x50   :  { %212 = vmatpush1.msra.mxu0 %v179_v7  ;;  %325 = vmatpush1.msra.mxu1 %v181_v8  ;;  %v171_v15 = vld [vmem:[#allocation9 + $0x180] sm:$0xff]  ;;  %v173_v16 = vld [vmem:[#allocation9 + $0x190] sm:$0xff]  ;;  %v168_v17 = vld [vmem:[#allocation9 + $0x168] sm:$0xff] }
  0x51   :  { %213 = vmatprep.subr.mxu0 %v176_v9  ;;  %326 = vmatprep.subr.mxu1 %v178_v10  ;;  %v170_v18 = vld [vmem:[#allocation9 + $0x178] sm:$0xff]  ;;  %v167_v19 = vld [vmem:[#allocation9 + $0x160] sm:$0xff]  ;;  %v169_v20 = vld [vmem:[#allocation9 + $0x170] sm:$0xff]  ;;  %p5351_p5 = por %p5350_p4, %p5349_p3 }
  0x52   :  { %214 = vmatpush1.msra.mxu0 %v175_v11  ;;  %327 = vmatpush1.msra.mxu1 %v177_v12  ;;  %v164_v21 = vld [vmem:[#allocation9 + $0x148] sm:$0xff]  ;;  %v166_v22 = vld [vmem:[#allocation9 + $0x158] sm:$0xff]  ;;  %v163_v23 = vld [vmem:[#allocation9 + $0x140] sm:$0xff] }
  0x53   :  { %215 = vmatprep.subr.mxu0 %v172_v13  ;;  %328 = vmatprep.subr.mxu1 %v174_v14  ;;  %v165_v24 = vld [vmem:[#allocation9 + $0x150] sm:$0xff]  ;;  %v160_v25 = vld [vmem:[#allocation9 + $0x128] sm:$0xff]  ;;  %v162_v26 = vld [vmem:[#allocation9 + $0x138] sm:$0xff]  ;;  %p5352_p6 = pnand %p5351_p5, %p5345_p2 }
  0x54   :  { %216 = vmatpush1.msra.mxu0 %v171_v15  ;;  %329 = vmatpush1.msra.mxu1 %v173_v16  ;;  %v159_v27 = vld [vmem:[#allocation9 + $0x120] sm:$0xff]  ;;  %v161_v28 = vld [vmem:[#allocation9 + $0x130] sm:$0xff]  ;;  %v156_v29 = vld [vmem:[#allocation9 + $0x108] sm:$0xff] }
  0x55   :  { %217 = vmatprep.subr.mxu0 %v168_v17  ;;  %330 = vmatprep.subr.mxu1 %v170_v18  ;;  %v158_v30 = vld [vmem:[#allocation9 + $0x118] sm:$0xff]  ;;  %v155_v31 = vld [vmem:[#allocation9 + $0x100] sm:$0xff]  ;;  %v157_v32 = vld [vmem:[#allocation9 + $0x110] sm:$0xff] }
  0x56   :  { %218 = vmatpush1.msra.mxu0 %v167_v19  ;;  %331 = vmatpush1.msra.mxu1 %v169_v20  ;;  %v152_v33 = vld [vmem:[#allocation9 + $0xe8] sm:$0xff]  ;;  %v154_v34 = vld [vmem:[#allocation9 + $0xf8] sm:$0xff]  ;;  %v151_v35 = vld [vmem:[#allocation9 + $0xe0] sm:$0xff] }
  0x57   :  { %219 = vmatprep.subr.mxu0 %v164_v21  ;;  %332 = vmatprep.subr.mxu1 %v166_v22  ;;  %v153_v36 = vld [vmem:[#allocation9 + $0xf0] sm:$0xff]  ;;  %v148_v37 = vld [vmem:[#allocation9 + $0xc8] sm:$0xff]  ;;  %v150_v38 = vld [vmem:[#allocation9 + $0xd8] sm:$0xff] }
  0x58   :  { %220 = vmatpush1.msra.mxu0 %v163_v23  ;;  %333 = vmatpush1.msra.mxu1 %v165_v24  ;;  %v147_v39 = vld [vmem:[#allocation9 + $0xc0] sm:$0xff]  ;;  %v149_v40 = vld [vmem:[#allocation9 + $0xd0] sm:$0xff]  ;;  %v144_v41 = vld [vmem:[#allocation9 + $0xa8] sm:$0xff] }
  0x59   :  { %221 = vmatprep.subr.mxu0 %v160_v25  ;;  %334 = vmatprep.subr.mxu1 %v162_v26  ;;  %v146_v42 = vld [vmem:[#allocation9 + $0xb8] sm:$0xff]  ;;  %v143_v43 = vld [vmem:[#allocation9 + $0xa0] sm:$0xff]  ;;  %v145_v44 = vld [vmem:[#allocation9 + $0xb0] sm:$0xff] }
  0x5a   :  { %222 = vmatpush1.msra.mxu0 %v159_v27  ;;  %335 = vmatpush1.msra.mxu1 %v161_v28  ;;  %v140_v45 = vld [vmem:[#allocation9 + $0x88] sm:$0xff]  ;;  %v142_v46 = vld [vmem:[#allocation9 + $0x98] sm:$0xff]  ;;  %v139_v47 = vld [vmem:[#allocation9 + $0x80] sm:$0xff] }
  0x5b   :  { %223 = vmatprep.subr.mxu0 %v156_v29  ;;  %336 = vmatprep.subr.mxu1 %v158_v30  ;;  %v141_v48 = vld [vmem:[#allocation9 + $0x90] sm:$0xff]  ;;  %v136_v49 = vld [vmem:[#allocation9 + $0x68] sm:$0xff]  ;;  %v138_v50 = vld [vmem:[#allocation9 + $0x78] sm:$0xff] }
  0x5c   :  { %224 = vmatpush1.msra.mxu0 %v155_v31  ;;  %337 = vmatpush1.msra.mxu1 %v157_v32  ;;  %v135_v51 = vld [vmem:[#allocation9 + $0x60] sm:$0xff]  ;;  %v137_v52 = vld [vmem:[#allocation9 + $0x70] sm:$0xff]  ;;  %v132_v53 = vld [vmem:[#allocation9 + $0x48] sm:$0xff] }
  0x5d   :  { %225 = vmatprep.subr.mxu0 %v152_v33  ;;  %338 = vmatprep.subr.mxu1 %v154_v34  ;;  %v134_v54 = vld [vmem:[#allocation9 + $0x58] sm:$0xff]  ;;  %v131_v55 = vld [vmem:[#allocation9 + $0x40] sm:$0xff]  ;;  %v133_v56 = vld [vmem:[#allocation9 + $0x50] sm:$0xff] }
  0x5e   :  { %226 = vmatpush1.msra.mxu0 %v151_v35  ;;  %339 = vmatpush1.msra.mxu1 %v153_v36  ;;  %v128_v57 = vld [vmem:[#allocation9 + $0x28] sm:$0xff]  ;;  %v130_v58 = vld [vmem:[#allocation9 + $0x38] sm:$0xff]  ;;  %v127_v59 = vld [vmem:[#allocation9 + $0x20] sm:$0xff] }
  0x5f   :  { %227 = vmatprep.subr.mxu0 %v148_v37  ;;  %340 = vmatprep.subr.mxu1 %v150_v38  ;;  %v129_v60 = vld [vmem:[#allocation9 + $0x30] sm:$0xff]  ;;  %v124_v61 = vld [vmem:[#allocation9 + $0x8] sm:$0xff]  ;;  %v126_v62 = vld [vmem:[#allocation9 + $0x18] sm:$0xff] }
  0x60   :  { %228 = vmatpush1.msra.mxu0 %v147_v39  ;;  %341 = vmatpush1.msra.mxu1 %v149_v40  ;;  %v123_v63 = vld [vmem:[#allocation9] sm:$0xff]  ;;  %v125_v1 = vld [vmem:[#allocation9 + $0x10] sm:$0xff]  ;;  %v5475_v3 = vld [vmem:[#allocation11 + $0x1e8] sm:$0xff] }
  0x61   :  { %229 = vmatprep.subr.mxu0 %v144_v41  ;;  %342 = vmatprep.subr.mxu1 %v146_v42  ;;  %v115_v2 = vld [vmem:[#allocation6] sm:$0xff]  ;;  %v5477_v4 = vld [vmem:[#allocation11 + $0x1f8] sm:$0xff]  ;;  %v5481_v6 = vld [vmem:[#allocation11 + $0x1f0] sm:$0xff] }
  0x62   :  { %230 = vmatpush1.msra.mxu0 %v143_v43  ;;  %343 = vmatpush1.msra.mxu1 %v145_v44  ;;  %v5479_v5 = vld [vmem:[#allocation11 + $0x1e0] sm:$0xff]  ;;  %v5483_v7 = vld [vmem:[#allocation11 + $0x1c8] sm:$0xff]  ;;  %v5485_v8 = vld [vmem:[#allocation11 + $0x1d8] sm:$0xff] }
  0x63   :  { %231 = vmatprep.subr.mxu0 %v140_v45  ;;  %344 = vmatprep.subr.mxu1 %v142_v46  ;;  %v5491_v9 = vld [vmem:[#allocation11 + $0x1c0] sm:$0xff]  ;;  %v5493_v10 = vld [vmem:[#allocation11 + $0x1d0] sm:$0xff]  ;;  %v116_v11 = vld [vmem:[#allocation6 + $0x8] sm:$0xff] }
  0x64   :  { %232 = vmatpush1.msra.mxu0 %v139_v47  ;;  %345 = vmatpush1.msra.mxu1 %v141_v48  ;;  %v5499_v12 = vld [vmem:[#allocation11 + $0x1a8] sm:$0xff]  ;;  %v5501_v13 = vld [vmem:[#allocation11 + $0x1b8] sm:$0xff]  ;;  %v5505_v14 = vld [vmem:[#allocation11 + $0x1a0] sm:$0xff] }
  0x65   :  { %233 = vmatprep.subr.mxu0 %v136_v49  ;;  %346 = vmatprep.subr.mxu1 %v138_v50  ;;  %v5507_v15 = vld [vmem:[#allocation11 + $0x1b0] sm:$0xff]  ;;  %v5509_v16 = vld [vmem:[#allocation11 + $0x188] sm:$0xff]  ;;  %v5511_v17 = vld [vmem:[#allocation11 + $0x198] sm:$0xff] }
  0x66   :  { %234 = vmatpush1.msra.mxu0 %v135_v51  ;;  %347 = vmatpush1.msra.mxu1 %v137_v52  ;;  %v5517_v18 = vld [vmem:[#allocation11 + $0x180] sm:$0xff]  ;;  %v5519_v19 = vld [vmem:[#allocation11 + $0x190] sm:$0xff]  ;;  %v5525_v21 = vld [vmem:[#allocation11 + $0x168] sm:$0xff] }
  0x67   :  { %235 = vmatprep.subr.mxu0 %v132_v53  ;;  %348 = vmatprep.subr.mxu1 %v134_v54  ;;  %v117_v20 = vld [vmem:[#allocation6 + $0x10] sm:$0xff]  ;;  %v5527_v22 = vld [vmem:[#allocation11 + $0x178] sm:$0xff]  ;;  %v5531_v23 = vld [vmem:[#allocation11 + $0x160] sm:$0xff] }
  0x68   :  { %236 = vmatpush1.msra.mxu0 %v131_v55  ;;  %349 = vmatpush1.msra.mxu1 %v133_v56  ;;  %v5533_v24 = vld [vmem:[#allocation11 + $0x170] sm:$0xff]  ;;  %v5535_v25 = vld [vmem:[#allocation11 + $0x148] sm:$0xff]  ;;  %v5537_v26 = vld [vmem:[#allocation11 + $0x158] sm:$0xff] }
  0x69   :  { %237 = vmatprep.subr.mxu0 %v128_v57  ;;  %350 = vmatprep.subr.mxu1 %v130_v58  ;;  %v5543_v27 = vld [vmem:[#allocation11 + $0x140] sm:$0xff]  ;;  %v5545_v28 = vld [vmem:[#allocation11 + $0x150] sm:$0xff]  ;;  %v118_v29 = vld [vmem:[#allocation6 + $0x18] sm:$0xff] }
  0x6a   :  { %238 = vmatpush1.msra.mxu0 %v127_v59  ;;  %351 = vmatpush1.msra.mxu1 %v129_v60  ;;  %v5551_v30 = vld [vmem:[#allocation11 + $0x128] sm:$0xff]  ;;  %v5553_v31 = vld [vmem:[#allocation11 + $0x138] sm:$0xff]  ;;  %v5557_v32 = vld [vmem:[#allocation11 + $0x120] sm:$0xff] }
  0x6b   :  { %239 = vmatprep.subr.mxu0 %v124_v61  ;;  %352 = vmatprep.subr.mxu1 %v126_v62  ;;  %v5559_v33 = vld [vmem:[#allocation11 + $0x130] sm:$0xff]  ;;  %v5561_v34 = vld [vmem:[#allocation11 + $0x108] sm:$0xff]  ;;  %v5563_v35 = vld [vmem:[#allocation11 + $0x118] sm:$0xff] }
  0x6c   :  { %240 = vmatpush1.msra.mxu0 %v123_v63  ;;  %353 = vmatpush1.msra.mxu1 %v125_v1  ;;  %v5569_v36 = vld [vmem:[#allocation11 + $0x100] sm:$0xff]  ;;  %v5571_v37 = vld [vmem:[#allocation11 + $0x110] sm:$0xff]  ;;  %v5577_v39 = vld [vmem:[#allocation11 + $0xe8] sm:$0xff] }
  0x6d   :  { %274 = vmatmul.mubr.f32.vlgmr.msra.gmra.mxu0 %v115_v2  ;;  %387 = vmatmul.mubr.f32.vlgmr.msra.gmra.mxu1 %v115_v2  ;;  %v119_v38 = vld [vmem:[#allocation6 + $0x20] sm:$0xff]  ;;  %v5579_v40 = vld [vmem:[#allocation11 + $0xf8] sm:$0xff]  ;;  %v5585_v42 = vld [vmem:[#allocation11 + $0xf0] sm:$0xff] }
  0x6e   :  { %541 = vmatprep.subr.mxu0 %v5475_v3  ;;  %612 = vmatprep.subr.mxu1 %v5477_v4  ;;  %v5583_v41 = vld [vmem:[#allocation11 + $0xe0] sm:$0xff]  ;;  %v5587_v43 = vld [vmem:[#allocation11 + $0xc8] sm:$0xff]  ;;  %v5589_v44 = vld [vmem:[#allocation11 + $0xd8] sm:$0xff] }
  0x6f   :  { %542 = vmatpush1.msra.mxu0 %v5479_v5  ;;  %613 = vmatpush1.msra.mxu1 %v5481_v6  ;;  %v5595_v45 = vld [vmem:[#allocation11 + $0xc0] sm:$0xff]  ;;  %v5597_v46 = vld [vmem:[#allocation11 + $0xd0] sm:$0xff]  ;;  %v120_v47 = vld [vmem:[#allocation6 + $0x28] sm:$0xff] }
  0x70   :  { %543 = vmatprep.subr.mxu0 %v5483_v7  ;;  %614 = vmatprep.subr.mxu1 %v5485_v8  ;;  %v5603_v48 = vld [vmem:[#allocation11 + $0xa8] sm:$0xff]  ;;  %v5605_v49 = vld [vmem:[#allocation11 + $0xb8] sm:$0xff]  ;;  %v5609_v50 = vld [vmem:[#allocation11 + $0xa0] sm:$0xff] }
  0x71   :  { %279 = vmatprep.mubr.f32.mxu0 %v7380_v0  ;;  %392 = vmatprep.mubr.f32.mxu1 %v7380_v0  ;;  %v5611_v51 = vld [vmem:[#allocation11 + $0xb0] sm:$0xff]  ;;  %v5613_v52 = vld [vmem:[#allocation11 + $0x88] sm:$0xff]  ;;  %v5615_v53 = vld [vmem:[#allocation11 + $0x98] sm:$0xff] }
  0x72   :  { %544 = vmatpush1.msra.mxu0 %v5491_v9  ;;  %615 = vmatpush1.msra.mxu1 %v5493_v10  ;;  %7564 = vst [vmem:[#allocation23_spill] sm:$0xff] %v5611_v51  ;;  %7565 = vst [vmem:[#allocation24_spill] sm:$0xff] %v5613_v52  ;;  %v5621_v54 = vld [vmem:[#allocation11 + $0x80] sm:$0xff]  ;;  %v5623_v55 = vld [vmem:[#allocation11 + $0x90] sm:$0xff] }
  0x73   :  { %280 = vmatmul.mubr.f32.gmra.mxu0 %v116_v11  ;;  %393 = vmatmul.mubr.f32.gmra.mxu1 %v116_v11  ;;  %7566 = vst [vmem:[#allocation25_spill] sm:$0xff] %v5615_v53  ;;  %7567 = vst [vmem:[#allocation26_spill] sm:$0xff] %v5621_v54  ;;  %v121_v56 = vld [vmem:[#allocation6 + $0x30] sm:$0xff]  ;;  %v5629_v57 = vld [vmem:[#allocation11 + $0x68] sm:$0xff] }
  0x74   :  { %545 = vmatprep.subr.mxu0 %v5499_v12  ;;  %616 = vmatprep.subr.mxu1 %v5501_v13  ;;  %7568 = vst [vmem:[#allocation27_spill] sm:$0xff] %v5623_v55  ;;  %7569 = vst [vmem:[#allocation28_spill] sm:$0xff] %v5629_v57  ;;  %v5631_v58 = vld [vmem:[#allocation11 + $0x78] sm:$0xff]  ;;  %v5635_v59 = vld [vmem:[#allocation11 + $0x60] sm:$0xff] }
  0x75   :  { %546 = vmatpush1.msra.mxu0 %v5505_v14  ;;  %617 = vmatpush1.msra.mxu1 %v5507_v15  ;;  %7570 = vst [vmem:[#allocation29_spill] sm:$0xff] %v5631_v58  ;;  %7571 = vst [vmem:[#allocation30_spill] sm:$0xff] %v5635_v59  ;;  %v5637_v60 = vld [vmem:[#allocation11 + $0x70] sm:$0xff]  ;;  %v5639_v61 = vld [vmem:[#allocation11 + $0x48] sm:$0xff] }
  0x76   :  { %547 = vmatprep.subr.mxu0 %v5509_v16  ;;  %618 = vmatprep.subr.mxu1 %v5511_v17  ;;  %7572 = vst [vmem:[#allocation31_spill] sm:$0xff] %v5637_v60  ;;  %7573 = vst [vmem:[#allocation32_spill] sm:$0xff] %v5639_v61  ;;  %v5641_v62 = vld [vmem:[#allocation11 + $0x58] sm:$0xff]  ;;  %v5647_v63 = vld [vmem:[#allocation11 + $0x40] sm:$0xff] }
  0x77   :  { %285 = vmatprep.mubr.f32.mxu0 %v7380_v0  ;;  %398 = vmatprep.mubr.f32.mxu1 %v7380_v0  ;;  %7574 = vst [vmem:[#allocation33_spill] sm:$0xff] %v5641_v62  ;;  %7575 = vst [vmem:[#allocation34_spill] sm:$0xff] %v5647_v63  ;;  %v5649_v1 = vld [vmem:[#allocation11 + $0x50] sm:$0xff]  ;;  %v122_v2 = vld [vmem:[#allocation6 + $0x38] sm:$0xff] }
  0x78   :  { %548 = vmatpush1.msra.mxu0 %v5517_v18  ;;  %619 = vmatpush1.msra.mxu1 %v5519_v19  ;;  %7576 = vst [vmem:[#allocation35_spill] sm:$0xff] %v5649_v1  ;;  %v5655_v11 = vld [vmem:[#allocation11 + $0x28] sm:$0xff] }
  0x79   :  { %286 = vmatmul.mubr.f32.gmra.mxu0 %v117_v20  ;;  %399 = vmatmul.mubr.f32.gmra.mxu1 %v117_v20  ;;  %7577 = vst [vmem:[#allocation36_spill] sm:$0xff] %v5655_v11  ;;  %v5657_v20 = vld [vmem:[#allocation11 + $0x38] sm:$0xff] }
  0x7a   :  { %549 = vmatprep.subr.mxu0 %v5525_v21  ;;  %620 = vmatprep.subr.mxu1 %v5527_v22  ;;  %7578 = vst [vmem:[#allocation37_spill] sm:$0xff] %v5657_v20 }
  0x7b   :  { %550 = vmatpush1.msra.mxu0 %v5531_v23  ;;  %621 = vmatpush1.msra.mxu1 %v5533_v24 }
  0x7c   :  { %551 = vmatprep.subr.mxu0 %v5535_v25  ;;  %622 = vmatprep.subr.mxu1 %v5537_v26 }
  0x7d   :  { %291 = vmatprep.mubr.f32.mxu0 %v7380_v0  ;;  %404 = vmatprep.mubr.f32.mxu1 %v7380_v0 }
  0x7e   :  { %552 = vmatpush1.msra.mxu0 %v5543_v27  ;;  %623 = vmatpush1.msra.mxu1 %v5545_v28 }
  0x7f   :  { %292 = vmatmul.mubr.f32.gmra.mxu0 %v118_v29  ;;  %405 = vmatmul.mubr.f32.gmra.mxu1 %v118_v29  ;;  %v5661_v29 = vld [vmem:[#allocation11 + $0x20] sm:$0xff] }
  0x80   :  { %553 = vmatprep.subr.mxu0 %v5551_v30  ;;  %624 = vmatprep.subr.mxu1 %v5553_v31  ;;  %7579 = vst [vmem:[#allocation38_spill] sm:$0xff] %v5661_v29 }
  0x81   :  { %554 = vmatpush1.msra.mxu0 %v5557_v32  ;;  %625 = vmatpush1.msra.mxu1 %v5559_v33 }
  0x82   :  { %555 = vmatprep.subr.mxu0 %v5561_v34  ;;  %626 = vmatprep.subr.mxu1 %v5563_v35 }
  0x83   :  { %297 = vmatprep.mubr.f32.mxu0 %v7380_v0  ;;  %410 = vmatprep.mubr.f32.mxu1 %v7380_v0 }
  0x84   :  { %556 = vmatpush1.msra.mxu0 %v5569_v36  ;;  %627 = vmatpush1.msra.mxu1 %v5571_v37 }
  0x85   :  { %298 = vmatmul.mubr.f32.gmra.mxu0 %v119_v38  ;;  %411 = vmatmul.mubr.f32.gmra.mxu1 %v119_v38  ;;  %v5663_v38 = vld [vmem:[#allocation11 + $0x30] sm:$0xff] }
  0x86   :  { %557 = vmatprep.subr.mxu0 %v5577_v39  ;;  %628 = vmatprep.subr.mxu1 %v5579_v40  ;;  %7580 = vst [vmem:[#allocation39_spill] sm:$0xff] %v5663_v38 }
  0x87   :  { %558 = vmatpush1.msra.mxu0 %v5583_v41  ;;  %629 = vmatpush1.msra.mxu1 %v5585_v42 }
  0x88   :  { %559 = vmatprep.subr.mxu0 %v5587_v43  ;;  %630 = vmatprep.subr.mxu1 %v5589_v44 }
  0x89   :  { %303 = vmatprep.mubr.f32.mxu0 %v7380_v0  ;;  %416 = vmatprep.mubr.f32.mxu1 %v7380_v0 }
  0x8a   :  { %560 = vmatpush1.msra.mxu0 %v5595_v45  ;;  %631 = vmatpush1.msra.mxu1 %v5597_v46 }
  0x8b   :  { %304 = vmatmul.mubr.f32.gmra.mxu0 %v120_v47  ;;  %417 = vmatmul.mubr.f32.gmra.mxu1 %v120_v47  ;;  %v5665_v47 = vld [vmem:[#allocation11 + $0x8] sm:$0xff] }
  0x8c   :  { %561 = vmatprep.subr.mxu0 %v5603_v48  ;;  %632 = vmatprep.subr.mxu1 %v5605_v49  ;;  %7581 = vst [vmem:[#allocation40_spill] sm:$0xff] %v5665_v47 }
  0x8d   :  { %562 = vmatpush1.msra.mxu0 %v5609_v50  ;;  %633 = vmatpush1.msra.mxu1 %v5611_v51 }
  0x8e   :  { %563 = vmatprep.subr.mxu0 %v5613_v52  ;;  %634 = vmatprep.subr.mxu1 %v5615_v53 }
  0x8f   :  { %309 = vmatprep.mubr.f32.mxu0 %v7380_v0  ;;  %422 = vmatprep.mubr.f32.mxu1 %v7380_v0 }
  0x90   :  { %564 = vmatpush1.msra.mxu0 %v5621_v54  ;;  %635 = vmatpush1.msra.mxu1 %v5623_v55 }
  0x91   :  { %310 = vmatmul.mubr.f32.gmra.mxu0 %v121_v56  ;;  %423 = vmatmul.mubr.f32.gmra.mxu1 %v121_v56  ;;  %v5667_v56 = vld [vmem:[#allocation11 + $0x18] sm:$0xff] }
  0x92   :  { %565 = vmatprep.subr.mxu0 %v5629_v57  ;;  %636 = vmatprep.subr.mxu1 %v5631_v58  ;;  %7582 = vst [vmem:[#allocation41_spill] sm:$0xff] %v5667_v56 }
  0x93   :  { %566 = vmatpush1.msra.mxu0 %v5635_v59  ;;  %637 = vmatpush1.msra.mxu1 %v5637_v60 }
  0x94   :  { %567 = vmatprep.subr.mxu0 %v5639_v61  ;;  %638 = vmatprep.subr.mxu1 %v5641_v62 }
  0x95   :  { %315 = vmatprep.mubr.f32.mxu0 %v7380_v0  ;;  %428 = vmatprep.mubr.f32.mxu1 %v7380_v0  ;;  %v5671_v0 = vld [vmem:[#allocation11] sm:$0xff] }
  0x96   :  { %568 = vmatpush1.msra.mxu0 %v5647_v63  ;;  %639 = vmatpush1.msra.mxu1 %v5649_v1  ;;  %7583 = vst [vmem:[#allocation42_spill] sm:$0xff] %v5671_v0  ;;  %v5675_v1 = vld [vmem:[#allocation11 + $0x10] sm:$0xff] }
  0x97   :  { %316 = vmatmul.mubr.f32.gmra.mxu0 %v122_v2  ;;  %429 = vmatmul.mubr.f32.gmra.mxu1 %v122_v2  ;;  %7584 = vst [vmem:[#allocation43_spill] sm:$0xff] %v5675_v1  ;;  %v7585_v2 = vmov 0.0  }
  0x98   :  { %569 = vmatprep.subr.mxu0 %v5655_v11  ;;  %640 = vmatprep.subr.mxu1 %v5657_v20 }
  0x99   :  { %570 = vmatpush1.msra.mxu0 %v5661_v29  ;;  %641 = vmatpush1.msra.mxu1 %v5663_v38 }
  0x9a   :  { %571 = vmatprep.subr.mxu0 %v5665_v47  ;;  %642 = vmatprep.subr.mxu1 %v5667_v56 }
  0x9b   :  { %572 = vmatpush1.msra.mxu0 %v5671_v0  ;;  %605 = vmatprep.mubr.f32.mxu0 %v7585_v2 }
  0x9c   :  { %643 = vmatpush1.msra.mxu1 %v5675_v1  ;;  %676 = vmatprep.mubr.f32.mxu1 %v7585_v2 }
  0x9d   :  { %606 = vmatmul.mubr.f32.vlgmr.msra.gmra.mxu0 %v7585_v2  ;;  %677 = vmatmul.mubr.f32.vlgmr.msra.gmra.mxu1 %v7585_v2 }
  0x9e   :  { %787 = vmatprep.subr.mxu0 %v5475_v3  ;;  %858 = vmatprep.subr.mxu1 %v5477_v4 }
  0x9f   :  { %788 = vmatpush1.msra.mxu0 %v5479_v5  ;;  %859 = vmatpush1.msra.mxu1 %v5481_v6 }
  0xa0   :  { %789 = vmatprep.subr.mxu0 %v5483_v7  ;;  %860 = vmatprep.subr.mxu1 %v5485_v8 }
  0xa1   :  { %790 = vmatpush1.msra.mxu0 %v5491_v9  ;;  %861 = vmatpush1.msra.mxu1 %v5493_v10 }
  0xa2   :  { %791 = vmatprep.subr.mxu0 %v5499_v12  ;;  %862 = vmatprep.subr.mxu1 %v5501_v13 }
  0xa3   :  { %792 = vmatpush1.msra.mxu0 %v5505_v14  ;;  %863 = vmatpush1.msra.mxu1 %v5507_v15 }
  0xa4   :  { %793 = vmatprep.subr.mxu0 %v5509_v16  ;;  %864 = vmatprep.subr.mxu1 %v5511_v17 }
  0xa5   :  { %794 = vmatpush1.msra.mxu0 %v5517_v18  ;;  %865 = vmatpush1.msra.mxu1 %v5519_v19 }
  0xa6   :  { %795 = vmatprep.subr.mxu0 %v5525_v21  ;;  %866 = vmatprep.subr.mxu1 %v5527_v22 }
  0xa7   :  { %796 = vmatpush1.msra.mxu0 %v5531_v23  ;;  %867 = vmatpush1.msra.mxu1 %v5533_v24 }
  0xa8   :  { %797 = vmatprep.subr.mxu0 %v5535_v25  ;;  %868 = vmatprep.subr.mxu1 %v5537_v26 }
  0xa9   :  { %798 = vmatpush1.msra.mxu0 %v5543_v27  ;;  %869 = vmatpush1.msra.mxu1 %v5545_v28 }
  0xaa   :  { %799 = vmatprep.subr.mxu0 %v5551_v30  ;;  %870 = vmatprep.subr.mxu1 %v5553_v31 }
  0xab   :  { %800 = vmatpush1.msra.mxu0 %v5557_v32  ;;  %871 = vmatpush1.msra.mxu1 %v5559_v33 }
  0xac   :  { %801 = vmatprep.subr.mxu0 %v5561_v34  ;;  %872 = vmatprep.subr.mxu1 %v5563_v35 }
  0xad   :  { %802 = vmatpush1.msra.mxu0 %v5569_v36  ;;  %873 = vmatpush1.msra.mxu1 %v5571_v37 }
  0xae   :  { %803 = vmatprep.subr.mxu0 %v5577_v39  ;;  %874 = vmatprep.subr.mxu1 %v5579_v40 }
  0xaf   :  { %804 = vmatpush1.msra.mxu0 %v5583_v41  ;;  %875 = vmatpush1.msra.mxu1 %v5585_v42 }
  0xb0   :  { %805 = vmatprep.subr.mxu0 %v5587_v43  ;;  %876 = vmatprep.subr.mxu1 %v5589_v44 }
  0xb1   :  { %806 = vmatpush1.msra.mxu0 %v5595_v45  ;;  %877 = vmatpush1.msra.mxu1 %v5597_v46 }
  0xb2   :  { %807 = vmatprep.subr.mxu0 %v5603_v48  ;;  %878 = vmatprep.subr.mxu1 %v5605_v49 }
  0xb3   :  { %808 = vmatpush1.msra.mxu0 %v5609_v50  ;;  %879 = vmatpush1.msra.mxu1 %v5611_v51 }
  0xb4   :  { %809 = vmatprep.subr.mxu0 %v5613_v52  ;;  %880 = vmatprep.subr.mxu1 %v5615_v53  ;;  %v7586_v52 = vld [vmem:[#allocation35_spill] sm:$0xff] }
  0xb5   :  { %810 = vmatpush1.msra.mxu0 %v5621_v54  ;;  %881 = vmatpush1.msra.mxu1 %v5623_v55 }
  0xb6   :  { %811 = vmatprep.subr.mxu0 %v5629_v57  ;;  %882 = vmatprep.subr.mxu1 %v5631_v58 }
  0xb7   :  { %812 = vmatpush1.msra.mxu0 %v5635_v59  ;;  %883 = vmatpush1.msra.mxu1 %v5637_v60 }
  0xb8   :  { %813 = vmatprep.subr.mxu0 %v5639_v61  ;;  %884 = vmatprep.subr.mxu1 %v5641_v62 }
  0xb9   :  { %814 = vmatpush1.msra.mxu0 %v5647_v63  ;;  %885 = vmatpush1.msra.mxu1 %v7586_v52 }
  0xba   :  { %815 = vmatprep.subr.mxu0 %v5655_v11  ;;  %886 = vmatprep.subr.mxu1 %v5657_v20  ;;  %v189_v20 = vlaneseq }
  0xbb   :  { %816 = vmatpush1.msra.mxu0 %v5661_v29  ;;  %887 = vmatpush1.msra.mxu1 %v5663_v38 }
  0xbc   :  { %817 = vmatprep.subr.mxu0 %v5665_v47  ;;  %888 = vmatprep.subr.mxu1 %v5667_v56  ;;  %v5753_v29 = vshrl.u32 %v189_v20, 7 }
  0xbd   :  { %818 = vmatpush1.msra.mxu0 %v5671_v0  ;;  %851 = vmatprep.mubr.f32.mxu0 %v7585_v2 }
  0xbe   :  { %889 = vmatpush1.msra.mxu1 %v5675_v1  ;;  %922 = vmatprep.mubr.f32.mxu1 %v7585_v2  ;;  %7587 = vst [vmem:[#allocation44_spill] sm:$0xff] %v5753_v29  ;;  %v7401_v56 = vsub.s32 0, %v5753_v29  ;;  %v7403_v0 = vsub.s32 2, %v5753_v29  ;;  %v187_v1 = vld [vmem:[%s7373_s3] sm:$0xf]  ;;  %v7408_v20 = vsub.s32 3, %v5753_v29 }
  0xbf   :  { %1034 = vmatprep.subr.mxu0 %v5475_v3  ;;  %1105 = vmatprep.subr.mxu1 %v5477_v4  ;;  %v7407_v4 = vsub.s32 1, %v5753_v29 }
  0xc0   :  { %v192_v11 = vrot.slane %v187_v1, %v7401_v56  ;;  %v5774_v52 = vrot.slane %v187_v1, %v7403_v0  ;;  %v5780_v60 = vrot.slane %v187_v1, %v7408_v20 }
  0xc1   :  { %v196_v61 = vrot.slane %v187_v1, %v7407_v4 }
 0x12d   :  { %v5755_v38 = vpop.f32.mrf.mxu0  ;;  %v5757_v47 = vpop.f32.mrf.mxu1 }
 0x12f   :  { %v5764_v2 = vpop.f32.mrf.mxu0  ;;  %v5766_v3 = vpop.f32.mrf.mxu1 }
 0x133   :  { %v281_v63 = vpop.f32.mrf.mxu0  ;;  %v394_v62 = vpop.f32.mrf.mxu1 }
 0x134   :  { %v5782_v59 = vadd.f32 %v281_v63, %v192_v11  ;;  %v5785_v58 = vadd.f32 %v394_v62, %v5774_v52 }
 0x135   :  { %v283_v57 = vpop.f32.mrf.mxu0  ;;  %v396_v56 = vpop.f32.mrf.mxu1 }
 0x136   :  { %7588 = vst [vmem:[#allocation45_spill] sm:$0xff] %v5785_v58  ;;  %v5787_v55 = vadd.f32 %v283_v57, %v196_v61  ;;  %v5790_v0 = vadd.f32 %v396_v56, %v5780_v60 }
 0x138   :  { %7589 = vst [vmem:[#allocation46_spill] sm:$0xff] %v5787_v55  ;;  %7590 = vst [vmem:[#allocation47_spill] sm:$0xff] %v5790_v0 }
 0x139   :  { %v287_v54 = vpop.f32.mrf.mxu0  ;;  %v400_v53 = vpop.f32.mrf.mxu1 }
 0x13a   :  { %v5792_v51 = vadd.f32 %v287_v54, %v192_v11  ;;  %v5795_v4 = vadd.f32 %v400_v53, %v5774_v52 }
 0x13b   :  { %v289_v1 = vpop.f32.mrf.mxu0  ;;  %v402_v63 = vpop.f32.mrf.mxu1 }
 0x13c   :  { %7591 = vst [vmem:[#allocation48_spill] sm:$0xff] %v5792_v51  ;;  %7592 = vst [vmem:[#allocation49_spill] sm:$0xff] %v5795_v4  ;;  %v5797_v20 = vadd.f32 %v289_v1, %v196_v61  ;;  %v5800_v62 = vadd.f32 %v402_v63, %v5780_v60 }
 0x13e   :  { %7593 = vst [vmem:[#allocation50_spill] sm:$0xff] %v5797_v20  ;;  %7594 = vst [vmem:[#allocation51_spill] sm:$0xff] %v5800_v62 }
 0x13f   :  { %v293_v29 = vpop.f32.mrf.mxu0  ;;  %v406_v57 = vpop.f32.mrf.mxu1 }
 0x140   :  { %v5802_v58 = vadd.f32 %v293_v29, %v192_v11  ;;  %v5805_v56 = vadd.f32 %v406_v57, %v5774_v52 }
 0x141   :  { %v295_v0 = vpop.f32.mrf.mxu0  ;;  %v408_v54 = vpop.f32.mrf.mxu1 }
 0x142   :  { %7595 = vst [vmem:[#allocation52_spill] sm:$0xff] %v5802_v58  ;;  %7596 = vst [vmem:[#allocation53_spill] sm:$0xff] %v5805_v56  ;;  %v5807_v51 = vadd.f32 %v295_v0, %v196_v61  ;;  %v5810_v53 = vadd.f32 %v408_v54, %v5780_v60 }
 0x144   :  { %7597 = vst [vmem:[#allocation54_spill] sm:$0xff] %v5807_v51  ;;  %7598 = vst [vmem:[#allocation55_spill] sm:$0xff] %v5810_v53 }
 0x145   :  { %v299_v4 = vpop.f32.mrf.mxu0  ;;  %v412_v1 = vpop.f32.mrf.mxu1 }
 0x146   :  { %v5812_v20 = vadd.f32 %v299_v4, %v192_v11  ;;  %v5815_v63 = vadd.f32 %v412_v1, %v5774_v52 }
 0x147   :  { %v301_v62 = vpop.f32.mrf.mxu0  ;;  %v414_v29 = vpop.f32.mrf.mxu1 }
 0x148   :  { %7599 = vst [vmem:[#allocation56_spill] sm:$0xff] %v5812_v20  ;;  %7600 = vst [vmem:[#allocation57_spill] sm:$0xff] %v5815_v63  ;;  %v5817_v58 = vadd.f32 %v301_v62, %v196_v61  ;;  %v5820_v57 = vadd.f32 %v414_v29, %v5780_v60 }
 0x14a   :  { %7601 = vst [vmem:[#allocation58_spill] sm:$0xff] %v5817_v58  ;;  %7602 = vst [vmem:[#allocation59_spill] sm:$0xff] %v5820_v57 }
 0x14b   :  { %v305_v56 = vpop.f32.mrf.mxu0  ;;  %v418_v0 = vpop.f32.mrf.mxu1 }
 0x14c   :  { %v5822_v51 = vadd.f32 %v305_v56, %v192_v11  ;;  %v5825_v54 = vadd.f32 %v418_v0, %v5774_v52 }
 0x14d   :  { %v307_v53 = vpop.f32.mrf.mxu0  ;;  %v420_v4 = vpop.f32.mrf.mxu1 }
 0x14e   :  { %7603 = vst [vmem:[#allocation60_spill] sm:$0xff] %v5822_v51  ;;  %7604 = vst [vmem:[#allocation61_spill] sm:$0xff] %v5825_v54  ;;  %v5827_v20 = vadd.f32 %v307_v53, %v196_v61  ;;  %v5830_v1 = vadd.f32 %v420_v4, %v5780_v60 }
 0x150   :  { %7605 = vst [vmem:[#allocation62_spill] sm:$0xff] %v5827_v20  ;;  %7606 = vst [vmem:[#allocation63_spill] sm:$0xff] %v5830_v1 }
 0x151   :  { %v311_v63 = vpop.f32.mrf.mxu0  ;;  %v424_v62 = vpop.f32.mrf.mxu1 }
 0x152   :  { %v5832_v58 = vadd.f32 %v311_v63, %v192_v11  ;;  %v5835_v29 = vadd.f32 %v424_v62, %v5774_v52 }
 0x153   :  { %v313_v57 = vpop.f32.mrf.mxu0  ;;  %v426_v56 = vpop.f32.mrf.mxu1 }
 0x154   :  { %7607 = vst [vmem:[#allocation64_spill] sm:$0xff] %v5832_v58  ;;  %7608 = vst [vmem:[#allocation65_spill] sm:$0xff] %v5835_v29  ;;  %v5837_v51 = vadd.f32 %v313_v57, %v196_v61  ;;  %v5840_v0 = vadd.f32 %v426_v56, %v5780_v60  ;;  %v276_v57 = vadd.f32 %v5755_v38, %v192_v11 }
 0x155   :  { %v278_v56 = vadd.f32 %v5764_v2, %v196_v61 }
 0x156   :  { %7609 = vst [vmem:[#allocation66_spill] sm:$0xff] %v5837_v51  ;;  %7610 = vst [vmem:[#allocation67_spill] sm:$0xff] %v5840_v0 }
 0x157   :  { %v317_v54 = vpop.f32.mrf.mxu0  ;;  %v430_v53 = vpop.f32.mrf.mxu1 }
 0x158   :  { %v5842_v20 = vadd.f32 %v317_v54, %v192_v11  ;;  %v5845_v4 = vadd.f32 %v430_v53, %v5774_v52 }
 0x159   :  { %v319_v1 = vpop.f32.mrf.mxu0  ;;  %v432_v63 = vpop.f32.mrf.mxu1 }
 0x15a   :  { %7611 = vst [vmem:[#allocation68_spill] sm:$0xff] %v5842_v20  ;;  %7612 = vst [vmem:[#allocation69_spill] sm:$0xff] %v5845_v4  ;;  %v5847_v58 = vadd.f32 %v319_v1, %v196_v61  ;;  %v5850_v62 = vadd.f32 %v432_v63, %v5780_v60  ;;  %v391_v1 = vadd.f32 %v5766_v3, %v5780_v60 }
 0x15b   :  { %v389_v63 = vadd.f32 %v5757_v47, %v5774_v52 }
 0x15c   :  { %7613 = vst [vmem:[#allocation70_spill] sm:$0xff] %v5847_v58  ;;  %7614 = vst [vmem:[#allocation71_spill] sm:$0xff] %v5850_v62 }
 0x15d   :  { %v607_v29 = vpop.f32.mrf.mxu0  ;;  %v678_v20 = vpop.f32.mrf.mxu1 }
 0x15e   :  { %v683_v0 = vadd.f32 %v607_v29, %v276_v57  ;;  %v685_v62 = vadd.f32 %v678_v20, %v389_v63 }
 0x15f   :  { %v609_v51 = vpop.f32.mrf.mxu0  ;;  %v680_v4 = vpop.f32.mrf.mxu1 }
 0x160   :  { %v4854_v55 = vmul.f32 -1.442695, %v683_v0  ;;  %v684_v54 = vadd.f32 %v609_v51, %v278_v56  ;;  %v686_v58 = vadd.f32 %v680_v4, %v391_v1 }
 0x162   :  { %4968 = vpow2.f32 %v4854_v55  ;;  %v4855_v53 = vmul.f32 -1.442695, %v684_v54  ;;  %v4856_v11 = vmul.f32 -1.442695, %v686_v58 }
 0x164   :  { %4970 = vpow2.f32 %v4855_v53 }
 0x165   :  { %4972 = vpow2.f32 %v4856_v11 }
 0x16f   :  { %v4969_v38 = vpop.eup %4968 }
 0x170   :  { %v690_v61 = vadd.f32 1.0, %v4969_v38 }
 0x171   :  { %v4971_v2 = vpop.eup %4970 }
 0x172   :  { %4974 = vrcp.f32 %v690_v61  ;;  %v696_v51 = vadd.f32 1.0, %v4971_v2  ;;  %v4973_v55 = vpop.eup %4972  ;;  %v5943_v2 = vld [vmem:[#allocation11 + $0x1e8] sm:$0xff] }
 0x173   :  { %4976 = vtanh.f32 %v685_v62  ;;  %v703_v56 = vadd.f32 1.0, %v4973_v55  ;;  %v5949_v55 = vld [vmem:[#allocation11 + $0x1e0] sm:$0xff] }
 0x174   :  { %4978 = vrcp.f32 %v696_v51  ;;  %v5945_v51 = vld [vmem:[#allocation11 + $0x1f8] sm:$0xff] }
 0x175   :  { %4980 = vrcp.f32 %v703_v56  ;;  %v5961_v56 = vld [vmem:[#allocation11 + $0x1c0] sm:$0xff] }
 0x17f   :  { %v4975_v29 = vpop.eup %4974 }
 0x180   :  { %v4977_v0 = vpop.eup %4976 }
 0x181   :  { %v4979_v57 = vpop.eup %4978  ;;  %v708_v3 = vmul.f32 %v4977_v0, %v4975_v29  ;;  %v5951_v29 = vld [vmem:[#allocation11 + $0x1f0] sm:$0xff]  ;;  %v5955_v0 = vld [vmem:[#allocation11 + $0x1c8] sm:$0xff] }
 0x182   :  { %v707_v60 = vmul.f32 0.0, %v4979_v57  ;;  %v4981_v52 = vpop.eup %4980  ;;  %v5957_v57 = vld [vmem:[#allocation11 + $0x1d8] sm:$0xff] }
 0x184   :  { %v5858_v4 = vadd.f32 %v708_v3, %v707_v60  ;;  %v5963_v60 = vld [vmem:[#allocation11 + $0x1d0] sm:$0xff]  ;;  %v5967_v3 = vld [vmem:[#allocation11 + $0x1a8] sm:$0xff] }
 0x186   :  { %4982 = vtanh.f32 %v5858_v4 }
 0x193   :  { %v4983_v58 = vpop.eup %4982 }
 0x194   :  { %v5861_v47 = vmul.f32 %v4983_v58, %v4981_v52  ;;  %v5973_v52 = vld [vmem:[#allocation11 + $0x1a0] sm:$0xff]  ;;  %v5975_v58 = vld [vmem:[#allocation11 + $0x1b0] sm:$0xff] }
 0x196   :  { %7615 = vst [vmem:[#allocation72_spill] sm:$0xff] %v5861_v47  ;;  %852 = vmatmul.mubr.f32.vlgmr.msra.gmra.mxu0 %v5861_v47  ;;  %923 = vmatmul.mubr.f32.vlgmr.msra.gmra.mxu1 %v5861_v47  ;;  %v6121_v47 = vld [vmem:[#allocation11 + $0x18] sm:$0xff] }
 0x197   :  { %1035 = vmatpush1.msra.mxu0 %v5479_v5  ;;  %1106 = vmatpush1.msra.mxu1 %v5481_v6  ;;  %v7616_v5 = vld [vmem:[#allocation23_spill] sm:$0xff]  ;;  %v7617_v6 = vld [vmem:[#allocation24_spill] sm:$0xff] }
 0x198   :  { %1036 = vmatprep.subr.mxu0 %v5483_v7  ;;  %1107 = vmatprep.subr.mxu1 %v5485_v8  ;;  %v7618_v7 = vld [vmem:[#allocation25_spill] sm:$0xff]  ;;  %v7619_v8 = vld [vmem:[#allocation26_spill] sm:$0xff]  ;;  %7642 = vst [vmem:[#allocation24_spill] sm:$0xff] %v5943_v2 }
 0x199   :  { %1037 = vmatpush1.msra.mxu0 %v5491_v9  ;;  %1108 = vmatpush1.msra.mxu1 %v5493_v10  ;;  %v7620_v9 = vld [vmem:[#allocation27_spill] sm:$0xff]  ;;  %v7621_v10 = vld [vmem:[#allocation28_spill] sm:$0xff]  ;;  %7643 = vst [vmem:[#allocation25_spill] sm:$0xff] %v5945_v51 }
 0x19a   :  { %1038 = vmatprep.subr.mxu0 %v5499_v12  ;;  %1109 = vmatprep.subr.mxu1 %v5501_v13  ;;  %v7622_v12 = vld [vmem:[#allocation29_spill] sm:$0xff]  ;;  %v7623_v13 = vld [vmem:[#allocation30_spill] sm:$0xff] }
 0x19b   :  { %1039 = vmatpush1.msra.mxu0 %v5505_v14  ;;  %1110 = vmatpush1.msra.mxu1 %v5507_v15  ;;  %v7624_v14 = vld [vmem:[#allocation31_spill] sm:$0xff]  ;;  %v7625_v15 = vld [vmem:[#allocation32_spill] sm:$0xff] }
 0x19c   :  { %1040 = vmatprep.subr.mxu0 %v5509_v16  ;;  %1111 = vmatprep.subr.mxu1 %v5511_v17  ;;  %v7626_v16 = vld [vmem:[#allocation33_spill] sm:$0xff]  ;;  %v7627_v17 = vld [vmem:[#allocation34_spill] sm:$0xff] }
 0x19d   :  { %1041 = vmatpush1.msra.mxu0 %v5517_v18  ;;  %1112 = vmatpush1.msra.mxu1 %v5519_v19  ;;  %v7628_v18 = vld [vmem:[#allocation35_spill] sm:$0xff]  ;;  %v7629_v19 = vld [vmem:[#allocation36_spill] sm:$0xff] }
 0x19e   :  { %1042 = vmatprep.subr.mxu0 %v5525_v21  ;;  %1113 = vmatprep.subr.mxu1 %v5527_v22  ;;  %v7630_v21 = vld [vmem:[#allocation37_spill] sm:$0xff]  ;;  %v7631_v22 = vld [vmem:[#allocation38_spill] sm:$0xff] }
 0x19f   :  { %1043 = vmatpush1.msra.mxu0 %v5531_v23  ;;  %1114 = vmatpush1.msra.mxu1 %v5533_v24  ;;  %v7632_v23 = vld [vmem:[#allocation39_spill] sm:$0xff]  ;;  %v7633_v24 = vld [vmem:[#allocation40_spill] sm:$0xff] }
 0x1a0   :  { %1044 = vmatprep.subr.mxu0 %v5535_v25  ;;  %1115 = vmatprep.subr.mxu1 %v5537_v26  ;;  %v7634_v25 = vld [vmem:[#allocation41_spill] sm:$0xff]  ;;  %v7635_v26 = vld [vmem:[#allocation42_spill] sm:$0xff]  ;;  %7658 = vst [vmem:[#allocation40_spill] sm:$0xff] %v6121_v47 }
 0x1a1   :  { %1045 = vmatpush1.msra.mxu0 %v5543_v27  ;;  %1116 = vmatpush1.msra.mxu1 %v5545_v28  ;;  %v7636_v27 = vmov 0.0   ;;  %v7637_v28 = vld [vmem:[#allocation43_spill] sm:$0xff] }
 0x1a2   :  { %1046 = vmatprep.subr.mxu0 %v5551_v30  ;;  %1117 = vmatprep.subr.mxu1 %v5553_v31 }
 0x1a3   :  { %1047 = vmatpush1.msra.mxu0 %v5557_v32  ;;  %1118 = vmatpush1.msra.mxu1 %v5559_v33 }
 0x1a4   :  { %1048 = vmatprep.subr.mxu0 %v5561_v34  ;;  %1119 = vmatprep.subr.mxu1 %v5563_v35  ;;  %v7638_v34 = vld [vmem:[#allocation46_spill] sm:$0xff] }
 0x1a5   :  { %1049 = vmatpush1.msra.mxu0 %v5569_v36  ;;  %1120 = vmatpush1.msra.mxu1 %v5571_v37 }
 0x1a6   :  { %1050 = vmatprep.subr.mxu0 %v5577_v39  ;;  %1121 = vmatprep.subr.mxu1 %v5579_v40  ;;  %v7639_v40 = vld [vmem:[#allocation47_spill] sm:$0xff] }
 0x1a7   :  { %1051 = vmatpush1.msra.mxu0 %v5583_v41  ;;  %1122 = vmatpush1.msra.mxu1 %v5585_v42  ;;  %v7640_v42 = vld [vmem:[#allocation45_spill] sm:$0xff] }
 0x1a8   :  { %1052 = vmatprep.subr.mxu0 %v5587_v43  ;;  %1123 = vmatprep.subr.mxu1 %v5589_v44 }
 0x1a9   :  { %1053 = vmatpush1.msra.mxu0 %v5595_v45  ;;  %1124 = vmatpush1.msra.mxu1 %v5597_v46 }
 0x1aa   :  { %1054 = vmatprep.subr.mxu0 %v5603_v48  ;;  %1125 = vmatprep.subr.mxu1 %v5605_v49 }
 0x1ab   :  { %1055 = vmatpush1.msra.mxu0 %v5609_v50  ;;  %1126 = vmatpush1.msra.mxu1 %v7616_v5  ;;  %v5979_v5 = vld [vmem:[#allocation11 + $0x188] sm:$0xff] }
 0x1ac   :  { %1056 = vmatprep.subr.mxu0 %v7617_v6  ;;  %1127 = vmatprep.subr.mxu1 %v7618_v7  ;;  %v5981_v6 = vld [vmem:[#allocation11 + $0x198] sm:$0xff]  ;;  %v5985_v7 = vld [vmem:[#allocation11 + $0x180] sm:$0xff] }
 0x1ad   :  { %1057 = vmatpush1.msra.mxu0 %v7619_v8  ;;  %1128 = vmatpush1.msra.mxu1 %v7620_v9  ;;  %v5987_v8 = vld [vmem:[#allocation11 + $0x190] sm:$0xff]  ;;  %v5991_v9 = vld [vmem:[#allocation11 + $0x168] sm:$0xff] }
 0x1ae   :  { %1058 = vmatprep.subr.mxu0 %v7621_v10  ;;  %1129 = vmatprep.subr.mxu1 %v7622_v12  ;;  %v5993_v10 = vld [vmem:[#allocation11 + $0x178] sm:$0xff]  ;;  %v5997_v12 = vld [vmem:[#allocation11 + $0x160] sm:$0xff] }
 0x1af   :  { %1059 = vmatpush1.msra.mxu0 %v7623_v13  ;;  %1130 = vmatpush1.msra.mxu1 %v7624_v14  ;;  %v5999_v13 = vld [vmem:[#allocation11 + $0x170] sm:$0xff]  ;;  %v6003_v14 = vld [vmem:[#allocation11 + $0x148] sm:$0xff] }
 0x1b0   :  { %1060 = vmatprep.subr.mxu0 %v7625_v15  ;;  %1131 = vmatprep.subr.mxu1 %v7626_v16  ;;  %v6005_v15 = vld [vmem:[#allocation11 + $0x158] sm:$0xff]  ;;  %v6009_v16 = vld [vmem:[#allocation11 + $0x140] sm:$0xff] }
 0x1b1   :  { %1061 = vmatpush1.msra.mxu0 %v7627_v17  ;;  %1132 = vmatpush1.msra.mxu1 %v7628_v18  ;;  %v6011_v17 = vld [vmem:[#allocation11 + $0x150] sm:$0xff]  ;;  %v6015_v18 = vld [vmem:[#allocation11 + $0x128] sm:$0xff] }
 0x1b2   :  { %1062 = vmatprep.subr.mxu0 %v7629_v19  ;;  %1133 = vmatprep.subr.mxu1 %v7630_v21  ;;  %v6017_v19 = vld [vmem:[#allocation11 + $0x138] sm:$0xff]  ;;  %v6021_v21 = vld [vmem:[#allocation11 + $0x120] sm:$0xff] }
 0x1b3   :  { %1063 = vmatpush1.msra.mxu0 %v7631_v22  ;;  %1134 = vmatpush1.msra.mxu1 %v7632_v23  ;;  %v6023_v22 = vld [vmem:[#allocation11 + $0x130] sm:$0xff]  ;;  %v6027_v23 = vld [vmem:[#allocation11 + $0x108] sm:$0xff] }
 0x1b4   :  { %1064 = vmatprep.subr.mxu0 %v7633_v24  ;;  %1135 = vmatprep.subr.mxu1 %v7634_v25  ;;  %v6029_v24 = vld [vmem:[#allocation11 + $0x118] sm:$0xff]  ;;  %v6031_v25 = vld [vmem:[#allocation11 + $0x100] sm:$0xff] }
 0x1b5   :  { %1065 = vmatpush1.msra.mxu0 %v7635_v26  ;;  %1098 = vmatprep.mubr.f32.mxu0 %v7636_v27  ;;  %v6035_v26 = vld [vmem:[#allocation11 + $0x110] sm:$0xff] }
 0x1b6   :  { %1136 = vmatpush1.msra.mxu1 %v7637_v28  ;;  %1169 = vmatprep.mubr.f32.mxu1 %v7636_v27  ;;  %v6037_v28 = vld [vmem:[#allocation11 + $0xe8] sm:$0xff] }
 0x1b7   :  { %1281 = vmatprep.subr.mxu0 %v5943_v2  ;;  %1352 = vmatprep.subr.mxu1 %v5945_v51 }
 0x256   :  { %v853_v30 = vpop.f32.mrf.mxu0  ;;  %v924_v36 = vpop.f32.mrf.mxu1 }
 0x257   :  { %v929_v31 = vadd.f32 %v853_v30, %v5782_v59  ;;  %v931_v43 = vadd.f32 %v924_v36, %v7640_v42  ;;  %v6039_v30 = vld [vmem:[#allocation11 + $0xf8] sm:$0xff]  ;;  %v6055_v36 = vld [vmem:[#allocation11 + $0xd0] sm:$0xff]  ;;  %v6071_v42 = vld [vmem:[#allocation11 + $0x88] sm:$0xff] }
 0x258   :  { %v855_v32 = vpop.f32.mrf.mxu0  ;;  %v926_v39 = vpop.f32.mrf.mxu1 }
 0x259   :  { %v4857_v33 = vmul.f32 -1.442695, %v929_v31  ;;  %v930_v35 = vadd.f32 %v855_v32, %v7638_v34  ;;  %v932_v41 = vadd.f32 %v926_v39, %v7639_v40  ;;  %v6043_v31 = vld [vmem:[#allocation11 + $0xe0] sm:$0xff]  ;;  %v6045_v32 = vld [vmem:[#allocation11 + $0xf0] sm:$0xff]  ;;  %v6051_v34 = vld [vmem:[#allocation11 + $0xd8] sm:$0xff] }
 0x25a   :  { %v6061_v39 = vld [vmem:[#allocation11 + $0xb8] sm:$0xff]  ;;  %v6065_v40 = vld [vmem:[#allocation11 + $0xa0] sm:$0xff] }
 0x25b   :  { %4984 = vpow2.f32 %v4857_v33  ;;  %v4858_v37 = vmul.f32 -1.442695, %v930_v35  ;;  %v4859_v44 = vmul.f32 -1.442695, %v932_v41  ;;  %v6047_v33 = vld [vmem:[#allocation11 + $0xc8] sm:$0xff]  ;;  %v6053_v35 = vld [vmem:[#allocation11 + $0xc0] sm:$0xff] }
 0x25c   :  { %v6067_v41 = vld [vmem:[#allocation11 + $0xb0] sm:$0xff] }
 0x25d   :  { %4986 = vpow2.f32 %v4858_v37  ;;  %v6059_v37 = vld [vmem:[#allocation11 + $0xa8] sm:$0xff] }
 0x25e   :  { %4988 = vtanh.f32 %v931_v43  ;;  %v6073_v43 = vld [vmem:[#allocation11 + $0x98] sm:$0xff] }
 0x25f   :  { %4990 = vpow2.f32 %v4859_v44  ;;  %v6077_v44 = vld [vmem:[#allocation11 + $0x80] sm:$0xff] }
 0x268   :  { %v4985_v45 = vpop.eup %4984 }
 0x269   :  { %v936_v46 = vadd.f32 1.0, %v4985_v45  ;;  %v6079_v45 = vld [vmem:[#allocation11 + $0x90] sm:$0xff] }
 0x26a   :  { %v4987_v48 = vpop.eup %4986  ;;  %7644 = vst [vmem:[#allocation26_spill] sm:$0xff] %v6079_v45 }
 0x26b   :  { %4992 = vrcp.f32 %v936_v46  ;;  %v942_v49 = vadd.f32 1.0, %v4987_v48  ;;  %v4989_v50 = vpop.eup %4988  ;;  %v6083_v46 = vld [vmem:[#allocation11 + $0x68] sm:$0xff]  ;;  %v6085_v48 = vld [vmem:[#allocation11 + $0x78] sm:$0xff] }
 0x26c   :  { %v4991_v59 = vpop.eup %4990  ;;  %7645 = vst [vmem:[#allocation27_spill] sm:$0xff] %v6083_v46  ;;  %7646 = vst [vmem:[#allocation28_spill] sm:$0xff] %v6085_v48 }
 0x26d   :  { %4994 = vrcp.f32 %v942_v49  ;;  %v949_v53 = vadd.f32 1.0, %v4991_v59  ;;  %v6089_v49 = vld [vmem:[#allocation11 + $0x60] sm:$0xff]  ;;  %v6095_v59 = vld [vmem:[#allocation11 + $0x48] sm:$0xff] }
 0x26e   :  { %7647 = vst [vmem:[#allocation29_spill] sm:$0xff] %v6089_v49  ;;  %7649 = vst [vmem:[#allocation31_spill] sm:$0xff] %v6095_v59 }
 0x26f   :  { %4996 = vrcp.f32 %v949_v53  ;;  %v6107_v53 = vld [vmem:[#allocation11 + $0x28] sm:$0xff] }
 0x270   :  { %7653 = vst [vmem:[#allocation35_spill] sm:$0xff] %v6107_v53 }
 0x278   :  { %v4993_v20 = vpop.eup %4992 }
 0x279   :  { %v954_v62 = vmul.f32 %v4993_v20, %v4989_v50  ;;  %v6091_v50 = vld [vmem:[#allocation11 + $0x70] sm:$0xff]  ;;  %v6097_v20 = vld [vmem:[#allocation11 + $0x58] sm:$0xff] }
 0x27a   :  { %v4995_v54 = vpop.eup %4994  ;;  %7648 = vst [vmem:[#allocation30_spill] sm:$0xff] %v6091_v50  ;;  %7650 = vst [vmem:[#allocation32_spill] sm:$0xff] %v6097_v20 }
 0x27b   :  { %v953_v1 = vmul.f32 %v4995_v54, %v5858_v4  ;;  %v5969_v4 = vld [vmem:[#allocation11 + $0x1b8] sm:$0xff]  ;;  %v6103_v54 = vld [vmem:[#allocation11 + $0x50] sm:$0xff] }
 0x27c   :  { %v4997_v11 = vpop.eup %4996  ;;  %7652 = vst [vmem:[#allocation34_spill] sm:$0xff] %v6103_v54 }
 0x27d   :  { %v5934_v63 = vadd.f32 %v954_v62, %v953_v1  ;;  %v6101_v62 = vld [vmem:[#allocation11 + $0x40] sm:$0xff]  ;;  %v6109_v1 = vld [vmem:[#allocation11 + $0x38] sm:$0xff] }
 0x27e   :  { %7651 = vst [vmem:[#allocation33_spill] sm:$0xff] %v6101_v62  ;;  %7654 = vst [vmem:[#allocation36_spill] sm:$0xff] %v6109_v1 }
 0x27f   :  { %4998 = vtanh.f32 %v5934_v63 }
 0x28c   :  { %v4999_v38 = vpop.eup %4998 }
 0x28d   :  { %v5937_v61 = vmul.f32 %v4999_v38, %v4997_v11  ;;  %v6113_v11 = vld [vmem:[#allocation11 + $0x20] sm:$0xff]  ;;  %v6115_v38 = vld [vmem:[#allocation11 + $0x30] sm:$0xff] }
 0x28e   :  { %7655 = vst [vmem:[#allocation37_spill] sm:$0xff] %v6113_v11  ;;  %7656 = vst [vmem:[#allocation38_spill] sm:$0xff] %v6115_v38 }
 0x28f   :  { %7641 = vst [vmem:[#allocation23_spill] sm:$0xff] %v5937_v61  ;;  %1099 = vmatmul.mubr.f32.vlgmr.msra.gmra.mxu0 %v5937_v61  ;;  %1170 = vmatmul.mubr.f32.vlgmr.msra.gmra.mxu1 %v5937_v61  ;;  %v6119_v61 = vld [vmem:[#allocation11 + $0x8] sm:$0xff] }
 0x290   :  { %1345 = vmatprep.mubr.f32.mxu0 %v7636_v27  ;;  %1416 = vmatprep.mubr.f32.mxu1 %v7636_v27  ;;  %7657 = vst [vmem:[#allocation39_spill] sm:$0xff] %v6119_v61  ;;  %v6125_v27 = vld [vmem:[#allocation11] sm:$0xff] }
 0x291   :  { %1282 = vmatpush1.msra.mxu0 %v5949_v55  ;;  %1353 = vmatpush1.msra.mxu1 %v5951_v29  ;;  %7659 = vst [vmem:[#allocation41_spill] sm:$0xff] %v6125_v27 }
 0x292   :  { %1283 = vmatprep.subr.mxu0 %v5955_v0  ;;  %1354 = vmatprep.subr.mxu1 %v5957_v57 }
 0x293   :  { %1284 = vmatpush1.msra.mxu0 %v5961_v56  ;;  %1355 = vmatpush1.msra.mxu1 %v5963_v60 }
 0x294   :  { %1285 = vmatprep.subr.mxu0 %v5967_v3  ;;  %1356 = vmatprep.subr.mxu1 %v5969_v4 }
 0x295   :  { %1286 = vmatpush1.msra.mxu0 %v5973_v52  ;;  %1357 = vmatpush1.msra.mxu1 %v5975_v58 }
 0x296   :  { %1287 = vmatprep.subr.mxu0 %v5979_v5  ;;  %1358 = vmatprep.subr.mxu1 %v5981_v6 }
 0x297   :  { %1288 = vmatpush1.msra.mxu0 %v5985_v7  ;;  %1359 = vmatpush1.msra.mxu1 %v5987_v8 }
 0x298   :  { %1289 = vmatprep.subr.mxu0 %v5991_v9  ;;  %1360 = vmatprep.subr.mxu1 %v5993_v10 }
 0x299   :  { %1290 = vmatpush1.msra.mxu0 %v5997_v12  ;;  %1361 = vmatpush1.msra.mxu1 %v5999_v13 }
 0x29a   :  { %1291 = vmatprep.subr.mxu0 %v6003_v14  ;;  %1362 = vmatprep.subr.mxu1 %v6005_v15 }
 0x29b   :  { %1292 = vmatpush1.msra.mxu0 %v6009_v16  ;;  %1363 = vmatpush1.msra.mxu1 %v6011_v17 }
 0x29c   :  { %1293 = vmatprep.subr.mxu0 %v6015_v18  ;;  %1364 = vmatprep.subr.mxu1 %v6017_v19 }
 0x29d   :  { %1294 = vmatpush1.msra.mxu0 %v6021_v21  ;;  %1365 = vmatpush1.msra.mxu1 %v6023_v22 }
 0x29e   :  { %1295 = vmatprep.subr.mxu0 %v6027_v23  ;;  %1366 = vmatprep.subr.mxu1 %v6029_v24 }
 0x29f   :  { %1296 = vmatpush1.msra.mxu0 %v6031_v25  ;;  %1367 = vmatpush1.msra.mxu1 %v6035_v26 }
 0x2a0   :  { %1297 = vmatprep.subr.mxu0 %v6037_v28  ;;  %1368 = vmatprep.subr.mxu1 %v6039_v30 }
 0x2a1   :  { %1298 = vmatpush1.msra.mxu0 %v6043_v31  ;;  %1369 = vmatpush1.msra.mxu1 %v6045_v32 }
 0x2a2   :  { %1299 = vmatprep.subr.mxu0 %v6047_v33  ;;  %1370 = vmatprep.subr.mxu1 %v6051_v34 }
 0x2a3   :  { %1300 = vmatpush1.msra.mxu0 %v6053_v35  ;;  %1371 = vmatpush1.msra.mxu1 %v6055_v36 }
 0x2a4   :  { %1301 = vmatprep.subr.mxu0 %v6059_v37  ;;  %1372 = vmatprep.subr.mxu1 %v6061_v39 }
 0x2a5   :  { %1302 = vmatpush1.msra.mxu0 %v6065_v40  ;;  %1373 = vmatpush1.msra.mxu1 %v6067_v41 }
 0x2a6   :  { %1303 = vmatprep.subr.mxu0 %v6071_v42  ;;  %1374 = vmatprep.subr.mxu1 %v6073_v43 }
 0x2a7   :  { %1304 = vmatpush1.msra.mxu0 %v6077_v44  ;;  %1375 = vmatpush1.msra.mxu1 %v6079_v45 }
 0x2a8   :  { %1305 = vmatprep.subr.mxu0 %v6083_v46  ;;  %1376 = vmatprep.subr.mxu1 %v6085_v48  ;;  %v7664_v48 = vld [vmem:[#allocation49_spill] sm:$0xff] }
 0x2a9   :  { %1306 = vmatpush1.msra.mxu0 %v6089_v49  ;;  %1377 = vmatpush1.msra.mxu1 %v6091_v50  ;;  %v7663_v49 = vld [vmem:[#allocation51_spill] sm:$0xff] }
 0x2aa   :  { %1307 = vmatprep.subr.mxu0 %v6095_v59  ;;  %1378 = vmatprep.subr.mxu1 %v6097_v20  ;;  %v6127_v59 = vld [vmem:[#allocation11 + $0x10] sm:$0xff] }
 0x2ab   :  { %1308 = vmatpush1.msra.mxu0 %v6101_v62  ;;  %1379 = vmatpush1.msra.mxu1 %v6103_v54  ;;  %7660 = vst [vmem:[#allocation42_spill] sm:$0xff] %v6127_v59 }
 0x2ac   :  { %1309 = vmatprep.subr.mxu0 %v6107_v53  ;;  %1380 = vmatprep.subr.mxu1 %v6109_v1  ;;  %v7661_v53 = vld [vmem:[#allocation48_spill] sm:$0xff] }
 0x2ad   :  { %1310 = vmatpush1.msra.mxu0 %v6113_v11  ;;  %1381 = vmatpush1.msra.mxu1 %v6115_v38  ;;  %v7662_v11 = vld [vmem:[#allocation50_spill] sm:$0xff] }
 0x2ae   :  { %1311 = vmatprep.subr.mxu0 %v6119_v61  ;;  %1382 = vmatprep.subr.mxu1 %v6121_v47 }
 0x2af   :  { %1312 = vmatpush1.msra.mxu0 %v6125_v27  ;;  %1383 = vmatpush1.msra.mxu1 %v6127_v59 }
 0x2b0   :  { %1528 = vmatprep.subr.mxu0 %v5943_v2  ;;  %1599 = vmatprep.subr.mxu1 %v5945_v51 }
 0x34f   :  { %v1100_v1 = vpop.f32.mrf.mxu0  ;;  %v1171_v38 = vpop.f32.mrf.mxu1 }
 0x350   :  { %v1176_v54 = vadd.f32 %v1100_v1, %v7661_v53  ;;  %v1178_v59 = vadd.f32 %v1171_v38, %v7664_v48  ;;  %v7672_v38 = vld [vmem:[#allocation32_spill] sm:$0xff] }
 0x351   :  { %v1102_v62 = vpop.f32.mrf.mxu0  ;;  %v1173_v47 = vpop.f32.mrf.mxu1 }
 0x352   :  { %v4860_v20 = vmul.f32 -1.442695, %v1176_v54  ;;  %v1177_v50 = vadd.f32 %v1102_v62, %v7662_v11  ;;  %v1179_v27 = vadd.f32 %v1173_v47, %v7663_v49  ;;  %v7670_v49 = vld [vmem:[#allocation30_spill] sm:$0xff] }
 0x354   :  { %5000 = vpow2.f32 %v4860_v20  ;;  %v4861_v61 = vmul.f32 -1.442695, %v1177_v50  ;;  %v4862_v46 = vmul.f32 -1.442695, %v1179_v27 }
 0x356   :  { %5002 = vpow2.f32 %v4861_v61 }
 0x357   :  { %5004 = vtanh.f32 %v1178_v59  ;;  %v7671_v59 = vld [vmem:[#allocation31_spill] sm:$0xff] }
 0x358   :  { %5006 = vpow2.f32 %v4862_v46  ;;  %v7669_v46 = vld [vmem:[#allocation29_spill] sm:$0xff] }
 0x361   :  { %v5001_v2 = vpop.eup %5000 }
 0x362   :  { %v1183_v45 = vadd.f32 1.0, %v5001_v2 }
 0x363   :  { %v5003_v51 = vpop.eup %5002 }
 0x364   :  { %5008 = vrcp.f32 %v1183_v45  ;;  %v1189_v53 = vadd.f32 1.0, %v5003_v51  ;;  %v5005_v54 = vpop.eup %5004  ;;  %v7667_v51 = vld [vmem:[#allocation27_spill] sm:$0xff]  ;;  %v7668_v45 = vld [vmem:[#allocation28_spill] sm:$0xff] }
 0x365   :  { %v5007_v62 = vpop.eup %5006 }
 0x366   :  { %5010 = vrcp.f32 %v1189_v53  ;;  %v1196_v61 = vadd.f32 1.0, %v5007_v62  ;;  %v7673_v53 = vld [vmem:[#allocation33_spill] sm:$0xff]  ;;  %v7675_v62 = vld [vmem:[#allocation35_spill] sm:$0xff] }
 0x368   :  { %5012 = vrcp.f32 %v1196_v61  ;;  %v7679_v61 = vld [vmem:[#allocation39_spill] sm:$0xff] }
 0x371   :  { %v5009_v20 = vpop.eup %5008 }
 0x372   :  { %v1201_v1 = vmul.f32 %v5009_v20, %v5005_v54  ;;  %v7674_v54 = vld [vmem:[#allocation34_spill] sm:$0xff]  ;;  %v7676_v20 = vld [vmem:[#allocation36_spill] sm:$0xff] }
 0x373   :  { %v5011_v50 = vpop.eup %5010 }
 0x374   :  { %v1200_v11 = vmul.f32 %v5011_v50, %v5934_v63  ;;  %v7666_v63 = vld [vmem:[#allocation26_spill] sm:$0xff] }
 0x375   :  { %v5013_v27 = vpop.eup %5012  ;;  %v7678_v50 = vld [vmem:[#allocation38_spill] sm:$0xff] }
 0x376   :  { %v6142_v47 = vadd.f32 %v1201_v1, %v1200_v11  ;;  %v7677_v1 = vld [vmem:[#allocation37_spill] sm:$0xff]  ;;  %v7680_v11 = vld [vmem:[#allocation40_spill] sm:$0xff] }
 0x378   :  { %5014 = vtanh.f32 %v6142_v47 }
 0x385   :  { %v5015_v2 = vpop.eup %5014 }
 0x386   :  { %v6145_v48 = vmul.f32 %v5015_v2, %v5013_v27  ;;  %v7681_v27 = vld [vmem:[#allocation41_spill] sm:$0xff]  ;;  %v7682_v2 = vmov 0.0  }
 0x388   :  { %7665 = vst [vmem:[#allocation43_spill] sm:$0xff] %v6145_v48  ;;  %1346 = vmatmul.mubr.f32.vlgmr.msra.gmra.mxu0 %v6145_v48  ;;  %1417 = vmatmul.mubr.f32.vlgmr.msra.gmra.mxu1 %v6145_v48  ;;  %v7683_v48 = vld [vmem:[#allocation42_spill] sm:$0xff] }
 0x389   :  { %1529 = vmatpush1.msra.mxu0 %v5949_v55  ;;  %1600 = vmatpush1.msra.mxu1 %v5951_v29 }
 0x38a   :  { %1530 = vmatprep.subr.mxu0 %v5955_v0  ;;  %1601 = vmatprep.subr.mxu1 %v5957_v57 }
 0x38b   :  { %1531 = vmatpush1.msra.mxu0 %v5961_v56  ;;  %1602 = vmatpush1.msra.mxu1 %v5963_v60 }
 0x38c   :  { %1532 = vmatprep.subr.mxu0 %v5967_v3  ;;  %1603 = vmatprep.subr.mxu1 %v5969_v4 }
 0x38d   :  { %1533 = vmatpush1.msra.mxu0 %v5973_v52  ;;  %1604 = vmatpush1.msra.mxu1 %v5975_v58 }
 0x38e   :  { %1534 = vmatprep.subr.mxu0 %v5979_v5  ;;  %1605 = vmatprep.subr.mxu1 %v5981_v6 }
 0x38f   :  { %1535 = vmatpush1.msra.mxu0 %v5985_v7  ;;  %1606 = vmatpush1.msra.mxu1 %v5987_v8 }
 0x390   :  { %1536 = vmatprep.subr.mxu0 %v5991_v9  ;;  %1607 = vmatprep.subr.mxu1 %v5993_v10 }
 0x391   :  { %1537 = vmatpush1.msra.mxu0 %v5997_v12  ;;  %1608 = vmatpush1.msra.mxu1 %v5999_v13 }
 0x392   :  { %1538 = vmatprep.subr.mxu0 %v6003_v14  ;;  %1609 = vmatprep.subr.mxu1 %v6005_v15 }
 0x393   :  { %1539 = vmatpush1.msra.mxu0 %v6009_v16  ;;  %1610 = vmatpush1.msra.mxu1 %v6011_v17 }
 0x394   :  { %1540 = vmatprep.subr.mxu0 %v6015_v18  ;;  %1611 = vmatprep.subr.mxu1 %v6017_v19 }
 0x395   :  { %1541 = vmatpush1.msra.mxu0 %v6021_v21  ;;  %1612 = vmatpush1.msra.mxu1 %v6023_v22 }
 0x396   :  { %1542 = vmatprep.subr.mxu0 %v6027_v23  ;;  %1613 = vmatprep.subr.mxu1 %v6029_v24 }
 0x397   :  { %1543 = vmatpush1.msra.mxu0 %v6031_v25  ;;  %1614 = vmatpush1.msra.mxu1 %v6035_v26 }
 0x398   :  { %1544 = vmatprep.subr.mxu0 %v6037_v28  ;;  %1615 = vmatprep.subr.mxu1 %v6039_v30 }
 0x399   :  { %1545 = vmatpush1.msra.mxu0 %v6043_v31  ;;  %1616 = vmatpush1.msra.mxu1 %v6045_v32 }
 0x39a   :  { %1546 = vmatprep.subr.mxu0 %v6047_v33  ;;  %1617 = vmatprep.subr.mxu1 %v6051_v34 }
 0x39b   :  { %1547 = vmatpush1.msra.mxu0 %v6053_v35  ;;  %1618 = vmatpush1.msra.mxu1 %v6055_v36 }
 0x39c   :  { %1548 = vmatprep.subr.mxu0 %v6059_v37  ;;  %1619 = vmatprep.subr.mxu1 %v6061_v39 }
 0x39d   :  { %1549 = vmatpush1.msra.mxu0 %v6065_v40  ;;  %1620 = vmatpush1.msra.mxu1 %v6067_v41 }
 0x39e   :  { %1550 = vmatprep.subr.mxu0 %v6071_v42  ;;  %1621 = vmatprep.subr.mxu1 %v6073_v43 }
 0x39f   :  { %1551 = vmatpush1.msra.mxu0 %v6077_v44  ;;  %1622 = vmatpush1.msra.mxu1 %v7666_v63 }
 0x3a0   :  { %1552 = vmatprep.subr.mxu0 %v7667_v51  ;;  %1623 = vmatprep.subr.mxu1 %v7668_v45  ;;  %v7689_v45 = vld [vmem:[#allocation53_spill] sm:$0xff] }
 0x3a1   :  { %1553 = vmatpush1.msra.mxu0 %v7669_v46  ;;  %1624 = vmatpush1.msra.mxu1 %v7670_v49  ;;  %v7688_v46 = vld [vmem:[#allocation55_spill] sm:$0xff] }
 0x3a2   :  { %1554 = vmatprep.subr.mxu0 %v7671_v59  ;;  %1625 = vmatprep.subr.mxu1 %v7672_v38 }
 0x3a3   :  { %1555 = vmatpush1.msra.mxu0 %v7673_v53  ;;  %1626 = vmatpush1.msra.mxu1 %v7674_v54  ;;  %v7684_v54 = vld [vmem:[#allocation24_spill] sm:$0xff] }
 0x3a4   :  { %1556 = vmatprep.subr.mxu0 %v7675_v62  ;;  %1627 = vmatprep.subr.mxu1 %v7676_v20  ;;  %v7685_v62 = vld [vmem:[#allocation25_spill] sm:$0xff] }
 0x3a5   :  { %1557 = vmatpush1.msra.mxu0 %v7677_v1  ;;  %1628 = vmatpush1.msra.mxu1 %v7678_v50  ;;  %v7686_v1 = vld [vmem:[#allocation52_spill] sm:$0xff] }
 0x3a6   :  { %1558 = vmatprep.subr.mxu0 %v7679_v61  ;;  %1629 = vmatprep.subr.mxu1 %v7680_v11  ;;  %v7687_v61 = vld [vmem:[#allocation54_spill] sm:$0xff] }
 0x3a7   :  { %1559 = vmatpush1.msra.mxu0 %v7681_v27  ;;  %1592 = vmatprep.mubr.f32.mxu0 %v7682_v2 }
 0x3a8   :  { %1630 = vmatpush1.msra.mxu1 %v7683_v48  ;;  %1663 = vmatprep.mubr.f32.mxu1 %v7682_v2 }
 0x3a9   :  { %1775 = vmatprep.subr.mxu0 %v7684_v54  ;;  %1846 = vmatprep.subr.mxu1 %v7685_v62 }
 0x448   :  { %v1347_v20 = vpop.f32.mrf.mxu0  ;;  %v1418_v11 = vpop.f32.mrf.mxu1 }
 0x449   :  { %v1423_v53 = vadd.f32 %v1347_v20, %v7686_v1  ;;  %v1425_v2 = vadd.f32 %v1418_v11, %v7689_v45  ;;  %v7696_v11 = vld [vmem:[#allocation31_spill] sm:$0xff] }
 0x44a   :  { %v1349_v50 = vpop.f32.mrf.mxu0  ;;  %v1420_v49 = vpop.f32.mrf.mxu1 }
 0x44b   :  { %v4863_v38 = vmul.f32 -1.442695, %v1423_v53  ;;  %v1424_v59 = vadd.f32 %v1349_v50, %v7687_v61  ;;  %v1426_v48 = vadd.f32 %v1420_v49, %v7688_v46 }
 0x44d   :  { %5016 = vpow2.f32 %v4863_v38  ;;  %v4864_v27 = vmul.f32 -1.442695, %v1424_v59  ;;  %v4865_v51 = vmul.f32 -1.442695, %v1426_v48 }
 0x44f   :  { %5018 = vpow2.f32 %v4864_v27 }
 0x450   :  { %5020 = vtanh.f32 %v1425_v2  ;;  %v7697_v2 = vld [vmem:[#allocation32_spill] sm:$0xff] }
 0x451   :  { %5022 = vpow2.f32 %v4865_v51  ;;  %v7693_v51 = vld [vmem:[#allocation28_spill] sm:$0xff] }
 0x45a   :  { %v5017_v54 = vpop.eup %5016 }
 0x45b   :  { %v1430_v63 = vadd.f32 1.0, %v5017_v54  ;;  %v7694_v54 = vld [vmem:[#allocation29_spill] sm:$0xff] }
 0x45c   :  { %v5019_v62 = vpop.eup %5018 }
 0x45d   :  { %5024 = vrcp.f32 %v1430_v63  ;;  %v1436_v20 = vadd.f32 1.0, %v5019_v62  ;;  %v5021_v53 = vpop.eup %5020  ;;  %v7692_v63 = vld [vmem:[#allocation27_spill] sm:$0xff]  ;;  %v7695_v62 = vld [vmem:[#allocation30_spill] sm:$0xff] }
 0x45e   :  { %v5023_v1 = vpop.eup %5022 }
 0x45f   :  { %5026 = vrcp.f32 %v1436_v20  ;;  %v1443_v61 = vadd.f32 1.0, %v5023_v1  ;;  %v7698_v20 = vld [vmem:[#allocation33_spill] sm:$0xff]  ;;  %v7700_v1 = vld [vmem:[#allocation35_spill] sm:$0xff] }
 0x461   :  { %5028 = vrcp.f32 %v1443_v61  ;;  %v7704_v61 = vld [vmem:[#allocation39_spill] sm:$0xff] }
 0x46a   :  { %v5025_v38 = vpop.eup %5024 }
 0x46b   :  { %v1448_v50 = vmul.f32 %v5025_v38, %v5021_v53  ;;  %v7699_v53 = vld [vmem:[#allocation34_spill] sm:$0xff]  ;;  %v7701_v38 = vld [vmem:[#allocation36_spill] sm:$0xff] }
 0x46c   :  { %v5027_v59 = vpop.eup %5026 }
 0x46d   :  { %v1447_v27 = vmul.f32 %v5027_v59, %v6142_v47  ;;  %v7691_v47 = vld [vmem:[#allocation26_spill] sm:$0xff] }
 0x46e   :  { %v5029_v48 = vpop.eup %5028  ;;  %v7703_v59 = vld [vmem:[#allocation38_spill] sm:$0xff] }
 0x46f   :  { %v6220_v46 = vadd.f32 %v1448_v50, %v1447_v27  ;;  %v7702_v50 = vld [vmem:[#allocation37_spill] sm:$0xff]  ;;  %v7705_v27 = vld [vmem:[#allocation40_spill] sm:$0xff] }
 0x471   :  { %5030 = vtanh.f32 %v6220_v46 }
 0x47e   :  { %v5031_v45 = vpop.eup %5030 }
 0x47f   :  { %v6223_v49 = vmul.f32 %v5031_v45, %v5029_v48  ;;  %v7706_v48 = vld [vmem:[#allocation41_spill] sm:$0xff]  ;;  %v7707_v45 = vmov 0.0  }
 0x481   :  { %7690 = vst [vmem:[#allocation46_spill] sm:$0xff] %v6223_v49  ;;  %1593 = vmatmul.mubr.f32.vlgmr.msra.gmra.mxu0 %v6223_v49  ;;  %1664 = vmatmul.mubr.f32.vlgmr.msra.gmra.mxu1 %v6223_v49  ;;  %v7708_v49 = vld [vmem:[#allocation42_spill] sm:$0xff] }
 0x482   :  { %1776 = vmatpush1.msra.mxu0 %v5949_v55  ;;  %1847 = vmatpush1.msra.mxu1 %v5951_v29 }
 0x483   :  { %1777 = vmatprep.subr.mxu0 %v5955_v0  ;;  %1848 = vmatprep.subr.mxu1 %v5957_v57 }
 0x484   :  { %1778 = vmatpush1.msra.mxu0 %v5961_v56  ;;  %1849 = vmatpush1.msra.mxu1 %v5963_v60 }
 0x485   :  { %1779 = vmatprep.subr.mxu0 %v5967_v3  ;;  %1850 = vmatprep.subr.mxu1 %v5969_v4 }
 0x486   :  { %1780 = vmatpush1.msra.mxu0 %v5973_v52  ;;  %1851 = vmatpush1.msra.mxu1 %v5975_v58 }
 0x487   :  { %1781 = vmatprep.subr.mxu0 %v5979_v5  ;;  %1852 = vmatprep.subr.mxu1 %v5981_v6 }
 0x488   :  { %1782 = vmatpush1.msra.mxu0 %v5985_v7  ;;  %1853 = vmatpush1.msra.mxu1 %v5987_v8 }
 0x489   :  { %1783 = vmatprep.subr.mxu0 %v5991_v9  ;;  %1854 = vmatprep.subr.mxu1 %v5993_v10 }
 0x48a   :  { %1784 = vmatpush1.msra.mxu0 %v5997_v12  ;;  %1855 = vmatpush1.msra.mxu1 %v5999_v13 }
 0x48b   :  { %1785 = vmatprep.subr.mxu0 %v6003_v14  ;;  %1856 = vmatprep.subr.mxu1 %v6005_v15 }
 0x48c   :  { %1786 = vmatpush1.msra.mxu0 %v6009_v16  ;;  %1857 = vmatpush1.msra.mxu1 %v6011_v17 }
 0x48d   :  { %1787 = vmatprep.subr.mxu0 %v6015_v18  ;;  %1858 = vmatprep.subr.mxu1 %v6017_v19 }
 0x48e   :  { %1788 = vmatpush1.msra.mxu0 %v6021_v21  ;;  %1859 = vmatpush1.msra.mxu1 %v6023_v22 }
 0x48f   :  { %1789 = vmatprep.subr.mxu0 %v6027_v23  ;;  %1860 = vmatprep.subr.mxu1 %v6029_v24 }
 0x490   :  { %1790 = vmatpush1.msra.mxu0 %v6031_v25  ;;  %1861 = vmatpush1.msra.mxu1 %v6035_v26 }
 0x491   :  { %1791 = vmatprep.subr.mxu0 %v6037_v28  ;;  %1862 = vmatprep.subr.mxu1 %v6039_v30 }
 0x492   :  { %1792 = vmatpush1.msra.mxu0 %v6043_v31  ;;  %1863 = vmatpush1.msra.mxu1 %v6045_v32 }
 0x493   :  { %1793 = vmatprep.subr.mxu0 %v6047_v33  ;;  %1864 = vmatprep.subr.mxu1 %v6051_v34 }
 0x494   :  { %1794 = vmatpush1.msra.mxu0 %v6053_v35  ;;  %1865 = vmatpush1.msra.mxu1 %v6055_v36 }
 0x495   :  { %1795 = vmatprep.subr.mxu0 %v6059_v37  ;;  %1866 = vmatprep.subr.mxu1 %v6061_v39 }
 0x496   :  { %1796 = vmatpush1.msra.mxu0 %v6065_v40  ;;  %1867 = vmatpush1.msra.mxu1 %v6067_v41 }
 0x497   :  { %1797 = vmatprep.subr.mxu0 %v6071_v42  ;;  %1868 = vmatprep.subr.mxu1 %v6073_v43 }
 0x498   :  { %1798 = vmatpush1.msra.mxu0 %v6077_v44  ;;  %1869 = vmatpush1.msra.mxu1 %v7691_v47 }
 0x499   :  { %1799 = vmatprep.subr.mxu0 %v7692_v63  ;;  %1870 = vmatprep.subr.mxu1 %v7693_v51  ;;  %v7714_v51 = vld [vmem:[#allocation57_spill] sm:$0xff] }
 0x49a   :  { %1800 = vmatpush1.msra.mxu0 %v7694_v54  ;;  %1871 = vmatpush1.msra.mxu1 %v7695_v62  ;;  %v7713_v54 = vld [vmem:[#allocation59_spill] sm:$0xff] }
 0x49b   :  { %1801 = vmatprep.subr.mxu0 %v7696_v11  ;;  %1872 = vmatprep.subr.mxu1 %v7697_v2 }
 0x49c   :  { %1802 = vmatpush1.msra.mxu0 %v7698_v20  ;;  %1873 = vmatpush1.msra.mxu1 %v7699_v53  ;;  %v7709_v53 = vld [vmem:[#allocation24_spill] sm:$0xff] }
 0x49d   :  { %1803 = vmatprep.subr.mxu0 %v7700_v1  ;;  %1874 = vmatprep.subr.mxu1 %v7701_v38  ;;  %v7710_v1 = vld [vmem:[#allocation25_spill] sm:$0xff] }
 0x49e   :  { %1804 = vmatpush1.msra.mxu0 %v7702_v50  ;;  %1875 = vmatpush1.msra.mxu1 %v7703_v59  ;;  %v7711_v50 = vld [vmem:[#allocation56_spill] sm:$0xff] }
 0x49f   :  { %1805 = vmatprep.subr.mxu0 %v7704_v61  ;;  %1876 = vmatprep.subr.mxu1 %v7705_v27  ;;  %v7712_v61 = vld [vmem:[#allocation58_spill] sm:$0xff] }
 0x4a0   :  { %1806 = vmatpush1.msra.mxu0 %v7706_v48  ;;  %1839 = vmatprep.mubr.f32.mxu0 %v7707_v45 }
 0x4a1   :  { %1877 = vmatpush1.msra.mxu1 %v7708_v49  ;;  %1910 = vmatprep.mubr.f32.mxu1 %v7707_v45 }
 0x4a2   :  { %2022 = vmatprep.subr.mxu0 %v7709_v53  ;;  %2093 = vmatprep.subr.mxu1 %v7710_v1 }
 0x541   :  { %v1594_v38 = vpop.f32.mrf.mxu0  ;;  %v1665_v27 = vpop.f32.mrf.mxu1 }
 0x542   :  { %v1670_v20 = vadd.f32 %v1594_v38, %v7711_v50  ;;  %v1672_v45 = vadd.f32 %v1665_v27, %v7714_v51  ;;  %v2266_v27 = vld [vmem:[#allocation11 + $0x1e8] sm:$0xff] }
 0x543   :  { %v1596_v59 = vpop.f32.mrf.mxu0  ;;  %v1667_v62 = vpop.f32.mrf.mxu1 }
 0x544   :  { %v4866_v2 = vmul.f32 -1.442695, %v1670_v20  ;;  %v1671_v11 = vadd.f32 %v1596_v59, %v7712_v61  ;;  %v1673_v49 = vadd.f32 %v1667_v62, %v7713_v54 }
 0x546   :  { %5032 = vpow2.f32 %v4866_v2  ;;  %v4867_v48 = vmul.f32 -1.442695, %v1671_v11  ;;  %v4868_v63 = vmul.f32 -1.442695, %v1673_v49 }
 0x548   :  { %5034 = vpow2.f32 %v4867_v48 }
 0x549   :  { %5036 = vtanh.f32 %v1672_v45  ;;  %v2268_v45 = vld [vmem:[#allocation11 + $0x1f8] sm:$0xff] }
 0x54a   :  { %5038 = vpow2.f32 %v4868_v63 }
 0x553   :  { %v5033_v53 = vpop.eup %5032 }
 0x554   :  { %v1677_v47 = vadd.f32 1.0, %v5033_v53  ;;  %v2265_v53 = vld [vmem:[#allocation11 + $0x1e0] sm:$0xff] }
 0x555   :  { %v5035_v1 = vpop.eup %5034 }
 0x556   :  { %5040 = vrcp.f32 %v1677_v47  ;;  %v1683_v38 = vadd.f32 1.0, %v5035_v1  ;;  %v5037_v20 = vpop.eup %5036  ;;  %v2267_v1 = vld [vmem:[#allocation11 + $0x1f0] sm:$0xff] }
 0x557   :  { %v5039_v50 = vpop.eup %5038 }
 0x558   :  { %5042 = vrcp.f32 %v1683_v38  ;;  %v1690_v61 = vadd.f32 1.0, %v5039_v50  ;;  %v2262_v38 = vld [vmem:[#allocation11 + $0x1c8] sm:$0xff]  ;;  %v2261_v50 = vld [vmem:[#allocation11 + $0x1c0] sm:$0xff] }
 0x55a   :  { %5044 = vrcp.f32 %v1690_v61  ;;  %v2257_v61 = vld [vmem:[#allocation11 + $0x1a0] sm:$0xff] }
 0x563   :  { %v5041_v2 = vpop.eup %5040 }
 0x564   :  { %v1695_v59 = vmul.f32 %v5041_v2, %v5037_v20  ;;  %v2264_v20 = vld [vmem:[#allocation11 + $0x1d8] sm:$0xff]  ;;  %v2263_v2 = vld [vmem:[#allocation11 + $0x1d0] sm:$0xff] }
 0x565   :  { %v5043_v11 = vpop.eup %5042 }
 0x566   :  { %v1694_v48 = vmul.f32 %v5043_v11, %v6220_v46  ;;  %v2260_v11 = vld [vmem:[#allocation11 + $0x1b8] sm:$0xff] }
 0x567   :  { %v5045_v49 = vpop.eup %5044 }
 0x568   :  { %v6298_v54 = vadd.f32 %v1695_v59, %v1694_v48  ;;  %v2258_v59 = vld [vmem:[#allocation11 + $0x1a8] sm:$0xff]  ;;  %v2259_v48 = vld [vmem:[#allocation11 + $0x1b0] sm:$0xff] }
 0x56a   :  { %5046 = vtanh.f32 %v6298_v54 }
 0x577   :  { %v5047_v51 = vpop.eup %5046 }
 0x578   :  { %v6301_v62 = vmul.f32 %v5047_v51, %v5045_v49  ;;  %v2256_v49 = vld [vmem:[#allocation11 + $0x198] sm:$0xff]  ;;  %v2253_v51 = vld [vmem:[#allocation11 + $0x180] sm:$0xff] }
 0x57a   :  { %1840 = vmatmul.mubr.f32.vlgmr.msra.gmra.mxu0 %v6301_v62  ;;  %1911 = vmatmul.mubr.f32.vlgmr.msra.gmra.mxu1 %v6301_v62 }
 0x57b   :  { %2023 = vmatpush1.msra.mxu0 %v5949_v55  ;;  %2094 = vmatpush1.msra.mxu1 %v5951_v29  ;;  %v7715_v55 = vld [vmem:[#allocation26_spill] sm:$0xff]  ;;  %v7716_v29 = vld [vmem:[#allocation27_spill] sm:$0xff] }
 0x57c   :  { %2024 = vmatprep.subr.mxu0 %v5955_v0  ;;  %2095 = vmatprep.subr.mxu1 %v5957_v57  ;;  %v7717_v0 = vld [vmem:[#allocation28_spill] sm:$0xff]  ;;  %v7718_v57 = vld [vmem:[#allocation29_spill] sm:$0xff] }
 0x57d   :  { %2025 = vmatpush1.msra.mxu0 %v5961_v56  ;;  %2096 = vmatpush1.msra.mxu1 %v5963_v60  ;;  %v7719_v56 = vld [vmem:[#allocation30_spill] sm:$0xff]  ;;  %v7720_v60 = vld [vmem:[#allocation31_spill] sm:$0xff] }
 0x57e   :  { %2026 = vmatprep.subr.mxu0 %v5967_v3  ;;  %2097 = vmatprep.subr.mxu1 %v5969_v4  ;;  %v7721_v3 = vld [vmem:[#allocation32_spill] sm:$0xff]  ;;  %v7722_v4 = vld [vmem:[#allocation33_spill] sm:$0xff] }
 0x57f   :  { %2027 = vmatpush1.msra.mxu0 %v5973_v52  ;;  %2098 = vmatpush1.msra.mxu1 %v5975_v58  ;;  %v7723_v52 = vld [vmem:[#allocation34_spill] sm:$0xff]  ;;  %v7724_v58 = vld [vmem:[#allocation35_spill] sm:$0xff] }
 0x580   :  { %2028 = vmatprep.subr.mxu0 %v5979_v5  ;;  %2099 = vmatprep.subr.mxu1 %v5981_v6  ;;  %v7725_v5 = vld [vmem:[#allocation36_spill] sm:$0xff]  ;;  %v7726_v6 = vld [vmem:[#allocation37_spill] sm:$0xff] }
 0x581   :  { %2029 = vmatpush1.msra.mxu0 %v5985_v7  ;;  %2100 = vmatpush1.msra.mxu1 %v5987_v8  ;;  %v7727_v7 = vld [vmem:[#allocation38_spill] sm:$0xff]  ;;  %v7728_v8 = vld [vmem:[#allocation39_spill] sm:$0xff] }
 0x582   :  { %2030 = vmatprep.subr.mxu0 %v5991_v9  ;;  %2101 = vmatprep.subr.mxu1 %v5993_v10  ;;  %v7729_v9 = vld [vmem:[#allocation40_spill] sm:$0xff]  ;;  %v7730_v10 = vld [vmem:[#allocation41_spill] sm:$0xff] }
 0x583   :  { %2031 = vmatpush1.msra.mxu0 %v5997_v12  ;;  %2102 = vmatpush1.msra.mxu1 %v5999_v13  ;;  %v7731_v12 = vmov 0.0   ;;  %v7732_v13 = vld [vmem:[#allocation42_spill] sm:$0xff] }
 0x584   :  { %2032 = vmatprep.subr.mxu0 %v6003_v14  ;;  %2103 = vmatprep.subr.mxu1 %v6005_v15  ;;  %v7733_v15 = vld [vmem:[#allocation60_spill] sm:$0xff] }
 0x585   :  { %2033 = vmatpush1.msra.mxu0 %v6009_v16  ;;  %2104 = vmatpush1.msra.mxu1 %v6011_v17 }
 0x586   :  { %2034 = vmatprep.subr.mxu0 %v6015_v18  ;;  %2105 = vmatprep.subr.mxu1 %v6017_v19  ;;  %v7734_v19 = vld [vmem:[#allocation62_spill] sm:$0xff] }
 0x587   :  { %2035 = vmatpush1.msra.mxu0 %v6021_v21  ;;  %2106 = vmatpush1.msra.mxu1 %v6023_v22 }
 0x588   :  { %2036 = vmatprep.subr.mxu0 %v6027_v23  ;;  %2107 = vmatprep.subr.mxu1 %v6029_v24 }
 0x589   :  { %2037 = vmatpush1.msra.mxu0 %v6031_v25  ;;  %2108 = vmatpush1.msra.mxu1 %v6035_v26  ;;  %v7735_v25 = vld [vmem:[#allocation63_spill] sm:$0xff] }
 0x58a   :  { %2038 = vmatprep.subr.mxu0 %v6037_v28  ;;  %2109 = vmatprep.subr.mxu1 %v6039_v30  ;;  %v7736_v28 = vld [vmem:[#allocation61_spill] sm:$0xff] }
 0x58b   :  { %2039 = vmatpush1.msra.mxu0 %v6043_v31  ;;  %2110 = vmatpush1.msra.mxu1 %v6045_v32 }
 0x58c   :  { %2040 = vmatprep.subr.mxu0 %v6047_v33  ;;  %2111 = vmatprep.subr.mxu1 %v6051_v34 }
 0x58d   :  { %2041 = vmatpush1.msra.mxu0 %v6053_v35  ;;  %2112 = vmatpush1.msra.mxu1 %v6055_v36 }
 0x58e   :  { %2042 = vmatprep.subr.mxu0 %v6059_v37  ;;  %2113 = vmatprep.subr.mxu1 %v6061_v39 }
 0x58f   :  { %2043 = vmatpush1.msra.mxu0 %v6065_v40  ;;  %2114 = vmatpush1.msra.mxu1 %v6067_v41 }
 0x590   :  { %2044 = vmatprep.subr.mxu0 %v6071_v42  ;;  %2115 = vmatprep.subr.mxu1 %v6073_v43 }
 0x591   :  { %2045 = vmatpush1.msra.mxu0 %v6077_v44  ;;  %2116 = vmatpush1.msra.mxu1 %v7715_v55  ;;  %v2255_v55 = vld [vmem:[#allocation11 + $0x190] sm:$0xff] }
 0x592   :  { %2046 = vmatprep.subr.mxu0 %v7716_v29  ;;  %2117 = vmatprep.subr.mxu1 %v7717_v0  ;;  %v2250_v29 = vld [vmem:[#allocation11 + $0x168] sm:$0xff]  ;;  %v2252_v0 = vld [vmem:[#allocation11 + $0x178] sm:$0xff] }
 0x593   :  { %2047 = vmatpush1.msra.mxu0 %v7718_v57  ;;  %2118 = vmatpush1.msra.mxu1 %v7719_v56  ;;  %v2249_v57 = vld [vmem:[#allocation11 + $0x160] sm:$0xff]  ;;  %v2251_v56 = vld [vmem:[#allocation11 + $0x170] sm:$0xff] }
 0x594   :  { %2048 = vmatprep.subr.mxu0 %v7720_v60  ;;  %2119 = vmatprep.subr.mxu1 %v7721_v3  ;;  %v2246_v60 = vld [vmem:[#allocation11 + $0x148] sm:$0xff]  ;;  %v2248_v3 = vld [vmem:[#allocation11 + $0x158] sm:$0xff] }
 0x595   :  { %2049 = vmatpush1.msra.mxu0 %v7722_v4  ;;  %2120 = vmatpush1.msra.mxu1 %v7723_v52  ;;  %v2245_v4 = vld [vmem:[#allocation11 + $0x140] sm:$0xff]  ;;  %v2247_v52 = vld [vmem:[#allocation11 + $0x150] sm:$0xff] }
 0x596   :  { %2050 = vmatprep.subr.mxu0 %v7724_v58  ;;  %2121 = vmatprep.subr.mxu1 %v7725_v5  ;;  %v2242_v58 = vld [vmem:[#allocation11 + $0x128] sm:$0xff]  ;;  %v2244_v5 = vld [vmem:[#allocation11 + $0x138] sm:$0xff] }
 0x597   :  { %2051 = vmatpush1.msra.mxu0 %v7726_v6  ;;  %2122 = vmatpush1.msra.mxu1 %v7727_v7  ;;  %v2241_v6 = vld [vmem:[#allocation11 + $0x120] sm:$0xff]  ;;  %v2243_v7 = vld [vmem:[#allocation11 + $0x130] sm:$0xff] }
 0x598   :  { %2052 = vmatprep.subr.mxu0 %v7728_v8  ;;  %2123 = vmatprep.subr.mxu1 %v7729_v9  ;;  %v2238_v8 = vld [vmem:[#allocation11 + $0x108] sm:$0xff]  ;;  %v2240_v9 = vld [vmem:[#allocation11 + $0x118] sm:$0xff] }
 0x599   :  { %2053 = vmatpush1.msra.mxu0 %v7730_v10  ;;  %2086 = vmatprep.mubr.f32.mxu0 %v7731_v12  ;;  %v2237_v10 = vld [vmem:[#allocation11 + $0x100] sm:$0xff] }
 0x59a   :  { %2124 = vmatpush1.msra.mxu1 %v7732_v13  ;;  %2157 = vmatprep.mubr.f32.mxu1 %v7731_v12  ;;  %v2239_v13 = vld [vmem:[#allocation11 + $0x110] sm:$0xff] }
 0x59b   :  { %2269 = vmatprep.subr.mxu0 %v2266_v27  ;;  %2340 = vmatprep.subr.mxu1 %v2268_v45  ;;  %v2206_v27 = vld [vmem:[#allocation11 + $0x8] sm:$0xff]  ;;  %v2208_v45 = vld [vmem:[#allocation11 + $0x18] sm:$0xff] }
 0x63a   :  { %v1841_v14 = vpop.f32.mrf.mxu0  ;;  %v1912_v22 = vpop.f32.mrf.mxu1 }
 0x63b   :  { %v1917_v16 = vadd.f32 %v1841_v14, %v7733_v15  ;;  %v1919_v30 = vadd.f32 %v1912_v22, %v7736_v28  ;;  %v2234_v14 = vld [vmem:[#allocation11 + $0xe8] sm:$0xff]  ;;  %v2236_v15 = vld [vmem:[#allocation11 + $0xf8] sm:$0xff]  ;;  %v2231_v22 = vld [vmem:[#allocation11 + $0xd0] sm:$0xff] }
 0x63c   :  { %v1843_v17 = vpop.f32.mrf.mxu0  ;;  %v1914_v24 = vpop.f32.mrf.mxu1  ;;  %v2222_v28 = vld [vmem:[#allocation11 + $0x88] sm:$0xff] }
 0x63d   :  { %v4869_v18 = vmul.f32 -1.442695, %v1917_v16  ;;  %v1918_v21 = vadd.f32 %v1843_v17, %v7734_v19  ;;  %v1920_v26 = vadd.f32 %v1914_v24, %v7735_v25  ;;  %v2233_v16 = vld [vmem:[#allocation11 + $0xe0] sm:$0xff]  ;;  %v2235_v17 = vld [vmem:[#allocation11 + $0xf0] sm:$0xff]  ;;  %v2232_v19 = vld [vmem:[#allocation11 + $0xd8] sm:$0xff] }
 0x63e   :  { %v2228_v24 = vld [vmem:[#allocation11 + $0xb8] sm:$0xff]  ;;  %v2225_v25 = vld [vmem:[#allocation11 + $0xa0] sm:$0xff] }
 0x63f   :  { %5048 = vpow2.f32 %v4869_v18  ;;  %v4870_v23 = vmul.f32 -1.442695, %v1918_v21  ;;  %v4871_v31 = vmul.f32 -1.442695, %v1920_v26  ;;  %v2230_v18 = vld [vmem:[#allocation11 + $0xc8] sm:$0xff]  ;;  %v2229_v21 = vld [vmem:[#allocation11 + $0xc0] sm:$0xff] }
 0x640   :  { %v2227_v26 = vld [vmem:[#allocation11 + $0xb0] sm:$0xff] }
 0x641   :  { %5050 = vpow2.f32 %v4870_v23  ;;  %v2226_v23 = vld [vmem:[#allocation11 + $0xa8] sm:$0xff] }
 0x642   :  { %5052 = vtanh.f32 %v1919_v30  ;;  %v2224_v30 = vld [vmem:[#allocation11 + $0x98] sm:$0xff] }
 0x643   :  { %5054 = vpow2.f32 %v4871_v31  ;;  %v2221_v31 = vld [vmem:[#allocation11 + $0x80] sm:$0xff] }
 0x64c   :  { %v5049_v32 = vpop.eup %5048 }
 0x64d   :  { %v1924_v33 = vadd.f32 1.0, %v5049_v32  ;;  %v2223_v32 = vld [vmem:[#allocation11 + $0x90] sm:$0xff] }
 0x64e   :  { %v5051_v34 = vpop.eup %5050 }
 0x64f   :  { %5056 = vrcp.f32 %v1924_v33  ;;  %v1930_v35 = vadd.f32 1.0, %v5051_v34  ;;  %v5053_v36 = vpop.eup %5052  ;;  %v2218_v33 = vld [vmem:[#allocation11 + $0x68] sm:$0xff]  ;;  %v2220_v34 = vld [vmem:[#allocation11 + $0x78] sm:$0xff] }
 0x650   :  { %v5055_v37 = vpop.eup %5054 }
 0x651   :  { %5058 = vrcp.f32 %v1930_v35  ;;  %v1937_v42 = vadd.f32 1.0, %v5055_v37  ;;  %v2217_v35 = vld [vmem:[#allocation11 + $0x60] sm:$0xff]  ;;  %v2214_v37 = vld [vmem:[#allocation11 + $0x48] sm:$0xff] }
 0x653   :  { %5060 = vrcp.f32 %v1937_v42  ;;  %v2210_v42 = vld [vmem:[#allocation11 + $0x28] sm:$0xff] }
 0x65c   :  { %v5057_v39 = vpop.eup %5056 }
 0x65d   :  { %v1942_v40 = vmul.f32 %v5057_v39, %v5053_v36  ;;  %v2219_v36 = vld [vmem:[#allocation11 + $0x70] sm:$0xff]  ;;  %v2216_v39 = vld [vmem:[#allocation11 + $0x58] sm:$0xff] }
 0x65e   :  { %v5059_v41 = vpop.eup %5058 }
 0x65f   :  { %v1941_v43 = vmul.f32 %v5059_v41, %v6298_v54  ;;  %v2254_v54 = vld [vmem:[#allocation11 + $0x188] sm:$0xff]  ;;  %v2215_v41 = vld [vmem:[#allocation11 + $0x50] sm:$0xff] }
 0x660   :  { %v5061_v46 = vpop.eup %5060 }
 0x661   :  { %v6374_v44 = vadd.f32 %v1942_v40, %v1941_v43  ;;  %v2213_v40 = vld [vmem:[#allocation11 + $0x40] sm:$0xff]  ;;  %v2212_v43 = vld [vmem:[#allocation11 + $0x38] sm:$0xff] }
 0x663   :  { %5062 = vtanh.f32 %v6374_v44 }
 0x670   :  { %v5063_v47 = vpop.eup %5062 }
 0x671   :  { %v6377_v63 = vmul.f32 %v5063_v47, %v5061_v46  ;;  %v2209_v46 = vld [vmem:[#allocation11 + $0x20] sm:$0xff]  ;;  %v2211_v47 = vld [vmem:[#allocation11 + $0x30] sm:$0xff] }
 0x673   :  { %2087 = vmatmul.mubr.f32.vlgmr.msra.gmra.mxu0 %v6377_v63  ;;  %2158 = vmatmul.mubr.f32.vlgmr.msra.gmra.mxu1 %v6377_v63 }
 0x674   :  { %2333 = vmatprep.mubr.f32.mxu0 %v7731_v12  ;;  %2404 = vmatprep.mubr.f32.mxu1 %v7731_v12 }
 0x675   :  { %2270 = vmatpush1.msra.mxu0 %v2265_v53  ;;  %2341 = vmatpush1.msra.mxu1 %v2267_v1  ;;  %v2205_v53 = vld [vmem:[#allocation11] sm:$0xff]  ;;  %v2207_v1 = vld [vmem:[#allocation11 + $0x10] sm:$0xff] }
 0x676   :  { %2271 = vmatprep.subr.mxu0 %v2262_v38  ;;  %2342 = vmatprep.subr.mxu1 %v2264_v20  ;;  %v2513_v38 = vld [vmem:[#allocation12 + $0x1e8] sm:$0xff]  ;;  %v2515_v20 = vld [vmem:[#allocation12 + $0x1f8] sm:$0xff] }
 0x677   :  { %2272 = vmatpush1.msra.mxu0 %v2261_v50  ;;  %2343 = vmatpush1.msra.mxu1 %v2263_v2  ;;  %v7737_v2 = vld [vmem:[#allocation64_spill] sm:$0xff] }
 0x678   :  { %2273 = vmatprep.subr.mxu0 %v2258_v59  ;;  %2344 = vmatprep.subr.mxu1 %v2260_v11 }
 0x679   :  { %2274 = vmatpush1.msra.mxu0 %v2257_v61  ;;  %2345 = vmatpush1.msra.mxu1 %v2259_v48  ;;  %v7738_v48 = vld [vmem:[#allocation66_spill] sm:$0xff] }
 0x67a   :  { %2275 = vmatprep.subr.mxu0 %v2254_v54  ;;  %2346 = vmatprep.subr.mxu1 %v2256_v49 }
 0x67b   :  { %2276 = vmatpush1.msra.mxu0 %v2253_v51  ;;  %2347 = vmatpush1.msra.mxu1 %v2255_v55 }
 0x67c   :  { %2277 = vmatprep.subr.mxu0 %v2250_v29  ;;  %2348 = vmatprep.subr.mxu1 %v2252_v0  ;;  %v7739_v29 = vld [vmem:[#allocation67_spill] sm:$0xff] }
 0x67d   :  { %2278 = vmatpush1.msra.mxu0 %v2249_v57  ;;  %2349 = vmatpush1.msra.mxu1 %v2251_v56  ;;  %v7740_v57 = vld [vmem:[#allocation65_spill] sm:$0xff] }
 0x67e   :  { %2279 = vmatprep.subr.mxu0 %v2246_v60  ;;  %2350 = vmatprep.subr.mxu1 %v2248_v3 }
 0x67f   :  { %2280 = vmatpush1.msra.mxu0 %v2245_v4  ;;  %2351 = vmatpush1.msra.mxu1 %v2247_v52 }
 0x680   :  { %2281 = vmatprep.subr.mxu0 %v2242_v58  ;;  %2352 = vmatprep.subr.mxu1 %v2244_v5 }
 0x681   :  { %2282 = vmatpush1.msra.mxu0 %v2241_v6  ;;  %2353 = vmatpush1.msra.mxu1 %v2243_v7 }
 0x682   :  { %2283 = vmatprep.subr.mxu0 %v2238_v8  ;;  %2354 = vmatprep.subr.mxu1 %v2240_v9 }
 0x683   :  { %2284 = vmatpush1.msra.mxu0 %v2237_v10  ;;  %2355 = vmatpush1.msra.mxu1 %v2239_v13 }
 0x684   :  { %2285 = vmatprep.subr.mxu0 %v2234_v14  ;;  %2356 = vmatprep.subr.mxu1 %v2236_v15 }
 0x685   :  { %2286 = vmatpush1.msra.mxu0 %v2233_v16  ;;  %2357 = vmatpush1.msra.mxu1 %v2235_v17 }
 0x686   :  { %2287 = vmatprep.subr.mxu0 %v2230_v18  ;;  %2358 = vmatprep.subr.mxu1 %v2232_v19  ;;  %v2512_v18 = vld [vmem:[#allocation12 + $0x1e0] sm:$0xff]  ;;  %v2514_v19 = vld [vmem:[#allocation12 + $0x1f0] sm:$0xff] }
 0x687   :  { %2288 = vmatpush1.msra.mxu0 %v2229_v21  ;;  %2359 = vmatpush1.msra.mxu1 %v2231_v22  ;;  %v2509_v21 = vld [vmem:[#allocation12 + $0x1c8] sm:$0xff]  ;;  %v2511_v22 = vld [vmem:[#allocation12 + $0x1d8] sm:$0xff] }
 0x688   :  { %2289 = vmatprep.subr.mxu0 %v2226_v23  ;;  %2360 = vmatprep.subr.mxu1 %v2228_v24  ;;  %v2508_v23 = vld [vmem:[#allocation12 + $0x1c0] sm:$0xff]  ;;  %v2510_v24 = vld [vmem:[#allocation12 + $0x1d0] sm:$0xff] }
 0x689   :  { %2290 = vmatpush1.msra.mxu0 %v2225_v25  ;;  %2361 = vmatpush1.msra.mxu1 %v2227_v26  ;;  %v2507_v25 = vld [vmem:[#allocation12 + $0x1b8] sm:$0xff]  ;;  %v2504_v26 = vld [vmem:[#allocation12 + $0x1a0] sm:$0xff] }
 0x68a   :  { %2291 = vmatprep.subr.mxu0 %v2222_v28  ;;  %2362 = vmatprep.subr.mxu1 %v2224_v30  ;;  %v2506_v28 = vld [vmem:[#allocation12 + $0x1b0] sm:$0xff]  ;;  %v2501_v30 = vld [vmem:[#allocation12 + $0x188] sm:$0xff] }
 0x68b   :  { %2292 = vmatpush1.msra.mxu0 %v2221_v31  ;;  %2363 = vmatpush1.msra.mxu1 %v2223_v32  ;;  %v2503_v31 = vld [vmem:[#allocation12 + $0x198] sm:$0xff]  ;;  %v2500_v32 = vld [vmem:[#allocation12 + $0x180] sm:$0xff] }
 0x68c   :  { %2293 = vmatprep.subr.mxu0 %v2218_v33  ;;  %2364 = vmatprep.subr.mxu1 %v2220_v34  ;;  %v2502_v33 = vld [vmem:[#allocation12 + $0x190] sm:$0xff]  ;;  %v2497_v34 = vld [vmem:[#allocation12 + $0x168] sm:$0xff] }
 0x68d   :  { %2294 = vmatpush1.msra.mxu0 %v2217_v35  ;;  %2365 = vmatpush1.msra.mxu1 %v2219_v36  ;;  %v2499_v35 = vld [vmem:[#allocation12 + $0x178] sm:$0xff]  ;;  %v2496_v36 = vld [vmem:[#allocation12 + $0x160] sm:$0xff] }
 0x68e   :  { %2295 = vmatprep.subr.mxu0 %v2214_v37  ;;  %2366 = vmatprep.subr.mxu1 %v2216_v39  ;;  %v2498_v37 = vld [vmem:[#allocation12 + $0x170] sm:$0xff]  ;;  %v2493_v39 = vld [vmem:[#allocation12 + $0x148] sm:$0xff] }
 0x68f   :  { %2296 = vmatpush1.msra.mxu0 %v2213_v40  ;;  %2367 = vmatpush1.msra.mxu1 %v2215_v41  ;;  %v2495_v40 = vld [vmem:[#allocation12 + $0x158] sm:$0xff]  ;;  %v2492_v41 = vld [vmem:[#allocation12 + $0x140] sm:$0xff] }
 0x690   :  { %2297 = vmatprep.subr.mxu0 %v2210_v42  ;;  %2368 = vmatprep.subr.mxu1 %v2212_v43  ;;  %v2494_v42 = vld [vmem:[#allocation12 + $0x150] sm:$0xff]  ;;  %v2489_v43 = vld [vmem:[#allocation12 + $0x128] sm:$0xff] }
 0x691   :  { %2298 = vmatpush1.msra.mxu0 %v2209_v46  ;;  %2369 = vmatpush1.msra.mxu1 %v2211_v47  ;;  %v2491_v46 = vld [vmem:[#allocation12 + $0x138] sm:$0xff]  ;;  %v2488_v47 = vld [vmem:[#allocation12 + $0x120] sm:$0xff] }
 0x692   :  { %2299 = vmatprep.subr.mxu0 %v2206_v27  ;;  %2370 = vmatprep.subr.mxu1 %v2208_v45  ;;  %v2490_v27 = vld [vmem:[#allocation12 + $0x130] sm:$0xff]  ;;  %v2485_v45 = vld [vmem:[#allocation12 + $0x108] sm:$0xff] }
 0x693   :  { %2300 = vmatpush1.msra.mxu0 %v2205_v53  ;;  %2371 = vmatpush1.msra.mxu1 %v2207_v1  ;;  %v2487_v53 = vld [vmem:[#allocation12 + $0x118] sm:$0xff]  ;;  %v2484_v1 = vld [vmem:[#allocation12 + $0x100] sm:$0xff] }
 0x694   :  { %2538 = vmatprep.subr.mxu0 %v2513_v38  ;;  %2651 = vmatprep.subr.mxu1 %v2515_v20  ;;  %v2486_v38 = vld [vmem:[#allocation12 + $0x110] sm:$0xff]  ;;  %v2481_v20 = vld [vmem:[#allocation12 + $0xe8] sm:$0xff] }
 0x733   :  { %v2088_v50 = vpop.f32.mrf.mxu0  ;;  %v2159_v49 = vpop.f32.mrf.mxu1 }
 0x734   :  { %v2164_v59 = vadd.f32 %v2088_v50, %v7737_v2  ;;  %v2166_v56 = vadd.f32 %v2159_v49, %v7740_v57  ;;  %v2483_v50 = vld [vmem:[#allocation12 + $0xf8] sm:$0xff]  ;;  %v2480_v2 = vld [vmem:[#allocation12 + $0xe0] sm:$0xff]  ;;  %v2473_v49 = vld [vmem:[#allocation12 + $0xa8] sm:$0xff] }
 0x735   :  { %v2090_v11 = vpop.f32.mrf.mxu0  ;;  %v2161_v55 = vpop.f32.mrf.mxu1  ;;  %v2471_v57 = vld [vmem:[#allocation12 + $0x98] sm:$0xff] }
 0x736   :  { %v4872_v61 = vmul.f32 -1.442695, %v2164_v59  ;;  %v2165_v54 = vadd.f32 %v2090_v11, %v7738_v48  ;;  %v2167_v0 = vadd.f32 %v2161_v55, %v7739_v29  ;;  %v2482_v59 = vld [vmem:[#allocation12 + $0xf0] sm:$0xff]  ;;  %v2477_v11 = vld [vmem:[#allocation12 + $0xc8] sm:$0xff]  ;;  %v2476_v48 = vld [vmem:[#allocation12 + $0xc0] sm:$0xff] }
 0x737   :  { %v2472_v55 = vld [vmem:[#allocation12 + $0xa0] sm:$0xff]  ;;  %v2474_v29 = vld [vmem:[#allocation12 + $0xb0] sm:$0xff] }
 0x738   :  { %5064 = vpow2.f32 %v4872_v61  ;;  %v4873_v51 = vmul.f32 -1.442695, %v2165_v54  ;;  %v4874_v60 = vmul.f32 -1.442695, %v2167_v0  ;;  %v2479_v61 = vld [vmem:[#allocation12 + $0xd8] sm:$0xff]  ;;  %v2478_v54 = vld [vmem:[#allocation12 + $0xd0] sm:$0xff] }
 0x739   :  { %v2469_v0 = vld [vmem:[#allocation12 + $0x88] sm:$0xff] }
 0x73a   :  { %5066 = vpow2.f32 %v4873_v51  ;;  %v2475_v51 = vld [vmem:[#allocation12 + $0xb8] sm:$0xff] }
 0x73b   :  { %5068 = vtanh.f32 %v2166_v56  ;;  %v2468_v56 = vld [vmem:[#allocation12 + $0x80] sm:$0xff] }
 0x73c   :  { %5070 = vpow2.f32 %v4874_v60  ;;  %v2470_v60 = vld [vmem:[#allocation12 + $0x90] sm:$0xff] }
 0x745   :  { %v5065_v3 = vpop.eup %5064 }
 0x746   :  { %v2171_v4 = vadd.f32 1.0, %v5065_v3  ;;  %v2465_v3 = vld [vmem:[#allocation12 + $0x68] sm:$0xff] }
 0x747   :  { %v5067_v52 = vpop.eup %5066 }
 0x748   :  { %5072 = vrcp.f32 %v2171_v4  ;;  %v2177_v58 = vadd.f32 1.0, %v5067_v52  ;;  %v5069_v5 = vpop.eup %5068  ;;  %v2467_v4 = vld [vmem:[#allocation12 + $0x78] sm:$0xff]  ;;  %v2464_v52 = vld [vmem:[#allocation12 + $0x60] sm:$0xff] }
 0x749   :  { %v5071_v6 = vpop.eup %5070 }
 0x74a   :  { %5074 = vrcp.f32 %v2177_v58  ;;  %v2184_v10 = vadd.f32 1.0, %v5071_v6  ;;  %v2466_v58 = vld [vmem:[#allocation12 + $0x70] sm:$0xff]  ;;  %v2463_v6 = vld [vmem:[#allocation12 + $0x58] sm:$0xff] }
 0x74c   :  { %5076 = vrcp.f32 %v2184_v10  ;;  %v2459_v10 = vld [vmem:[#allocation12 + $0x38] sm:$0xff] }
 0x755   :  { %v5073_v7 = vpop.eup %5072 }
 0x756   :  { %v2189_v8 = vmul.f32 %v5073_v7, %v5069_v5  ;;  %v2461_v5 = vld [vmem:[#allocation12 + $0x48] sm:$0xff]  ;;  %v2460_v7 = vld [vmem:[#allocation12 + $0x40] sm:$0xff] }
 0x757   :  { %v5075_v9 = vpop.eup %5074 }
 0x758   :  { %v2188_v13 = vmul.f32 %v5075_v9, %v6374_v44  ;;  %v2505_v44 = vld [vmem:[#allocation12 + $0x1a8] sm:$0xff] }
 0x759   :  { %v5077_v15 = vpop.eup %5076  ;;  %v2457_v9 = vld [vmem:[#allocation12 + $0x28] sm:$0xff] }
 0x75a   :  { %v6388_v14 = vadd.f32 %v2189_v8, %v2188_v13  ;;  %v2462_v8 = vld [vmem:[#allocation12 + $0x50] sm:$0xff]  ;;  %v2456_v13 = vld [vmem:[#allocation12 + $0x20] sm:$0xff] }
 0x75c   :  { %5078 = vtanh.f32 %v6388_v14 }
 0x769   :  { %v5079_v16 = vpop.eup %5078 }
 0x76a   :  { %v6391_v17 = vmul.f32 %v5079_v16, %v5077_v15  ;;  %v2458_v15 = vld [vmem:[#allocation12 + $0x30] sm:$0xff]  ;;  %v2453_v16 = vld [vmem:[#allocation12 + $0x8] sm:$0xff] }
 0x76c   :  { %2334 = vmatmul.mubr.f32.vlgmr.msra.gmra.mxu0 %v6391_v17  ;;  %2405 = vmatmul.mubr.f32.vlgmr.msra.gmra.mxu1 %v6391_v17 }
 0x76d   :  { %2539 = vmatpush1.msra.mxu0 %v2512_v18  ;;  %2652 = vmatpush1.msra.mxu1 %v2514_v19  ;;  %v2455_v18 = vld [vmem:[#allocation12 + $0x18] sm:$0xff]  ;;  %v2452_v19 = vld [vmem:[#allocation12] sm:$0xff] }
 0x76e   :  { %2540 = vmatprep.subr.mxu0 %v2509_v21  ;;  %2653 = vmatprep.subr.mxu1 %v2511_v22  ;;  %v2454_v21 = vld [vmem:[#allocation12 + $0x10] sm:$0xff] }
 0x76f   :  { %2541 = vmatpush1.msra.mxu0 %v2508_v23  ;;  %2654 = vmatpush1.msra.mxu1 %v2510_v24  ;;  %v7741_v22 = vld [vmem:[#allocation72_spill] sm:$0xff]  ;;  %v7742_v23 = vld [vmem:[#allocation23_spill] sm:$0xff] }
 0x770   :  { %2542 = vmatprep.subr.mxu0 %v2505_v44  ;;  %2655 = vmatprep.subr.mxu1 %v2507_v25  ;;  %v7743_v24 = vld [vmem:[#allocation43_spill] sm:$0xff]  ;;  %v7744_v44 = vld [vmem:[#allocation46_spill] sm:$0xff]  ;;  %v6427_v25 = vld [vmem:[#allocation14 + $0x1f8] sm:$0xff] }
 0x771   :  { %2543 = vmatpush1.msra.mxu0 %v2504_v26  ;;  %2656 = vmatpush1.msra.mxu1 %v2506_v28  ;;  %7746 = vst [vmem:[#allocation45_spill] sm:$0xff] %v6427_v25  ;;  %v6433_v26 = vld [vmem:[#allocation14 + $0x1f0] sm:$0xff]  ;;  %v6439_v28 = vld [vmem:[#allocation14 + $0x1d8] sm:$0xff] }
 0x772   :  { %2544 = vmatprep.subr.mxu0 %v2501_v30  ;;  %2657 = vmatprep.subr.mxu1 %v2503_v31  ;;  %v6443_v30 = vld [vmem:[#allocation14 + $0x1c0] sm:$0xff]  ;;  %v6445_v31 = vld [vmem:[#allocation14 + $0x1d0] sm:$0xff] }
 0x773   :  { %2545 = vmatpush1.msra.mxu0 %v2500_v32  ;;  %2658 = vmatpush1.msra.mxu1 %v2502_v33  ;;  %v6449_v32 = vld [vmem:[#allocation14 + $0x1a8] sm:$0xff]  ;;  %v6451_v33 = vld [vmem:[#allocation14 + $0x1b8] sm:$0xff] }
 0x774   :  { %2546 = vmatprep.subr.mxu0 %v2497_v34  ;;  %2659 = vmatprep.subr.mxu1 %v2499_v35  ;;  %v6455_v34 = vld [vmem:[#allocation14 + $0x1a0] sm:$0xff]  ;;  %v6457_v35 = vld [vmem:[#allocation14 + $0x1b0] sm:$0xff] }
 0x775   :  { %2547 = vmatpush1.msra.mxu0 %v2496_v36  ;;  %2660 = vmatpush1.msra.mxu1 %v2498_v37  ;;  %v6461_v36 = vld [vmem:[#allocation14 + $0x188] sm:$0xff]  ;;  %v6463_v37 = vld [vmem:[#allocation14 + $0x198] sm:$0xff] }
 0x776   :  { %2548 = vmatprep.subr.mxu0 %v2493_v39  ;;  %2661 = vmatprep.subr.mxu1 %v2495_v40  ;;  %v6467_v39 = vld [vmem:[#allocation14 + $0x180] sm:$0xff]  ;;  %v6469_v40 = vld [vmem:[#allocation14 + $0x190] sm:$0xff] }
 0x777   :  { %2549 = vmatpush1.msra.mxu0 %v2492_v41  ;;  %2662 = vmatpush1.msra.mxu1 %v2494_v42  ;;  %v6473_v41 = vld [vmem:[#allocation14 + $0x168] sm:$0xff]  ;;  %v6475_v42 = vld [vmem:[#allocation14 + $0x178] sm:$0xff] }
 0x778   :  { %2550 = vmatprep.subr.mxu0 %v2489_v43  ;;  %2663 = vmatprep.subr.mxu1 %v2491_v46  ;;  %v6479_v43 = vld [vmem:[#allocation14 + $0x160] sm:$0xff]  ;;  %v6481_v46 = vld [vmem:[#allocation14 + $0x170] sm:$0xff] }
 0x779   :  { %2551 = vmatpush1.msra.mxu0 %v2488_v47  ;;  %2664 = vmatpush1.msra.mxu1 %v2490_v27  ;;  %v6485_v47 = vld [vmem:[#allocation14 + $0x148] sm:$0xff]  ;;  %v6487_v27 = vld [vmem:[#allocation14 + $0x158] sm:$0xff] }
 0x77a   :  { %2552 = vmatprep.subr.mxu0 %v2485_v45  ;;  %2665 = vmatprep.subr.mxu1 %v2487_v53  ;;  %v6491_v45 = vld [vmem:[#allocation14 + $0x140] sm:$0xff]  ;;  %v6493_v53 = vld [vmem:[#allocation14 + $0x150] sm:$0xff] }
 0x77b   :  { %2553 = vmatpush1.msra.mxu0 %v2484_v1  ;;  %2666 = vmatpush1.msra.mxu1 %v2486_v38  ;;  %v6497_v1 = vld [vmem:[#allocation14 + $0x128] sm:$0xff]  ;;  %v6499_v38 = vld [vmem:[#allocation14 + $0x138] sm:$0xff] }
 0x77c   :  { %2554 = vmatprep.subr.mxu0 %v2481_v20  ;;  %2667 = vmatprep.subr.mxu1 %v2483_v50  ;;  %v6503_v20 = vld [vmem:[#allocation14 + $0x120] sm:$0xff]  ;;  %v6505_v50 = vld [vmem:[#allocation14 + $0x130] sm:$0xff] }
 0x77d   :  { %2555 = vmatpush1.msra.mxu0 %v2480_v2  ;;  %2668 = vmatpush1.msra.mxu1 %v2482_v59  ;;  %v6509_v2 = vld [vmem:[#allocation14 + $0x108] sm:$0xff]  ;;  %v6511_v59 = vld [vmem:[#allocation14 + $0x118] sm:$0xff] }
 0x77e   :  { %2556 = vmatprep.subr.mxu0 %v2477_v11  ;;  %2669 = vmatprep.subr.mxu1 %v2479_v61  ;;  %v6515_v11 = vld [vmem:[#allocation14 + $0x100] sm:$0xff]  ;;  %v6517_v61 = vld [vmem:[#allocation14 + $0x110] sm:$0xff] }
 0x77f   :  { %2557 = vmatpush1.msra.mxu0 %v2476_v48  ;;  %2670 = vmatpush1.msra.mxu1 %v2478_v54  ;;  %v6521_v48 = vld [vmem:[#allocation14 + $0xe8] sm:$0xff]  ;;  %v6523_v54 = vld [vmem:[#allocation14 + $0xf8] sm:$0xff] }
 0x780   :  { %2558 = vmatprep.subr.mxu0 %v2473_v49  ;;  %2671 = vmatprep.subr.mxu1 %v2475_v51  ;;  %v6527_v49 = vld [vmem:[#allocation14 + $0xe0] sm:$0xff]  ;;  %v6529_v51 = vld [vmem:[#allocation14 + $0xf0] sm:$0xff] }
 0x781   :  { %2559 = vmatpush1.msra.mxu0 %v2472_v55  ;;  %2672 = vmatpush1.msra.mxu1 %v2474_v29  ;;  %v6533_v55 = vld [vmem:[#allocation14 + $0xc8] sm:$0xff]  ;;  %v6535_v29 = vld [vmem:[#allocation14 + $0xd8] sm:$0xff] }
 0x782   :  { %2560 = vmatprep.subr.mxu0 %v2469_v0  ;;  %2673 = vmatprep.subr.mxu1 %v2471_v57  ;;  %v6539_v0 = vld [vmem:[#allocation14 + $0xc0] sm:$0xff]  ;;  %v6541_v57 = vld [vmem:[#allocation14 + $0xd0] sm:$0xff] }
 0x783   :  { %2561 = vmatpush1.msra.mxu0 %v2468_v56  ;;  %2674 = vmatpush1.msra.mxu1 %v2470_v60  ;;  %v6545_v56 = vld [vmem:[#allocation14 + $0xa8] sm:$0xff]  ;;  %v6547_v60 = vld [vmem:[#allocation14 + $0xb8] sm:$0xff] }
 0x784   :  { %2562 = vmatprep.subr.mxu0 %v2465_v3  ;;  %2675 = vmatprep.subr.mxu1 %v2467_v4  ;;  %v6551_v3 = vld [vmem:[#allocation14 + $0xa0] sm:$0xff]  ;;  %v6553_v4 = vld [vmem:[#allocation14 + $0xb0] sm:$0xff] }
 0x785   :  { %2563 = vmatpush1.msra.mxu0 %v2464_v52  ;;  %2676 = vmatpush1.msra.mxu1 %v2466_v58  ;;  %v6557_v52 = vld [vmem:[#allocation14 + $0x88] sm:$0xff]  ;;  %v6559_v58 = vld [vmem:[#allocation14 + $0x98] sm:$0xff] }
 0x786   :  { %2564 = vmatprep.subr.mxu0 %v2461_v5  ;;  %2677 = vmatprep.subr.mxu1 %v2463_v6  ;;  %7747 = vst [vmem:[#allocation48_spill] sm:$0xff] %v6557_v52  ;;  %7748 = vst [vmem:[#allocation50_spill] sm:$0xff] %v6559_v58  ;;  %v6563_v5 = vld [vmem:[#allocation14 + $0x80] sm:$0xff]  ;;  %v6565_v6 = vld [vmem:[#allocation14 + $0x90] sm:$0xff] }
 0x787   :  { %2565 = vmatpush1.msra.mxu0 %v2460_v7  ;;  %2678 = vmatpush1.msra.mxu1 %v2462_v8  ;;  %7749 = vst [vmem:[#allocation51_spill] sm:$0xff] %v6563_v5  ;;  %7750 = vst [vmem:[#allocation49_spill] sm:$0xff] %v6565_v6  ;;  %v6569_v7 = vld [vmem:[#allocation14 + $0x68] sm:$0xff]  ;;  %v6571_v8 = vld [vmem:[#allocation14 + $0x78] sm:$0xff] }
 0x788   :  { %2566 = vmatprep.subr.mxu0 %v2457_v9  ;;  %2679 = vmatprep.subr.mxu1 %v2459_v10  ;;  %7751 = vst [vmem:[#allocation52_spill] sm:$0xff] %v6569_v7  ;;  %7752 = vst [vmem:[#allocation54_spill] sm:$0xff] %v6571_v8  ;;  %v6575_v9 = vld [vmem:[#allocation14 + $0x60] sm:$0xff]  ;;  %v6577_v10 = vld [vmem:[#allocation14 + $0x70] sm:$0xff] }
 0x789   :  { %2567 = vmatpush1.msra.mxu0 %v2456_v13  ;;  %2680 = vmatpush1.msra.mxu1 %v2458_v15  ;;  %7753 = vst [vmem:[#allocation55_spill] sm:$0xff] %v6575_v9  ;;  %7754 = vst [vmem:[#allocation53_spill] sm:$0xff] %v6577_v10  ;;  %v6581_v13 = vld [vmem:[#allocation14 + $0x48] sm:$0xff]  ;;  %v6583_v15 = vld [vmem:[#allocation14 + $0x58] sm:$0xff] }
 0x78a   :  { %2568 = vmatprep.subr.mxu0 %v2453_v16  ;;  %2681 = vmatprep.subr.mxu1 %v2455_v18  ;;  %7755 = vst [vmem:[#allocation24_spill] sm:$0xff] %v6581_v13  ;;  %7756 = vst [vmem:[#allocation25_spill] sm:$0xff] %v6583_v15  ;;  %v6587_v16 = vld [vmem:[#allocation14 + $0x40] sm:$0xff]  ;;  %v6589_v18 = vld [vmem:[#allocation14 + $0x50] sm:$0xff] }
 0x78b   :  { %2569 = vmatpush1.msra.mxu0 %v2452_v19  ;;  %2602 = vmatprep.mubr.f32.mxu0 %v7731_v12  ;;  %7757 = vst [vmem:[#allocation56_spill] sm:$0xff] %v6587_v16  ;;  %7758 = vst [vmem:[#allocation58_spill] sm:$0xff] %v6589_v18  ;;  %v6593_v19 = vld [vmem:[#allocation14 + $0x28] sm:$0xff] }
 0x78c   :  { %2682 = vmatpush1.msra.mxu1 %v2454_v21  ;;  %2715 = vmatprep.mubr.f32.mxu1 %v7731_v12  ;;  %7759 = vst [vmem:[#allocation59_spill] sm:$0xff] %v6593_v19  ;;  %v6595_v21 = vld [vmem:[#allocation14 + $0x38] sm:$0xff] }
 0x78d   :  { %2603 = vmatmul.mubr.f32.vlgmr.msra.gmra.mxu0 %v7741_v22  ;;  %2716 = vmatmul.mubr.f32.vlgmr.msra.gmra.mxu1 %v7741_v22  ;;  %7760 = vst [vmem:[#allocation57_spill] sm:$0xff] %v6595_v21  ;;  %v6599_v22 = vld [vmem:[#allocation14 + $0x20] sm:$0xff] }
 0x78e   :  { %2608 = vmatprep.mubr.f32.mxu0 %v7731_v12  ;;  %2721 = vmatprep.mubr.f32.mxu1 %v7731_v12  ;;  %7761 = vst [vmem:[#allocation26_spill] sm:$0xff] %v6599_v22 }
 0x78f   :  { %2938 = vmatprep.subr.mxu1 %v6427_v25 }
 0x790   :  { %2939 = vmatpush1.msra.mxu1 %v6433_v26 }
 0x791   :  { %2609 = vmatmul.mubr.f32.gmra.mxu0 %v7742_v23  ;;  %2722 = vmatmul.mubr.f32.gmra.mxu1 %v7742_v23  ;;  %v6601_v23 = vld [vmem:[#allocation14 + $0x30] sm:$0xff] }
 0x792   :  { %2614 = vmatprep.mubr.f32.mxu0 %v7731_v12  ;;  %2727 = vmatprep.mubr.f32.mxu1 %v7731_v12  ;;  %7762 = vst [vmem:[#allocation27_spill] sm:$0xff] %v6601_v23 }
 0x793   :  { %2940 = vmatprep.subr.mxu1 %v6439_v28 }
 0x794   :  { %2941 = vmatpush1.msra.mxu1 %v6445_v31 }
 0x795   :  { %2615 = vmatmul.mubr.f32.gmra.mxu0 %v7743_v24  ;;  %2728 = vmatmul.mubr.f32.gmra.mxu1 %v7743_v24  ;;  %v6605_v24 = vld [vmem:[#allocation14 + $0x8] sm:$0xff] }
 0x796   :  { %2620 = vmatprep.mubr.f32.mxu0 %v7731_v12  ;;  %2733 = vmatprep.mubr.f32.mxu1 %v7731_v12  ;;  %7763 = vst [vmem:[#allocation28_spill] sm:$0xff] %v6605_v24 }
 0x797   :  { %2942 = vmatprep.subr.mxu1 %v6451_v33 }
 0x798   :  { %2943 = vmatpush1.msra.mxu1 %v6457_v35 }
 0x799   :  { %2621 = vmatmul.mubr.f32.gmra.mxu0 %v7744_v44  ;;  %2734 = vmatmul.mubr.f32.gmra.mxu1 %v7744_v44  ;;  %v6607_v44 = vld [vmem:[#allocation14 + $0x18] sm:$0xff] }
 0x79a   :  { %2626 = vmatprep.mubr.f32.mxu0 %v7731_v12  ;;  %2739 = vmatprep.mubr.f32.mxu1 %v7731_v12  ;;  %7764 = vst [vmem:[#allocation29_spill] sm:$0xff] %v6607_v44 }
 0x79b   :  { %2944 = vmatprep.subr.mxu1 %v6463_v37 }
 0x79c   :  { %2945 = vmatpush1.msra.mxu1 %v6469_v40 }
 0x79d   :  { %2627 = vmatmul.mubr.f32.gmra.mxu0 %v6301_v62  ;;  %2740 = vmatmul.mubr.f32.gmra.mxu1 %v6301_v62  ;;  %v6425_v62 = vld [vmem:[#allocation14 + $0x1e8] sm:$0xff] }
 0x79e   :  { %2632 = vmatprep.mubr.f32.mxu0 %v7731_v12  ;;  %2745 = vmatprep.mubr.f32.mxu1 %v7731_v12  ;;  %7745 = vst [vmem:[#allocation47_spill] sm:$0xff] %v6425_v62 }
 0x79f   :  { %2867 = vmatprep.subr.mxu0 %v6425_v62  ;;  %2946 = vmatprep.subr.mxu1 %v6475_v42 }
 0x7a0   :  { %2947 = vmatpush1.msra.mxu1 %v6481_v46 }
 0x7a1   :  { %2633 = vmatmul.mubr.f32.gmra.mxu0 %v6377_v63  ;;  %2746 = vmatmul.mubr.f32.gmra.mxu1 %v6377_v63  ;;  %v6431_v63 = vld [vmem:[#allocation14 + $0x1e0] sm:$0xff] }
 0x7a2   :  { %2638 = vmatprep.mubr.f32.mxu0 %v7731_v12  ;;  %2751 = vmatprep.mubr.f32.mxu1 %v7731_v12 }
 0x7a3   :  { %2868 = vmatpush1.msra.mxu0 %v6431_v63  ;;  %2948 = vmatprep.subr.mxu1 %v6487_v27 }
 0x7a4   :  { %2949 = vmatpush1.msra.mxu1 %v6493_v53 }
 0x7a5   :  { %2639 = vmatmul.mubr.f32.gmra.mxu0 %v6391_v17  ;;  %2752 = vmatmul.mubr.f32.gmra.mxu1 %v6391_v17  ;;  %v6437_v17 = vld [vmem:[#allocation14 + $0x1c8] sm:$0xff] }
 0x7a6   :  { %2644 = vmatprep.mubr.f32.mxu0 %v7731_v12  ;;  %2757 = vmatprep.mubr.f32.mxu1 %v7731_v12 }
 0x7a7   :  { %2869 = vmatprep.subr.mxu0 %v6437_v17  ;;  %2950 = vmatprep.subr.mxu1 %v6499_v38 }
 0x7a8   :  { %2870 = vmatpush1.msra.mxu0 %v6443_v30  ;;  %2951 = vmatpush1.msra.mxu1 %v6505_v50 }
 0x7a9   :  { %2871 = vmatprep.subr.mxu0 %v6449_v32  ;;  %2952 = vmatprep.subr.mxu1 %v6511_v59 }
 0x7aa   :  { %2872 = vmatpush1.msra.mxu0 %v6455_v34  ;;  %2953 = vmatpush1.msra.mxu1 %v6517_v61 }
 0x7ab   :  { %2873 = vmatprep.subr.mxu0 %v6461_v36  ;;  %2954 = vmatprep.subr.mxu1 %v6523_v54 }
 0x7ac   :  { %2874 = vmatpush1.msra.mxu0 %v6467_v39  ;;  %2955 = vmatpush1.msra.mxu1 %v6529_v51 }
 0x7ad   :  { %2875 = vmatprep.subr.mxu0 %v6473_v41  ;;  %2956 = vmatprep.subr.mxu1 %v6535_v29 }
 0x7ae   :  { %2876 = vmatpush1.msra.mxu0 %v6479_v43  ;;  %2957 = vmatpush1.msra.mxu1 %v6541_v57 }
 0x7af   :  { %2877 = vmatprep.subr.mxu0 %v6485_v47  ;;  %2958 = vmatprep.subr.mxu1 %v6547_v60 }
 0x7b0   :  { %2878 = vmatpush1.msra.mxu0 %v6491_v45  ;;  %2959 = vmatpush1.msra.mxu1 %v6553_v4 }
 0x7b1   :  { %2879 = vmatprep.subr.mxu0 %v6497_v1  ;;  %2960 = vmatprep.subr.mxu1 %v6559_v58 }
 0x7b2   :  { %2880 = vmatpush1.msra.mxu0 %v6503_v20  ;;  %2961 = vmatpush1.msra.mxu1 %v6565_v6 }
 0x7b3   :  { %2881 = vmatprep.subr.mxu0 %v6509_v2  ;;  %2962 = vmatprep.subr.mxu1 %v6571_v8  ;;  %v7769_v8 = vld [vmem:[#allocation71_spill] sm:$0xff] }
 0x7b4   :  { %2882 = vmatpush1.msra.mxu0 %v6515_v11  ;;  %2963 = vmatpush1.msra.mxu1 %v6577_v10 }
 0x7b5   :  { %2883 = vmatprep.subr.mxu0 %v6521_v48  ;;  %2964 = vmatprep.subr.mxu1 %v6583_v15 }
 0x7b6   :  { %2884 = vmatpush1.msra.mxu0 %v6527_v49  ;;  %2965 = vmatpush1.msra.mxu1 %v6589_v18  ;;  %v6609_v18 = vld [vmem:[#allocation14] sm:$0xff] }
 0x7b7   :  { %2885 = vmatprep.subr.mxu0 %v6533_v55  ;;  %2966 = vmatprep.subr.mxu1 %v6595_v21  ;;  %7765 = vst [vmem:[#allocation30_spill] sm:$0xff] %v6609_v18 }
 0x7b8   :  { %2886 = vmatpush1.msra.mxu0 %v6539_v0  ;;  %2967 = vmatpush1.msra.mxu1 %v6601_v23 }
 0x7b9   :  { %2887 = vmatprep.subr.mxu0 %v6545_v56  ;;  %2968 = vmatprep.subr.mxu1 %v6607_v44 }
 0x7ba   :  { %2888 = vmatpush1.msra.mxu0 %v6551_v3 }
 0x7bb   :  { %2889 = vmatprep.subr.mxu0 %v6557_v52 }
 0x7bc   :  { %2890 = vmatpush1.msra.mxu0 %v6563_v5 }
 0x7bd   :  { %2891 = vmatprep.subr.mxu0 %v6569_v7  ;;  %v7770_v7 = vld [vmem:[#allocation69_spill] sm:$0xff] }
 0x7be   :  { %2892 = vmatpush1.msra.mxu0 %v6575_v9 }
 0x7bf   :  { %2893 = vmatprep.subr.mxu0 %v6581_v13  ;;  %v7768_v13 = vld [vmem:[#allocation70_spill] sm:$0xff] }
 0x7c0   :  { %2894 = vmatpush1.msra.mxu0 %v6587_v16 }
 0x7c1   :  { %2895 = vmatprep.subr.mxu0 %v6593_v19  ;;  %v6613_v19 = vld [vmem:[#allocation14 + $0x10] sm:$0xff] }
 0x7c2   :  { %2896 = vmatpush1.msra.mxu0 %v6599_v22  ;;  %7766 = vst [vmem:[#allocation31_spill] sm:$0xff] %v6613_v19  ;;  %2969 = vmatpush1.msra.mxu1 %v6613_v19  ;;  %v7767_v22 = vld [vmem:[#allocation68_spill] sm:$0xff] }
 0x7c3   :  { %2897 = vmatprep.subr.mxu0 %v6605_v24  ;;  %3180 = vmatprep.subr.mxu1 %v6427_v25 }
 0x7c4   :  { %2898 = vmatpush1.msra.mxu0 %v6609_v18 }
 0x7c5   :  { %3109 = vmatprep.subr.mxu0 %v6425_v62 }
 0x82c   :  { %v2335_v23 = vpop.f32.mrf.mxu0  ;;  %v2406_v24 = vpop.f32.mrf.mxu1 }
 0x82d   :  { %v2411_v21 = vadd.f32 %v2335_v23, %v7767_v22  ;;  %v2413_v19 = vadd.f32 %v2406_v24, %v7770_v7  ;;  %v7777_v24 = vld [vmem:[#allocation24_spill] sm:$0xff] }
 0x82e   :  { %v2337_v16 = vpop.f32.mrf.mxu0  ;;  %v2408_v9 = vpop.f32.mrf.mxu1 }
 0x82f   :  { %v4875_v15 = vmul.f32 -1.442695, %v2411_v21  ;;  %v2412_v10 = vadd.f32 %v2337_v16, %v7768_v13  ;;  %v2414_v18 = vadd.f32 %v2408_v9, %v7769_v8 }
 0x831   :  { %5080 = vpow2.f32 %v4875_v15  ;;  %v4876_v44 = vmul.f32 -1.442695, %v2412_v10  ;;  %v4877_v6 = vmul.f32 -1.442695, %v2414_v18  ;;  %v7775_v18 = vld [vmem:[#allocation55_spill] sm:$0xff] }
 0x833   :  { %5082 = vpow2.f32 %v4876_v44 }
 0x834   :  { %5084 = vtanh.f32 %v2413_v19  ;;  %v7776_v19 = vld [vmem:[#allocation53_spill] sm:$0xff] }
 0x835   :  { %5086 = vpow2.f32 %v4877_v6  ;;  %v7774_v6 = vld [vmem:[#allocation54_spill] sm:$0xff] }
 0x83e   :  { %v5081_v62 = vpop.eup %5080 }
 0x83f   :  { %v2418_v5 = vadd.f32 1.0, %v5081_v62 }
 0x840   :  { %v5083_v25 = vpop.eup %5082 }
 0x841   :  { %5088 = vrcp.f32 %v2418_v5  ;;  %v2424_v22 = vadd.f32 1.0, %v5083_v25  ;;  %v5085_v21 = vpop.eup %5084  ;;  %v7772_v25 = vld [vmem:[#allocation49_spill] sm:$0xff]  ;;  %v7773_v5 = vld [vmem:[#allocation52_spill] sm:$0xff] }
 0x842   :  { %v5087_v13 = vpop.eup %5086 }
 0x843   :  { %5090 = vrcp.f32 %v2424_v22  ;;  %v2431_v23 = vadd.f32 1.0, %v5087_v13  ;;  %v7778_v22 = vld [vmem:[#allocation25_spill] sm:$0xff]  ;;  %v7780_v13 = vld [vmem:[#allocation58_spill] sm:$0xff] }
 0x845   :  { %5092 = vrcp.f32 %v2431_v23  ;;  %v7784_v23 = vld [vmem:[#allocation27_spill] sm:$0xff] }
 0x84e   :  { %v5089_v15 = vpop.eup %5088 }
 0x84f   :  { %v2436_v16 = vmul.f32 %v5089_v15, %v5085_v21  ;;  %v7779_v21 = vld [vmem:[#allocation56_spill] sm:$0xff]  ;;  %v7781_v15 = vld [vmem:[#allocation59_spill] sm:$0xff] }
 0x850   :  { %v5091_v10 = vpop.eup %5090 }
 0x851   :  { %v2435_v44 = vmul.f32 %v5091_v10, %v6388_v14  ;;  %v7771_v14 = vld [vmem:[#allocation51_spill] sm:$0xff]  ;;  %v7783_v10 = vld [vmem:[#allocation26_spill] sm:$0xff] }
 0x852   :  { %v5093_v7 = vpop.eup %5092 }
 0x853   :  { %v2437_v8 = vadd.f32 %v2436_v16, %v2435_v44  ;;  %v7782_v16 = vld [vmem:[#allocation57_spill] sm:$0xff]  ;;  %v7785_v44 = vld [vmem:[#allocation28_spill] sm:$0xff] }
 0x855   :  { %5094 = vtanh.f32 %v2437_v8  ;;  %v7786_v8 = vld [vmem:[#allocation29_spill] sm:$0xff] }
 0x862   :  { %v5095_v9 = vpop.eup %5094 }
 0x863   :  { %v2439_v62 = vmul.f32 %v5095_v9, %v5093_v7  ;;  %v7787_v7 = vld [vmem:[#allocation30_spill] sm:$0xff]  ;;  %v7788_v9 = vld [vmem:[#allocation31_spill] sm:$0xff] }
 0x865   :  { %2645 = vmatmul.mubr.f32.gmra.mxu0 %v2439_v62  ;;  %2758 = vmatmul.mubr.f32.gmra.mxu1 %v2439_v62  ;;  %v7789_v62 = vld [vmem:[#allocation47_spill] sm:$0xff] }
 0x866   :  { %2931 = vmatprep.mubr.f32.mxu0 %v7731_v12  ;;  %3002 = vmatprep.mubr.f32.mxu1 %v7731_v12 }
 0x869   :  { %2932 = vmatmul.mubr.f32.vlgmr.msra.gmra.mxu0 %v7731_v12  ;;  %3003 = vmatmul.mubr.f32.vlgmr.msra.gmra.mxu1 %v7731_v12 }
 0x86a   :  { %3110 = vmatpush1.msra.mxu0 %v6431_v63  ;;  %3181 = vmatpush1.msra.mxu1 %v6433_v26 }
 0x86b   :  { %3111 = vmatprep.subr.mxu0 %v6437_v17  ;;  %3182 = vmatprep.subr.mxu1 %v6439_v28 }
 0x86c   :  { %3112 = vmatpush1.msra.mxu0 %v6443_v30  ;;  %3183 = vmatpush1.msra.mxu1 %v6445_v31 }
 0x86d   :  { %3113 = vmatprep.subr.mxu0 %v6449_v32  ;;  %3184 = vmatprep.subr.mxu1 %v6451_v33 }
 0x86e   :  { %3114 = vmatpush1.msra.mxu0 %v6455_v34  ;;  %3185 = vmatpush1.msra.mxu1 %v6457_v35 }
 0x86f   :  { %3115 = vmatprep.subr.mxu0 %v6461_v36  ;;  %3186 = vmatprep.subr.mxu1 %v6463_v37 }
 0x870   :  { %3116 = vmatpush1.msra.mxu0 %v6467_v39  ;;  %3187 = vmatpush1.msra.mxu1 %v6469_v40 }
 0x871   :  { %3117 = vmatprep.subr.mxu0 %v6473_v41  ;;  %3188 = vmatprep.subr.mxu1 %v6475_v42 }
 0x872   :  { %3118 = vmatpush1.msra.mxu0 %v6479_v43  ;;  %3189 = vmatpush1.msra.mxu1 %v6481_v46 }
 0x873   :  { %3119 = vmatprep.subr.mxu0 %v6485_v47  ;;  %3190 = vmatprep.subr.mxu1 %v6487_v27 }
 0x874   :  { %3120 = vmatpush1.msra.mxu0 %v6491_v45  ;;  %3191 = vmatpush1.msra.mxu1 %v6493_v53 }
 0x875   :  { %3121 = vmatprep.subr.mxu0 %v6497_v1  ;;  %3192 = vmatprep.subr.mxu1 %v6499_v38 }
 0x876   :  { %3122 = vmatpush1.msra.mxu0 %v6503_v20  ;;  %3193 = vmatpush1.msra.mxu1 %v6505_v50 }
 0x877   :  { %3123 = vmatprep.subr.mxu0 %v6509_v2  ;;  %3194 = vmatprep.subr.mxu1 %v6511_v59 }
 0x878   :  { %3124 = vmatpush1.msra.mxu0 %v6515_v11  ;;  %3195 = vmatpush1.msra.mxu1 %v6517_v61 }
 0x879   :  { %3125 = vmatprep.subr.mxu0 %v6521_v48  ;;  %3196 = vmatprep.subr.mxu1 %v6523_v54 }
 0x87a   :  { %3126 = vmatpush1.msra.mxu0 %v6527_v49  ;;  %3197 = vmatpush1.msra.mxu1 %v6529_v51 }
 0x87b   :  { %3127 = vmatprep.subr.mxu0 %v6533_v55  ;;  %3198 = vmatprep.subr.mxu1 %v6535_v29 }
 0x87c   :  { %3128 = vmatpush1.msra.mxu0 %v6539_v0  ;;  %3199 = vmatpush1.msra.mxu1 %v6541_v57 }
 0x87d   :  { %3129 = vmatprep.subr.mxu0 %v6545_v56  ;;  %3200 = vmatprep.subr.mxu1 %v6547_v60 }
 0x87e   :  { %3130 = vmatpush1.msra.mxu0 %v6551_v3  ;;  %3201 = vmatpush1.msra.mxu1 %v6553_v4 }
 0x87f   :  { %3131 = vmatprep.subr.mxu0 %v6557_v52  ;;  %3202 = vmatprep.subr.mxu1 %v6559_v58 }
 0x880   :  { %3132 = vmatpush1.msra.mxu0 %v7771_v14  ;;  %3203 = vmatpush1.msra.mxu1 %v7772_v25 }
 0x881   :  { %3133 = vmatprep.subr.mxu0 %v7773_v5  ;;  %3204 = vmatprep.subr.mxu1 %v7774_v6 }
 0x882   :  { %3134 = vmatpush1.msra.mxu0 %v7775_v18  ;;  %3205 = vmatpush1.msra.mxu1 %v7776_v19 }
 0x883   :  { %3135 = vmatprep.subr.mxu0 %v7777_v24  ;;  %3206 = vmatprep.subr.mxu1 %v7778_v22 }
 0x884   :  { %3136 = vmatpush1.msra.mxu0 %v7779_v21  ;;  %3207 = vmatpush1.msra.mxu1 %v7780_v13 }
 0x885   :  { %3137 = vmatprep.subr.mxu0 %v7781_v15  ;;  %3208 = vmatprep.subr.mxu1 %v7782_v16  ;;  %v7790_v15 = vld [vmem:[#allocation45_spill] sm:$0xff]  ;;  %v2604_v16 = vpop.f32.mrf.mxu0 }
 0x886   :  { %3138 = vmatpush1.msra.mxu0 %v7783_v10  ;;  %3209 = vmatpush1.msra.mxu1 %v7784_v23  ;;  %v2717_v10 = vpop.f32.mrf.mxu1 }
 0x887   :  { %3139 = vmatprep.subr.mxu0 %v7785_v44  ;;  %3210 = vmatprep.subr.mxu1 %v7786_v8  ;;  %v2606_v13 = vpop.f32.mrf.mxu0 }
 0x888   :  { %3140 = vmatpush1.msra.mxu0 %v7787_v7  ;;  %3173 = vmatprep.mubr.f32.mxu0 %v7731_v12  ;;  %v2719_v23 = vpop.f32.mrf.mxu1 }
 0x889   :  { %3211 = vmatpush1.msra.mxu1 %v7788_v9  ;;  %3244 = vmatprep.mubr.f32.mxu1 %v7731_v12  ;;  %v6694_v21 = vpop.f32.mrf.mxu0 }
 0x88a   :  { %3351 = vmatprep.subr.mxu0 %v7789_v62  ;;  %3422 = vmatprep.subr.mxu1 %v7790_v15  ;;  %7791 = vst [vmem:[#allocation32_spill] sm:$0xff] %v6694_v21  ;;  %v6696_v44 = vpop.f32.mrf.mxu1 }
 0x88b   :  { %7792 = vst [vmem:[#allocation33_spill] sm:$0xff] %v6696_v44  ;;  %v6698_v8 = vpop.f32.mrf.mxu0 }
 0x88c   :  { %7793 = vst [vmem:[#allocation34_spill] sm:$0xff] %v6698_v8  ;;  %v6700_v7 = vpop.f32.mrf.mxu1 }
 0x88d   :  { %7794 = vst [vmem:[#allocation35_spill] sm:$0xff] %v6700_v7  ;;  %v6702_v22 = vpop.f32.mrf.mxu0 }
 0x88e   :  { %7795 = vst [vmem:[#allocation36_spill] sm:$0xff] %v6702_v22  ;;  %v6704_v9 = vpop.f32.mrf.mxu1 }
 0x88f   :  { %7796 = vst [vmem:[#allocation37_spill] sm:$0xff] %v6704_v9  ;;  %v6706_v12 = vpop.f32.mrf.mxu0 }
 0x890   :  { %7797 = vst [vmem:[#allocation38_spill] sm:$0xff] %v6706_v12  ;;  %v6708_v62 = vpop.f32.mrf.mxu1 }
 0x891   :  { %7798 = vst [vmem:[#allocation39_spill] sm:$0xff] %v6708_v62  ;;  %v6710_v15 = vpop.f32.mrf.mxu0 }
 0x892   :  { %7799 = vst [vmem:[#allocation40_spill] sm:$0xff] %v6710_v15  ;;  %v6712_v24 = vpop.f32.mrf.mxu1 }
 0x893   :  { %7800 = vst [vmem:[#allocation41_spill] sm:$0xff] %v6712_v24  ;;  %v6714_v19 = vpop.f32.mrf.mxu0 }
 0x894   :  { %7801 = vst [vmem:[#allocation42_spill] sm:$0xff] %v6714_v19  ;;  %v6716_v21 = vpop.f32.mrf.mxu1 }
 0x895   :  { %7802 = vst [vmem:[#allocation60_spill] sm:$0xff] %v6716_v21  ;;  %v6718_v44 = vpop.f32.mrf.mxu0 }
 0x896   :  { %7803 = vst [vmem:[#allocation62_spill] sm:$0xff] %v6718_v44  ;;  %v6720_v8 = vpop.f32.mrf.mxu1 }
 0x897   :  { %7804 = vst [vmem:[#allocation63_spill] sm:$0xff] %v6720_v8  ;;  %v6722_v7 = vpop.f32.mrf.mxu0  ;;  %v2516_v8 = vld [vmem:[%s7376_s6] sm:$0xf] }
 0x898   :  { %7805 = vst [vmem:[#allocation61_spill] sm:$0xff] %v6722_v7  ;;  %v6724_v22 = vpop.f32.mrf.mxu1  ;;  %v7814_v7 = vld [vmem:[#allocation44_spill] sm:$0xff] }
 0x899   :  { %7806 = vst [vmem:[#allocation64_spill] sm:$0xff] %v6724_v22  ;;  %v6726_v9 = vpop.f32.mrf.mxu0  ;;  %v7815_v22 = vsub.s32 0, %v7814_v7 }
 0x89a   :  { %7807 = vst [vmem:[#allocation66_spill] sm:$0xff] %v6726_v9  ;;  %v6728_v12 = vpop.f32.mrf.mxu1 }
 0x89b   :  { %7808 = vst [vmem:[#allocation67_spill] sm:$0xff] %v6728_v12  ;;  %v6730_v62 = vpop.f32.mrf.mxu0  ;;  %v6745_v21 = vrot.slane %v2516_v8, %v7815_v22 }
 0x89c   :  { %7809 = vst [vmem:[#allocation65_spill] sm:$0xff] %v6730_v62  ;;  %v6732_v15 = vpop.f32.mrf.mxu1 }
 0x89d   :  { %7810 = vst [vmem:[#allocation72_spill] sm:$0xff] %v6732_v15  ;;  %v6734_v24 = vpop.f32.mrf.mxu0  ;;  %7816 = vst [vmem:[#allocation68_spill] sm:$0xff] %v6745_v21  ;;  %v7819_v15 = vsub.s32 1, %v7814_v7  ;;  %v2605_v18 = vadd.f32 %v2604_v16, %v6745_v21 }
 0x89e   :  { %7811 = vst [vmem:[#allocation23_spill] sm:$0xff] %v6734_v24  ;;  %v6736_v19 = vpop.f32.mrf.mxu1 }
 0x89f   :  { %7812 = vst [vmem:[#allocation43_spill] sm:$0xff] %v6736_v19  ;;  %v6741_v44 = vpop.f32.mrf.mxu0  ;;  %v6753_v62 = vrot.slane %v2516_v8, %v7819_v15  ;;  %v7823_v15 = vsub.s32 3, %v7814_v7 }
 0x8a0   :  { %7813 = vst [vmem:[#allocation46_spill] sm:$0xff] %v6741_v44  ;;  %v6747_v9 = vpop.f32.mrf.mxu1 }
 0x8a1   :  { %7817 = vst [vmem:[#allocation70_spill] sm:$0xff] %v6747_v9  ;;  %v2607_v44 = vadd.f32 %v2606_v13, %v6753_v62  ;;  %v6765_v52 = vrot.slane %v2516_v8, %v7823_v15 }
 0x8a3   :  { %7824 = vst [vmem:[#allocation44_spill] sm:$0xff] %v6765_v52  ;;  %v2720_v16 = vadd.f32 %v2719_v23, %v6765_v52 }
 0x925   :  { %v6749_v12 = vpop.f32.mrf.mxu0  ;;  %v6755_v24 = vpop.f32.mrf.mxu1 }
 0x926   :  { %7818 = vst [vmem:[#allocation71_spill] sm:$0xff] %v6749_v12  ;;  %7820 = vst [vmem:[#allocation69_spill] sm:$0xff] %v6755_v24 }
 0x927   :  { %v6757_v19 = vpop.f32.mrf.mxu0  ;;  %v6761_v5 = vpop.f32.mrf.mxu1 }
 0x928   :  { %7821 = vst [vmem:[#allocation47_spill] sm:$0xff] %v6757_v19  ;;  %7822 = vst [vmem:[#allocation45_spill] sm:$0xff] %v6761_v5  ;;  %v7825_v19 = vsub.s32 2, %v7814_v7 }
 0x929   :  { %v2933_v6 = vpop.f32.mrf.mxu0  ;;  %v3004_v12 = vpop.f32.mrf.mxu1 }
 0x92a   :  { %v3009_v22 = vadd.f32 %v2933_v6, %v2605_v18  ;;  %v6770_v13 = vrot.slane %v2516_v8, %v7825_v19 }
 0x92b   :  { %v2935_v25 = vpop.f32.mrf.mxu0  ;;  %v3006_v24 = vpop.f32.mrf.mxu1 }
 0x92c   :  { %v4878_v9 = vmul.f32 -1.442695, %v3009_v22  ;;  %v3010_v14 = vadd.f32 %v2935_v25, %v2607_v44  ;;  %v3012_v5 = vadd.f32 %v3006_v24, %v2720_v16  ;;  %v2718_v6 = vadd.f32 %v2717_v10, %v6770_v13 }
 0x92e   :  { %5096 = vpow2.f32 %v4878_v9  ;;  %v4879_v58 = vmul.f32 -1.442695, %v3010_v14  ;;  %v4880_v18 = vmul.f32 -1.442695, %v3012_v5  ;;  %v3011_v44 = vadd.f32 %v3004_v12, %v2718_v6 }
 0x930   :  { %5098 = vpow2.f32 %v4879_v58 }
 0x931   :  { %5100 = vpow2.f32 %v4880_v18  ;;  %v7849_v18 = vld [vmem:[#allocation44_spill] sm:$0xff] }
 0x93b   :  { %v5097_v25 = vpop.eup %5096 }
 0x93c   :  { %v3016_v9 = vadd.f32 1.0, %v5097_v25  ;;  %v7850_v25 = vld [vmem:[#allocation35_spill] sm:$0xff] }
 0x93d   :  { %v5099_v14 = vpop.eup %5098 }
 0x93e   :  { %5102 = vrcp.f32 %v3016_v9  ;;  %v3022_v22 = vadd.f32 1.0, %v5099_v14  ;;  %v5101_v58 = vpop.eup %5100  ;;  %v7851_v14 = vld [vmem:[#allocation33_spill] sm:$0xff] }
 0x93f   :  { %5104 = vtanh.f32 %v3011_v44  ;;  %v3029_v7 = vadd.f32 1.0, %v5101_v58  ;;  %v2726_v44 = vadd.f32 %v7850_v25, %v7849_v18  ;;  %v6868_v25 = vld [vmem:[#allocation14 + $0x1d8] sm:$0xff] }
 0x940   :  { %5106 = vrcp.f32 %v3022_v22  ;;  %v2724_v22 = vadd.f32 %v7851_v14, %v6770_v13  ;;  %v6878_v14 = vld [vmem:[#allocation14 + $0x1a8] sm:$0xff] }
 0x941   :  { %5108 = vrcp.f32 %v3029_v7 }
 0x94b   :  { %v5103_v15 = vpop.eup %5102 }
 0x94c   :  { %v5105_v23 = vpop.eup %5104 }
 0x94d   :  { %v5107_v52 = vpop.eup %5106  ;;  %v3034_v8 = vmul.f32 %v5105_v23, %v5103_v15 }
 0x94e   :  { %v3033_v19 = vmul.f32 0.0, %v5107_v52  ;;  %v5109_v12 = vpop.eup %5108 }
 0x950   :  { %v6773_v24 = vadd.f32 %v3034_v8, %v3033_v19 }
 0x952   :  { %5110 = vtanh.f32 %v6773_v24 }
 0x95f   :  { %v5111_v5 = vpop.eup %5110 }
 0x960   :  { %v3037_v10 = vmul.f32 %v5111_v5, %v5109_v12 }
 0x962   :  { %3174 = vmatmul.mubr.f32.vlgmr.msra.gmra.mxu0 %v3037_v10  ;;  %3245 = vmatmul.mubr.f32.vlgmr.msra.gmra.mxu1 %v3037_v10 }
 0x963   :  { %3352 = vmatpush1.msra.mxu0 %v6431_v63  ;;  %3423 = vmatpush1.msra.mxu1 %v6433_v26  ;;  %v7826_v63 = vld [vmem:[#allocation48_spill] sm:$0xff]  ;;  %v7827_v26 = vld [vmem:[#allocation50_spill] sm:$0xff] }
 0x964   :  { %3353 = vmatprep.subr.mxu0 %v6437_v17  ;;  %3424 = vmatprep.subr.mxu1 %v6439_v28  ;;  %v7828_v17 = vld [vmem:[#allocation51_spill] sm:$0xff]  ;;  %v7829_v28 = vld [vmem:[#allocation49_spill] sm:$0xff] }
 0x965   :  { %3354 = vmatpush1.msra.mxu0 %v6443_v30  ;;  %3425 = vmatpush1.msra.mxu1 %v6445_v31  ;;  %v7830_v30 = vld [vmem:[#allocation52_spill] sm:$0xff]  ;;  %v7831_v31 = vld [vmem:[#allocation54_spill] sm:$0xff] }
 0x966   :  { %3355 = vmatprep.subr.mxu0 %v6449_v32  ;;  %3426 = vmatprep.subr.mxu1 %v6451_v33  ;;  %v7832_v32 = vld [vmem:[#allocation55_spill] sm:$0xff]  ;;  %v7833_v33 = vld [vmem:[#allocation53_spill] sm:$0xff] }
 0x967   :  { %3356 = vmatpush1.msra.mxu0 %v6455_v34  ;;  %3427 = vmatpush1.msra.mxu1 %v6457_v35  ;;  %v7834_v34 = vld [vmem:[#allocation24_spill] sm:$0xff]  ;;  %v7835_v35 = vld [vmem:[#allocation25_spill] sm:$0xff] }
 0x968   :  { %3357 = vmatprep.subr.mxu0 %v6461_v36  ;;  %3428 = vmatprep.subr.mxu1 %v6463_v37  ;;  %v7836_v36 = vld [vmem:[#allocation56_spill] sm:$0xff]  ;;  %v7837_v37 = vld [vmem:[#allocation58_spill] sm:$0xff] }
 0x969   :  { %3358 = vmatpush1.msra.mxu0 %v6467_v39  ;;  %3429 = vmatpush1.msra.mxu1 %v6469_v40  ;;  %v7838_v39 = vld [vmem:[#allocation59_spill] sm:$0xff]  ;;  %v7839_v40 = vld [vmem:[#allocation57_spill] sm:$0xff] }
 0x96a   :  { %3359 = vmatprep.subr.mxu0 %v6473_v41  ;;  %3430 = vmatprep.subr.mxu1 %v6475_v42  ;;  %v7840_v41 = vld [vmem:[#allocation26_spill] sm:$0xff]  ;;  %v7841_v42 = vld [vmem:[#allocation27_spill] sm:$0xff] }
 0x96b   :  { %3360 = vmatpush1.msra.mxu0 %v6479_v43  ;;  %3431 = vmatpush1.msra.mxu1 %v6481_v46  ;;  %v7842_v43 = vld [vmem:[#allocation28_spill] sm:$0xff]  ;;  %v7843_v46 = vld [vmem:[#allocation29_spill] sm:$0xff] }
 0x96c   :  { %3361 = vmatprep.subr.mxu0 %v6485_v47  ;;  %3432 = vmatprep.subr.mxu1 %v6487_v27  ;;  %v7844_v47 = vld [vmem:[#allocation30_spill] sm:$0xff]  ;;  %v7845_v27 = vmov 0.0  }
 0x96d   :  { %3362 = vmatpush1.msra.mxu0 %v6491_v45  ;;  %3433 = vmatpush1.msra.mxu1 %v6493_v53  ;;  %v7846_v45 = vld [vmem:[#allocation31_spill] sm:$0xff]  ;;  %v7847_v53 = vld [vmem:[#allocation32_spill] sm:$0xff] }
 0x96e   :  { %3363 = vmatprep.subr.mxu0 %v6497_v1  ;;  %3434 = vmatprep.subr.mxu1 %v6499_v38  ;;  %v2611_v1 = vadd.f32 %v7847_v53, %v6745_v21 }
 0x96f   :  { %3364 = vmatpush1.msra.mxu0 %v6503_v20  ;;  %3435 = vmatpush1.msra.mxu1 %v6505_v50  ;;  %v7848_v20 = vld [vmem:[#allocation34_spill] sm:$0xff] }
 0x970   :  { %3365 = vmatprep.subr.mxu0 %v6509_v2  ;;  %3436 = vmatprep.subr.mxu1 %v6511_v59  ;;  %v2613_v50 = vadd.f32 %v7848_v20, %v6753_v62 }
 0x971   :  { %3366 = vmatpush1.msra.mxu0 %v6515_v11  ;;  %3437 = vmatpush1.msra.mxu1 %v6517_v61 }
 0x972   :  { %3367 = vmatprep.subr.mxu0 %v6521_v48  ;;  %3438 = vmatprep.subr.mxu1 %v6523_v54 }
 0x973   :  { %3368 = vmatpush1.msra.mxu0 %v6527_v49  ;;  %3439 = vmatpush1.msra.mxu1 %v6529_v51 }
 0x974   :  { %3369 = vmatprep.subr.mxu0 %v6533_v55  ;;  %3440 = vmatprep.subr.mxu1 %v6535_v29 }
 0x975   :  { %3370 = vmatpush1.msra.mxu0 %v6539_v0  ;;  %3441 = vmatpush1.msra.mxu1 %v6541_v57 }
 0x976   :  { %3371 = vmatprep.subr.mxu0 %v6545_v56  ;;  %3442 = vmatprep.subr.mxu1 %v6547_v60 }
 0x977   :  { %3372 = vmatpush1.msra.mxu0 %v6551_v3  ;;  %3443 = vmatpush1.msra.mxu1 %v6553_v4 }
 0x978   :  { %3373 = vmatprep.subr.mxu0 %v7826_v63  ;;  %3444 = vmatprep.subr.mxu1 %v7827_v26 }
 0x979   :  { %3374 = vmatpush1.msra.mxu0 %v7828_v17  ;;  %3445 = vmatpush1.msra.mxu1 %v7829_v28 }
 0x97a   :  { %3375 = vmatprep.subr.mxu0 %v7830_v30  ;;  %3446 = vmatprep.subr.mxu1 %v7831_v31 }
 0x97b   :  { %3376 = vmatpush1.msra.mxu0 %v7832_v32  ;;  %3447 = vmatpush1.msra.mxu1 %v7833_v33 }
 0x97c   :  { %3377 = vmatprep.subr.mxu0 %v7834_v34  ;;  %3448 = vmatprep.subr.mxu1 %v7835_v35 }
 0x97d   :  { %3378 = vmatpush1.msra.mxu0 %v7836_v36  ;;  %3449 = vmatpush1.msra.mxu1 %v7837_v37 }
 0x97e   :  { %3379 = vmatprep.subr.mxu0 %v7838_v39  ;;  %3450 = vmatprep.subr.mxu1 %v7839_v40 }
 0x97f   :  { %3380 = vmatpush1.msra.mxu0 %v7840_v41  ;;  %3451 = vmatpush1.msra.mxu1 %v7841_v42 }
 0x980   :  { %3381 = vmatprep.subr.mxu0 %v7842_v43  ;;  %3452 = vmatprep.subr.mxu1 %v7843_v46 }
 0x981   :  { %3382 = vmatpush1.msra.mxu0 %v7844_v47  ;;  %3415 = vmatprep.mubr.f32.mxu0 %v7845_v27 }
 0x982   :  { %3453 = vmatpush1.msra.mxu1 %v7846_v45  ;;  %3486 = vmatprep.mubr.f32.mxu1 %v7845_v27 }
 0xa22   :  { %v3175_v38 = vpop.f32.mrf.mxu0  ;;  %v3246_v52 = vpop.f32.mrf.mxu1 }
 0xa23   :  { %v3251_v2 = vadd.f32 %v3175_v38, %v2611_v1  ;;  %v3253_v58 = vadd.f32 %v3246_v52, %v2724_v22  ;;  %v6856_v52 = vld [vmem:[#allocation14 + $0x1f8] sm:$0xff] }
 0xa24   :  { %v3177_v59 = vpop.f32.mrf.mxu0  ;;  %v3248_v6 = vpop.f32.mrf.mxu1  ;;  %7853 = vst [vmem:[#allocation50_spill] sm:$0xff] %v6856_v52  ;;  %3664 = vmatprep.subr.mxu1 %v6856_v52  ;;  %v6880_v22 = vld [vmem:[#allocation14 + $0x1b8] sm:$0xff] }
 0xa25   :  { %v4881_v11 = vmul.f32 -1.442695, %v3251_v2  ;;  %v3252_v61 = vadd.f32 %v3177_v59, %v2613_v50  ;;  %v3254_v9 = vadd.f32 %v3248_v6, %v2726_v44  ;;  %v6866_v6 = vld [vmem:[#allocation14 + $0x1c8] sm:$0xff]  ;;  %v6872_v44 = vld [vmem:[#allocation14 + $0x1c0] sm:$0xff] }
 0xa27   :  { %5112 = vpow2.f32 %v4881_v11  ;;  %v4882_v16 = vmul.f32 -1.442695, %v3252_v61  ;;  %v4883_v15 = vmul.f32 -1.442695, %v3254_v9  ;;  %v6854_v61 = vld [vmem:[#allocation14 + $0x1e8] sm:$0xff]  ;;  %v6874_v9 = vld [vmem:[#allocation14 + $0x1d0] sm:$0xff] }
 0xa28   :  { %7852 = vst [vmem:[#allocation48_spill] sm:$0xff] %v6854_v61  ;;  %3593 = vmatprep.subr.mxu0 %v6854_v61 }
 0xa29   :  { %5114 = vpow2.f32 %v4882_v16  ;;  %v6862_v16 = vld [vmem:[#allocation14 + $0x1f0] sm:$0xff] }
 0xa2a   :  { %5116 = vtanh.f32 %v3253_v58  ;;  %v6884_v58 = vld [vmem:[#allocation14 + $0x1a0] sm:$0xff] }
 0xa2b   :  { %5118 = vpow2.f32 %v4883_v15  ;;  %v6886_v15 = vld [vmem:[#allocation14 + $0x1b0] sm:$0xff] }
 0xa34   :  { %v5113_v23 = vpop.eup %5112 }
 0xa35   :  { %v3258_v7 = vadd.f32 1.0, %v5113_v23  ;;  %v6890_v23 = vld [vmem:[#allocation14 + $0x188] sm:$0xff] }
 0xa36   :  { %v5115_v19 = vpop.eup %5114 }
 0xa37   :  { %5120 = vrcp.f32 %v3258_v7  ;;  %v3264_v8 = vadd.f32 1.0, %v5115_v19  ;;  %v5117_v12 = vpop.eup %5116  ;;  %v6892_v7 = vld [vmem:[#allocation14 + $0x198] sm:$0xff]  ;;  %v6896_v19 = vld [vmem:[#allocation14 + $0x180] sm:$0xff] }
 0xa38   :  { %v5119_v5 = vpop.eup %5118 }
 0xa39   :  { %5122 = vrcp.f32 %v3264_v8  ;;  %v3271_v38 = vadd.f32 1.0, %v5119_v5  ;;  %v6898_v8 = vld [vmem:[#allocation14 + $0x190] sm:$0xff]  ;;  %v6904_v5 = vld [vmem:[#allocation14 + $0x178] sm:$0xff] }
 0xa3b   :  { %5124 = vrcp.f32 %v3271_v38  ;;  %v6916_v38 = vld [vmem:[#allocation14 + $0x158] sm:$0xff] }
 0xa3c   :  { %7856 = vst [vmem:[#allocation52_spill] sm:$0xff] %v6916_v38 }
 0xa44   :  { %v5121_v10 = vpop.eup %5120 }
 0xa45   :  { %v3276_v53 = vmul.f32 %v5121_v10, %v5117_v12  ;;  %v6902_v12 = vld [vmem:[#allocation14 + $0x168] sm:$0xff]  ;;  %v6908_v10 = vld [vmem:[#allocation14 + $0x160] sm:$0xff] }
 0xa46   :  { %v5123_v1 = vpop.eup %5122 }
 0xa47   :  { %v3275_v20 = vmul.f32 %v5123_v1, %v6773_v24  ;;  %v6860_v24 = vld [vmem:[#allocation14 + $0x1e0] sm:$0xff]  ;;  %v6914_v1 = vld [vmem:[#allocation14 + $0x148] sm:$0xff] }
 0xa48   :  { %v5125_v2 = vpop.eup %5124  ;;  %7855 = vst [vmem:[#allocation49_spill] sm:$0xff] %v6914_v1 }
 0xa49   :  { %v6849_v50 = vadd.f32 %v3276_v53, %v3275_v20  ;;  %v6910_v53 = vld [vmem:[#allocation14 + $0x170] sm:$0xff]  ;;  %v6920_v20 = vld [vmem:[#allocation14 + $0x140] sm:$0xff] }
 0xa4a   :  { %7854 = vst [vmem:[#allocation51_spill] sm:$0xff] %v6910_v53  ;;  %7857 = vst [vmem:[#allocation54_spill] sm:$0xff] %v6920_v20 }
 0xa4b   :  { %5126 = vtanh.f32 %v6849_v50 }
 0xa58   :  { %v5127_v59 = vpop.eup %5126 }
 0xa59   :  { %v3279_v11 = vmul.f32 %v5127_v59, %v5125_v2  ;;  %v6922_v2 = vld [vmem:[#allocation14 + $0x150] sm:$0xff]  ;;  %v6926_v59 = vld [vmem:[#allocation14 + $0x128] sm:$0xff] }
 0xa5a   :  { %7858 = vst [vmem:[#allocation55_spill] sm:$0xff] %v6922_v2 }
 0xa5b   :  { %3416 = vmatmul.mubr.f32.vlgmr.msra.gmra.mxu0 %v3279_v11  ;;  %3487 = vmatmul.mubr.f32.vlgmr.msra.gmra.mxu1 %v3279_v11  ;;  %v6928_v11 = vld [vmem:[#allocation14 + $0x138] sm:$0xff] }
 0xa5c   :  { %3657 = vmatprep.mubr.f32.mxu0 %v7845_v27  ;;  %3728 = vmatprep.mubr.f32.mxu1 %v7845_v27  ;;  %v6932_v27 = vld [vmem:[#allocation14 + $0x120] sm:$0xff] }
 0xa5d   :  { %3594 = vmatpush1.msra.mxu0 %v6860_v24  ;;  %3665 = vmatpush1.msra.mxu1 %v6862_v16 }
 0xa5e   :  { %3595 = vmatprep.subr.mxu0 %v6866_v6  ;;  %3666 = vmatprep.subr.mxu1 %v6868_v25 }
 0xa5f   :  { %3596 = vmatpush1.msra.mxu0 %v6872_v44  ;;  %3667 = vmatpush1.msra.mxu1 %v6874_v9 }
 0xa60   :  { %3597 = vmatprep.subr.mxu0 %v6878_v14  ;;  %3668 = vmatprep.subr.mxu1 %v6880_v22 }
 0xa61   :  { %3598 = vmatpush1.msra.mxu0 %v6884_v58  ;;  %3669 = vmatpush1.msra.mxu1 %v6886_v15 }
 0xa62   :  { %3599 = vmatprep.subr.mxu0 %v6890_v23  ;;  %3670 = vmatprep.subr.mxu1 %v6892_v7 }
 0xa63   :  { %3600 = vmatpush1.msra.mxu0 %v6896_v19  ;;  %3671 = vmatpush1.msra.mxu1 %v6898_v8 }
 0xa64   :  { %3601 = vmatprep.subr.mxu0 %v6902_v12  ;;  %3672 = vmatprep.subr.mxu1 %v6904_v5 }
 0xa65   :  { %3602 = vmatpush1.msra.mxu0 %v6908_v10  ;;  %3673 = vmatpush1.msra.mxu1 %v6910_v53  ;;  %v6944_v53 = vld [vmem:[#allocation14 + $0x110] sm:$0xff] }
 0xa66   :  { %3603 = vmatprep.subr.mxu0 %v6914_v1  ;;  %3674 = vmatprep.subr.mxu1 %v6916_v38  ;;  %v6934_v1 = vld [vmem:[#allocation14 + $0x130] sm:$0xff]  ;;  %v6936_v38 = vld [vmem:[#allocation14 + $0x108] sm:$0xff] }
 0xa67   :  { %3604 = vmatpush1.msra.mxu0 %v6920_v20  ;;  %3675 = vmatpush1.msra.mxu1 %v6922_v2  ;;  %v6940_v20 = vld [vmem:[#allocation14 + $0x118] sm:$0xff]  ;;  %v6942_v2 = vld [vmem:[#allocation14 + $0x100] sm:$0xff] }
 0xa68   :  { %3605 = vmatprep.subr.mxu0 %v6926_v59  ;;  %3676 = vmatprep.subr.mxu1 %v6928_v11 }
 0xa69   :  { %3606 = vmatpush1.msra.mxu0 %v6932_v27  ;;  %3677 = vmatpush1.msra.mxu1 %v6934_v1 }
 0xa6a   :  { %3607 = vmatprep.subr.mxu0 %v6936_v38  ;;  %3678 = vmatprep.subr.mxu1 %v6940_v20 }
 0xa6b   :  { %3608 = vmatpush1.msra.mxu0 %v6942_v2  ;;  %3679 = vmatpush1.msra.mxu1 %v6944_v53 }
 0xa6c   :  { %3609 = vmatprep.subr.mxu0 %v6521_v48  ;;  %3680 = vmatprep.subr.mxu1 %v6523_v54  ;;  %v7859_v48 = vld [vmem:[#allocation36_spill] sm:$0xff] }
 0xa6d   :  { %3610 = vmatpush1.msra.mxu0 %v6527_v49  ;;  %3681 = vmatpush1.msra.mxu1 %v6529_v51  ;;  %v2617_v54 = vadd.f32 %v7859_v48, %v6745_v21  ;;  %v7860_v51 = vld [vmem:[#allocation38_spill] sm:$0xff] }
 0xa6e   :  { %3611 = vmatprep.subr.mxu0 %v6533_v55  ;;  %3682 = vmatprep.subr.mxu1 %v6535_v29  ;;  %v2619_v55 = vadd.f32 %v7860_v51, %v6753_v62  ;;  %v7865_v51 = vld [vmem:[#allocation52_spill] sm:$0xff] }
 0xa6f   :  { %3612 = vmatpush1.msra.mxu0 %v6539_v0  ;;  %3683 = vmatpush1.msra.mxu1 %v6541_v57 }
 0xa70   :  { %3613 = vmatprep.subr.mxu0 %v6545_v56  ;;  %3684 = vmatprep.subr.mxu1 %v6547_v60 }
 0xa71   :  { %3614 = vmatpush1.msra.mxu0 %v6551_v3  ;;  %3685 = vmatpush1.msra.mxu1 %v6553_v4 }
 0xa72   :  { %3615 = vmatprep.subr.mxu0 %v7826_v63  ;;  %3686 = vmatprep.subr.mxu1 %v7827_v26  ;;  %v7861_v63 = vld [vmem:[#allocation39_spill] sm:$0xff] }
 0xa73   :  { %3616 = vmatpush1.msra.mxu0 %v7828_v17  ;;  %3687 = vmatpush1.msra.mxu1 %v7829_v28  ;;  %v2732_v26 = vadd.f32 %v7861_v63, %v7849_v18  ;;  %v7862_v28 = vld [vmem:[#allocation37_spill] sm:$0xff] }
 0xa74   :  { %3617 = vmatprep.subr.mxu0 %v7830_v30  ;;  %3688 = vmatprep.subr.mxu1 %v7831_v31  ;;  %v2730_v30 = vadd.f32 %v7862_v28, %v6770_v13  ;;  %v7040_v63 = vld [vmem:[#allocation14 + $0xd8] sm:$0xff]  ;;  %v7048_v28 = vld [vmem:[#allocation14 + $0xa8] sm:$0xff] }
 0xa75   :  { %3618 = vmatpush1.msra.mxu0 %v7832_v32  ;;  %3689 = vmatpush1.msra.mxu1 %v7833_v33 }
 0xa76   :  { %3619 = vmatprep.subr.mxu0 %v7834_v34  ;;  %3690 = vmatprep.subr.mxu1 %v7835_v35 }
 0xa77   :  { %3620 = vmatpush1.msra.mxu0 %v7836_v36  ;;  %3691 = vmatpush1.msra.mxu1 %v7837_v37 }
 0xa78   :  { %3621 = vmatprep.subr.mxu0 %v7838_v39  ;;  %3692 = vmatprep.subr.mxu1 %v7839_v40 }
 0xa79   :  { %3622 = vmatpush1.msra.mxu0 %v7840_v41  ;;  %3693 = vmatpush1.msra.mxu1 %v7841_v42 }
 0xa7a   :  { %3623 = vmatprep.subr.mxu0 %v7842_v43  ;;  %3694 = vmatprep.subr.mxu1 %v7843_v46 }
 0xa7b   :  { %3624 = vmatpush1.msra.mxu0 %v7844_v47  ;;  %3695 = vmatpush1.msra.mxu1 %v7846_v45 }
 0xa7c   :  { %3835 = vmatprep.subr.mxu0 %v6854_v61  ;;  %3906 = vmatprep.subr.mxu1 %v6856_v52 }
 0xb1b   :  { %v3417_v49 = vpop.f32.mrf.mxu0  ;;  %v3488_v60 = vpop.f32.mrf.mxu1 }
 0xb1c   :  { %v3493_v29 = vadd.f32 %v3417_v49, %v2617_v54  ;;  %v3495_v31 = vadd.f32 %v3488_v60, %v2730_v30  ;;  %v7864_v49 = vld [vmem:[#allocation49_spill] sm:$0xff]  ;;  %v7032_v60 = vld [vmem:[#allocation14 + $0xe0] sm:$0xff] }
 0xb1d   :  { %v3419_v0 = vpop.f32.mrf.mxu0  ;;  %v3490_v4 = vpop.f32.mrf.mxu1  ;;  %v7052_v30 = vld [vmem:[#allocation14 + $0xb8] sm:$0xff] }
 0xb1e   :  { %v4884_v57 = vmul.f32 -1.442695, %v3493_v29  ;;  %v3494_v56 = vadd.f32 %v3419_v0, %v2619_v55  ;;  %v3496_v17 = vadd.f32 %v3490_v4, %v2732_v26  ;;  %v7866_v55 = vld [vmem:[#allocation54_spill] sm:$0xff]  ;;  %v7867_v29 = vld [vmem:[#allocation55_spill] sm:$0xff]  ;;  %v7868_v0 = vmov 0.0  }
 0xb1f   :  { %v7038_v4 = vld [vmem:[#allocation14 + $0xc8] sm:$0xff]  ;;  %v7044_v26 = vld [vmem:[#allocation14 + $0xc0] sm:$0xff] }
 0xb20   :  { %5128 = vpow2.f32 %v4884_v57  ;;  %v4885_v3 = vmul.f32 -1.442695, %v3494_v56  ;;  %v4886_v32 = vmul.f32 -1.442695, %v3496_v17  ;;  %v7028_v57 = vld [vmem:[#allocation14 + $0xe8] sm:$0xff]  ;;  %v7030_v56 = vld [vmem:[#allocation14 + $0xf8] sm:$0xff] }
 0xb21   :  { %v7046_v17 = vld [vmem:[#allocation14 + $0xd0] sm:$0xff] }
 0xb22   :  { %5130 = vpow2.f32 %v4885_v3  ;;  %v7036_v3 = vld [vmem:[#allocation14 + $0xf0] sm:$0xff] }
 0xb23   :  { %5132 = vtanh.f32 %v3495_v31  ;;  %v7054_v31 = vld [vmem:[#allocation14 + $0xa0] sm:$0xff] }
 0xb24   :  { %5134 = vpow2.f32 %v4886_v32  ;;  %v7056_v32 = vld [vmem:[#allocation14 + $0xb0] sm:$0xff] }
 0xb25   :  { %7869 = vst [vmem:[#allocation53_spill] sm:$0xff] %v7056_v32 }
 0xb2d   :  { %v5129_v33 = vpop.eup %5128 }
 0xb2e   :  { %v3500_v34 = vadd.f32 1.0, %v5129_v33  ;;  %v7060_v33 = vld [vmem:[#allocation14 + $0x88] sm:$0xff] }
 0xb2f   :  { %v5131_v35 = vpop.eup %5130  ;;  %7870 = vst [vmem:[#allocation24_spill] sm:$0xff] %v7060_v33 }
 0xb30   :  { %5136 = vrcp.f32 %v3500_v34  ;;  %v3506_v36 = vadd.f32 1.0, %v5131_v35  ;;  %v5133_v37 = vpop.eup %5132  ;;  %v7062_v34 = vld [vmem:[#allocation14 + $0x98] sm:$0xff]  ;;  %v7066_v35 = vld [vmem:[#allocation14 + $0x80] sm:$0xff] }
 0xb31   :  { %v5135_v39 = vpop.eup %5134  ;;  %7871 = vst [vmem:[#allocation25_spill] sm:$0xff] %v7062_v34  ;;  %7872 = vst [vmem:[#allocation56_spill] sm:$0xff] %v7066_v35 }
 0xb32   :  { %5138 = vrcp.f32 %v3506_v36  ;;  %v3513_v43 = vadd.f32 1.0, %v5135_v39  ;;  %v7068_v36 = vld [vmem:[#allocation14 + $0x90] sm:$0xff]  ;;  %v7074_v39 = vld [vmem:[#allocation14 + $0x78] sm:$0xff] }
 0xb33   :  { %7873 = vst [vmem:[#allocation58_spill] sm:$0xff] %v7068_v36  ;;  %7875 = vst [vmem:[#allocation57_spill] sm:$0xff] %v7074_v39 }
 0xb34   :  { %5140 = vrcp.f32 %v3513_v43  ;;  %v7086_v43 = vld [vmem:[#allocation14 + $0x58] sm:$0xff] }
 0xb35   :  { %7879 = vst [vmem:[#allocation29_spill] sm:$0xff] %v7086_v43 }
 0xb3d   :  { %v5137_v40 = vpop.eup %5136 }
 0xb3e   :  { %v3518_v41 = vmul.f32 %v5137_v40, %v5133_v37  ;;  %v7072_v37 = vld [vmem:[#allocation14 + $0x68] sm:$0xff]  ;;  %v7078_v40 = vld [vmem:[#allocation14 + $0x60] sm:$0xff] }
 0xb3f   :  { %v5139_v42 = vpop.eup %5138  ;;  %7874 = vst [vmem:[#allocation59_spill] sm:$0xff] %v7072_v37  ;;  %7876 = vst [vmem:[#allocation26_spill] sm:$0xff] %v7078_v40 }
 0xb40   :  { %v3517_v46 = vmul.f32 %v5139_v42, %v6849_v50  ;;  %v7863_v50 = vld [vmem:[#allocation51_spill] sm:$0xff] }
 0xb41   :  { %v5141_v45 = vpop.eup %5140  ;;  %v7084_v42 = vld [vmem:[#allocation14 + $0x48] sm:$0xff] }
 0xb42   :  { %v6993_v47 = vadd.f32 %v3518_v41, %v3517_v46  ;;  %v7080_v41 = vld [vmem:[#allocation14 + $0x70] sm:$0xff]  ;;  %7878 = vst [vmem:[#allocation28_spill] sm:$0xff] %v7084_v42  ;;  %v7090_v46 = vld [vmem:[#allocation14 + $0x40] sm:$0xff] }
 0xb43   :  { %7877 = vst [vmem:[#allocation27_spill] sm:$0xff] %v7080_v41  ;;  %7880 = vst [vmem:[#allocation30_spill] sm:$0xff] %v7090_v46 }
 0xb44   :  { %5142 = vtanh.f32 %v6993_v47 }
 0xb51   :  { %v5143_v48 = vpop.eup %5142 }
 0xb52   :  { %v3521_v54 = vmul.f32 %v5143_v48, %v5141_v45  ;;  %v7092_v45 = vld [vmem:[#allocation14 + $0x50] sm:$0xff]  ;;  %v7096_v48 = vld [vmem:[#allocation14 + $0x28] sm:$0xff] }
 0xb53   :  { %7881 = vst [vmem:[#allocation31_spill] sm:$0xff] %v7092_v45  ;;  %7882 = vst [vmem:[#allocation32_spill] sm:$0xff] %v7096_v48 }
 0xb54   :  { %3658 = vmatmul.mubr.f32.vlgmr.msra.gmra.mxu0 %v3521_v54  ;;  %3729 = vmatmul.mubr.f32.vlgmr.msra.gmra.mxu1 %v3521_v54  ;;  %v7098_v54 = vld [vmem:[#allocation14 + $0x38] sm:$0xff] }
 0xb55   :  { %3836 = vmatpush1.msra.mxu0 %v6860_v24  ;;  %3907 = vmatpush1.msra.mxu1 %v6862_v16  ;;  %7883 = vst [vmem:[#allocation34_spill] sm:$0xff] %v7098_v54 }
 0xb56   :  { %3837 = vmatprep.subr.mxu0 %v6866_v6  ;;  %3908 = vmatprep.subr.mxu1 %v6868_v25 }
 0xb57   :  { %3838 = vmatpush1.msra.mxu0 %v6872_v44  ;;  %3909 = vmatpush1.msra.mxu1 %v6874_v9 }
 0xb58   :  { %3839 = vmatprep.subr.mxu0 %v6878_v14  ;;  %3910 = vmatprep.subr.mxu1 %v6880_v22 }
 0xb59   :  { %3840 = vmatpush1.msra.mxu0 %v6884_v58  ;;  %3911 = vmatpush1.msra.mxu1 %v6886_v15 }
 0xb5a   :  { %3841 = vmatprep.subr.mxu0 %v6890_v23  ;;  %3912 = vmatprep.subr.mxu1 %v6892_v7 }
 0xb5b   :  { %3842 = vmatpush1.msra.mxu0 %v6896_v19  ;;  %3913 = vmatpush1.msra.mxu1 %v6898_v8 }
 0xb5c   :  { %3843 = vmatprep.subr.mxu0 %v6902_v12  ;;  %3914 = vmatprep.subr.mxu1 %v6904_v5 }
 0xb5d   :  { %3844 = vmatpush1.msra.mxu0 %v6908_v10  ;;  %3915 = vmatpush1.msra.mxu1 %v7863_v50 }
 0xb5e   :  { %3845 = vmatprep.subr.mxu0 %v7864_v49  ;;  %3916 = vmatprep.subr.mxu1 %v7865_v51 }
 0xb5f   :  { %3846 = vmatpush1.msra.mxu0 %v7866_v55  ;;  %3917 = vmatpush1.msra.mxu1 %v7867_v29 }
 0xb60   :  { %3847 = vmatprep.subr.mxu0 %v6926_v59  ;;  %3918 = vmatprep.subr.mxu1 %v6928_v11 }
 0xb61   :  { %3848 = vmatpush1.msra.mxu0 %v6932_v27  ;;  %3919 = vmatpush1.msra.mxu1 %v6934_v1 }
 0xb62   :  { %3849 = vmatprep.subr.mxu0 %v6936_v38  ;;  %3920 = vmatprep.subr.mxu1 %v6940_v20 }
 0xb63   :  { %3850 = vmatpush1.msra.mxu0 %v6942_v2  ;;  %3921 = vmatpush1.msra.mxu1 %v6944_v53 }
 0xb64   :  { %3899 = vmatprep.mubr.f32.mxu0 %v7868_v0  ;;  %3970 = vmatprep.mubr.f32.mxu1 %v7868_v0  ;;  %v7102_v0 = vld [vmem:[#allocation14 + $0x20] sm:$0xff] }
 0xb65   :  { %3851 = vmatprep.subr.mxu0 %v7028_v57  ;;  %3922 = vmatprep.subr.mxu1 %v7030_v56  ;;  %7884 = vst [vmem:[#allocation44_spill] sm:$0xff] %v7102_v0 }
 0xb66   :  { %3852 = vmatpush1.msra.mxu0 %v7032_v60  ;;  %3923 = vmatpush1.msra.mxu1 %v7036_v3 }
 0xb67   :  { %3853 = vmatprep.subr.mxu0 %v7038_v4  ;;  %3924 = vmatprep.subr.mxu1 %v7040_v63 }
 0xb68   :  { %3854 = vmatpush1.msra.mxu0 %v7044_v26  ;;  %3925 = vmatpush1.msra.mxu1 %v7046_v17 }
 0xb69   :  { %3855 = vmatprep.subr.mxu0 %v7048_v28  ;;  %3926 = vmatprep.subr.mxu1 %v7052_v30 }
 0xb6a   :  { %3856 = vmatpush1.msra.mxu0 %v7054_v31  ;;  %3927 = vmatpush1.msra.mxu1 %v7056_v32 }
 0xb6b   :  { %3857 = vmatprep.subr.mxu0 %v7060_v33  ;;  %3928 = vmatprep.subr.mxu1 %v7062_v34  ;;  %v7893_v34 = vld [vmem:[#allocation41_spill] sm:$0xff] }
 0xb6c   :  { %3858 = vmatpush1.msra.mxu0 %v7066_v35  ;;  %3929 = vmatpush1.msra.mxu1 %v7068_v36 }
 0xb6d   :  { %3859 = vmatprep.subr.mxu0 %v7072_v37  ;;  %3930 = vmatprep.subr.mxu1 %v7074_v39  ;;  %v7104_v37 = vld [vmem:[#allocation14 + $0x30] sm:$0xff]  ;;  %v7108_v39 = vld [vmem:[#allocation14 + $0x8] sm:$0xff] }
 0xb6e   :  { %3860 = vmatpush1.msra.mxu0 %v7078_v40  ;;  %3931 = vmatpush1.msra.mxu1 %v7080_v41  ;;  %7885 = vst [vmem:[#allocation35_spill] sm:$0xff] %v7104_v37  ;;  %7886 = vst [vmem:[#allocation33_spill] sm:$0xff] %v7108_v39  ;;  %v7110_v40 = vld [vmem:[#allocation14 + $0x18] sm:$0xff]  ;;  %v7114_v41 = vld [vmem:[#allocation14] sm:$0xff] }
 0xb6f   :  { %3861 = vmatprep.subr.mxu0 %v7084_v42  ;;  %3932 = vmatprep.subr.mxu1 %v7086_v43  ;;  %7887 = vst [vmem:[#allocation36_spill] sm:$0xff] %v7110_v40  ;;  %7888 = vst [vmem:[#allocation38_spill] sm:$0xff] %v7114_v41  ;;  %v7116_v42 = vld [vmem:[#allocation14 + $0x10] sm:$0xff] }
 0xb70   :  { %3862 = vmatpush1.msra.mxu0 %v7090_v46  ;;  %3933 = vmatpush1.msra.mxu1 %v7092_v45  ;;  %7889 = vst [vmem:[#allocation39_spill] sm:$0xff] %v7116_v42 }
 0xb71   :  { %3863 = vmatprep.subr.mxu0 %v7096_v48  ;;  %3934 = vmatprep.subr.mxu1 %v7098_v54  ;;  %v7890_v54 = vld [vmem:[#allocation40_spill] sm:$0xff] }
 0xb72   :  { %3864 = vmatpush1.msra.mxu0 %v7102_v0  ;;  %3935 = vmatpush1.msra.mxu1 %v7104_v37  ;;  %v2623_v48 = vadd.f32 %v7890_v54, %v6745_v21  ;;  %v7891_v0 = vld [vmem:[#allocation42_spill] sm:$0xff]  ;;  %v2736_v54 = vadd.f32 %v7893_v34, %v6770_v13  ;;  %v7896_v34 = vld [vmem:[#allocation25_spill] sm:$0xff] }
 0xb73   :  { %3865 = vmatprep.subr.mxu0 %v7108_v39  ;;  %3936 = vmatprep.subr.mxu1 %v7110_v40  ;;  %v2625_v46 = vadd.f32 %v7891_v0, %v6753_v62 }
 0xb74   :  { %3866 = vmatpush1.msra.mxu0 %v7114_v41  ;;  %3937 = vmatpush1.msra.mxu1 %v7116_v42 }
 0xb75   :  { %4077 = vmatprep.subr.mxu0 %v6854_v61  ;;  %4148 = vmatprep.subr.mxu1 %v6856_v52  ;;  %v7892_v61 = vld [vmem:[#allocation60_spill] sm:$0xff] }
 0xb76   :  { %v2738_v35 = vadd.f32 %v7892_v61, %v7849_v18 }
 0xc14   :  { %v3659_v45 = vpop.f32.mrf.mxu0  ;;  %v3730_v40 = vpop.f32.mrf.mxu1 }
 0xc15   :  { %v3735_v37 = vadd.f32 %v3659_v45, %v2623_v48  ;;  %v3737_v21 = vadd.f32 %v3730_v40, %v2736_v54  ;;  %v7897_v40 = vld [vmem:[#allocation56_spill] sm:$0xff]  ;;  %v7898_v48 = vld [vmem:[#allocation58_spill] sm:$0xff]  ;;  %v7899_v54 = vld [vmem:[#allocation59_spill] sm:$0xff] }
 0xc16   :  { %v3661_v43 = vpop.f32.mrf.mxu0  ;;  %v3732_v42 = vpop.f32.mrf.mxu1 }
 0xc17   :  { %v4887_v39 = vmul.f32 -1.442695, %v3735_v37  ;;  %v3736_v36 = vadd.f32 %v3661_v43, %v2625_v46  ;;  %v3738_v52 = vadd.f32 %v3732_v42, %v2738_v35 }
 0xc19   :  { %5144 = vpow2.f32 %v4887_v39  ;;  %v4888_v41 = vmul.f32 -1.442695, %v3736_v36  ;;  %v4889_v33 = vmul.f32 -1.442695, %v3738_v52 }
 0xc1b   :  { %5146 = vpow2.f32 %v4888_v41 }
 0xc1c   :  { %5148 = vtanh.f32 %v3737_v21 }
 0xc1d   :  { %5150 = vpow2.f32 %v4889_v33  ;;  %v7895_v33 = vld [vmem:[#allocation24_spill] sm:$0xff] }
 0xc26   :  { %v5145_v32 = vpop.eup %5144 }
 0xc27   :  { %v3742_v0 = vadd.f32 1.0, %v5145_v32 }
 0xc28   :  { %v5147_v45 = vpop.eup %5146 }
 0xc29   :  { %5152 = vrcp.f32 %v3742_v0  ;;  %v3748_v37 = vadd.f32 1.0, %v5147_v45  ;;  %v5149_v36 = vpop.eup %5148  ;;  %v7900_v0 = vld [vmem:[#allocation57_spill] sm:$0xff]  ;;  %v7901_v45 = vld [vmem:[#allocation26_spill] sm:$0xff] }
 0xc2a   :  { %v5151_v39 = vpop.eup %5150 }
 0xc2b   :  { %5154 = vrcp.f32 %v3748_v37  ;;  %v3755_v61 = vadd.f32 1.0, %v5151_v39  ;;  %v7902_v37 = vld [vmem:[#allocation27_spill] sm:$0xff]  ;;  %v7904_v39 = vld [vmem:[#allocation29_spill] sm:$0xff] }
 0xc2d   :  { %5156 = vrcp.f32 %v3755_v61  ;;  %v7908_v61 = vld [vmem:[#allocation34_spill] sm:$0xff] }
 0xc36   :  { %v5153_v41 = vpop.eup %5152 }
 0xc37   :  { %v3760_v43 = vmul.f32 %v5153_v41, %v5149_v36  ;;  %v7903_v36 = vld [vmem:[#allocation28_spill] sm:$0xff]  ;;  %v7905_v41 = vld [vmem:[#allocation30_spill] sm:$0xff] }
 0xc38   :  { %v5155_v46 = vpop.eup %5154 }
 0xc39   :  { %v3759_v35 = vmul.f32 %v5155_v46, %v6993_v47  ;;  %v7894_v47 = vld [vmem:[#allocation53_spill] sm:$0xff]  ;;  %v7907_v46 = vld [vmem:[#allocation32_spill] sm:$0xff] }
 0xc3a   :  { %v5157_v52 = vpop.eup %5156 }
 0xc3b   :  { %v7135_v42 = vadd.f32 %v3760_v43, %v3759_v35  ;;  %v7906_v43 = vld [vmem:[#allocation31_spill] sm:$0xff]  ;;  %v7909_v35 = vld [vmem:[#allocation44_spill] sm:$0xff] }
 0xc3d   :  { %5158 = vtanh.f32 %v7135_v42 }
 0xc4a   :  { %v5159_v21 = vpop.eup %5158 }
 0xc4b   :  { %v3763_v32 = vmul.f32 %v5159_v21, %v5157_v52  ;;  %v7910_v52 = vld [vmem:[#allocation35_spill] sm:$0xff]  ;;  %v7911_v21 = vld [vmem:[#allocation33_spill] sm:$0xff] }
 0xc4d   :  { %3900 = vmatmul.mubr.f32.vlgmr.msra.gmra.mxu0 %v3763_v32  ;;  %3971 = vmatmul.mubr.f32.vlgmr.msra.gmra.mxu1 %v3763_v32  ;;  %v7912_v32 = vld [vmem:[#allocation36_spill] sm:$0xff] }
 0xc4e   :  { %4078 = vmatpush1.msra.mxu0 %v6860_v24  ;;  %4149 = vmatpush1.msra.mxu1 %v6862_v16 }
 0xc4f   :  { %4079 = vmatprep.subr.mxu0 %v6866_v6  ;;  %4150 = vmatprep.subr.mxu1 %v6868_v25 }
 0xc50   :  { %4080 = vmatpush1.msra.mxu0 %v6872_v44  ;;  %4151 = vmatpush1.msra.mxu1 %v6874_v9 }
 0xc51   :  { %4081 = vmatprep.subr.mxu0 %v6878_v14  ;;  %4152 = vmatprep.subr.mxu1 %v6880_v22 }
 0xc52   :  { %4082 = vmatpush1.msra.mxu0 %v6884_v58  ;;  %4153 = vmatpush1.msra.mxu1 %v6886_v15 }
 0xc53   :  { %4083 = vmatprep.subr.mxu0 %v6890_v23  ;;  %4154 = vmatprep.subr.mxu1 %v6892_v7 }
 0xc54   :  { %4084 = vmatpush1.msra.mxu0 %v6896_v19  ;;  %4155 = vmatpush1.msra.mxu1 %v6898_v8 }
 0xc55   :  { %4085 = vmatprep.subr.mxu0 %v6902_v12  ;;  %4156 = vmatprep.subr.mxu1 %v6904_v5 }
 0xc56   :  { %4086 = vmatpush1.msra.mxu0 %v6908_v10  ;;  %4157 = vmatpush1.msra.mxu1 %v7863_v50 }
 0xc57   :  { %4087 = vmatprep.subr.mxu0 %v7864_v49  ;;  %4158 = vmatprep.subr.mxu1 %v7865_v51 }
 0xc58   :  { %4088 = vmatpush1.msra.mxu0 %v7866_v55  ;;  %4159 = vmatpush1.msra.mxu1 %v7867_v29 }
 0xc59   :  { %4089 = vmatprep.subr.mxu0 %v6926_v59  ;;  %4160 = vmatprep.subr.mxu1 %v6928_v11 }
 0xc5a   :  { %4090 = vmatpush1.msra.mxu0 %v6932_v27  ;;  %4161 = vmatpush1.msra.mxu1 %v6934_v1 }
 0xc5b   :  { %4091 = vmatprep.subr.mxu0 %v6936_v38  ;;  %4162 = vmatprep.subr.mxu1 %v6940_v20 }
 0xc5c   :  { %4092 = vmatpush1.msra.mxu0 %v6942_v2  ;;  %4163 = vmatpush1.msra.mxu1 %v6944_v53 }
 0xc5d   :  { %4093 = vmatprep.subr.mxu0 %v7028_v57  ;;  %4164 = vmatprep.subr.mxu1 %v7030_v56 }
 0xc5e   :  { %4094 = vmatpush1.msra.mxu0 %v7032_v60  ;;  %4165 = vmatpush1.msra.mxu1 %v7036_v3 }
 0xc5f   :  { %4095 = vmatprep.subr.mxu0 %v7038_v4  ;;  %4166 = vmatprep.subr.mxu1 %v7040_v63 }
 0xc60   :  { %4096 = vmatpush1.msra.mxu0 %v7044_v26  ;;  %4167 = vmatpush1.msra.mxu1 %v7046_v17 }
 0xc61   :  { %4097 = vmatprep.subr.mxu0 %v7048_v28  ;;  %4168 = vmatprep.subr.mxu1 %v7052_v30 }
 0xc62   :  { %4098 = vmatpush1.msra.mxu0 %v7054_v31  ;;  %4169 = vmatpush1.msra.mxu1 %v7894_v47 }
 0xc63   :  { %4099 = vmatprep.subr.mxu0 %v7895_v33  ;;  %4170 = vmatprep.subr.mxu1 %v7896_v34  ;;  %v7922_v34 = vld [vmem:[#allocation63_spill] sm:$0xff] }
 0xc64   :  { %4100 = vmatpush1.msra.mxu0 %v7897_v40  ;;  %4171 = vmatpush1.msra.mxu1 %v7898_v48 }
 0xc65   :  { %4101 = vmatprep.subr.mxu0 %v7899_v54  ;;  %4172 = vmatprep.subr.mxu1 %v7900_v0 }
 0xc66   :  { %4102 = vmatpush1.msra.mxu0 %v7901_v45  ;;  %4173 = vmatpush1.msra.mxu1 %v7902_v37  ;;  %v7913_v37 = vld [vmem:[#allocation38_spill] sm:$0xff] }
 0xc67   :  { %4103 = vmatprep.subr.mxu0 %v7903_v36  ;;  %4174 = vmatprep.subr.mxu1 %v7904_v39  ;;  %v7914_v36 = vmov 0.0   ;;  %v7915_v39 = vld [vmem:[#allocation39_spill] sm:$0xff] }
 0xc68   :  { %4104 = vmatpush1.msra.mxu0 %v7905_v41  ;;  %4175 = vmatpush1.msra.mxu1 %v7906_v43  ;;  %v7916_v43 = vld [vmem:[#allocation48_spill] sm:$0xff] }
 0xc69   :  { %4105 = vmatprep.subr.mxu0 %v7907_v46  ;;  %4176 = vmatprep.subr.mxu1 %v7908_v61  ;;  %v7917_v46 = vld [vmem:[#allocation50_spill] sm:$0xff]  ;;  %v7918_v61 = vld [vmem:[#allocation68_spill] sm:$0xff] }
 0xc6a   :  { %4106 = vmatpush1.msra.mxu0 %v7909_v35  ;;  %4177 = vmatpush1.msra.mxu1 %v7910_v52  ;;  %v7919_v35 = vld [vmem:[#allocation62_spill] sm:$0xff] }
 0xc6b   :  { %4107 = vmatprep.subr.mxu0 %v7911_v21  ;;  %4178 = vmatprep.subr.mxu1 %v7912_v32  ;;  %v2629_v41 = vadd.f32 %v7919_v35, %v7918_v61  ;;  %v7920_v21 = vld [vmem:[#allocation61_spill] sm:$0xff]  ;;  %v2742_v35 = vadd.f32 %v7922_v34, %v6770_v13 }
 0xc6c   :  { %4108 = vmatpush1.msra.mxu0 %v7913_v37  ;;  %4141 = vmatprep.mubr.f32.mxu0 %v7914_v36  ;;  %v2631_v45 = vadd.f32 %v7920_v21, %v6753_v62 }
 0xc6d   :  { %4179 = vmatpush1.msra.mxu1 %v7915_v39  ;;  %4212 = vmatprep.mubr.f32.mxu1 %v7914_v36 }
 0xc6e   :  { %4319 = vmatprep.subr.mxu0 %v7916_v43  ;;  %4390 = vmatprep.subr.mxu1 %v7917_v46  ;;  %v7921_v43 = vld [vmem:[#allocation64_spill] sm:$0xff] }
 0xc6f   :  { %v2744_v40 = vadd.f32 %v7921_v43, %v7849_v18 }
 0xd0d   :  { %v3901_v52 = vpop.f32.mrf.mxu0  ;;  %v3972_v48 = vpop.f32.mrf.mxu1 }
 0xd0e   :  { %v3977_v32 = vadd.f32 %v3901_v52, %v2629_v41  ;;  %v3979_v61 = vadd.f32 %v3972_v48, %v2742_v35  ;;  %v7948_v35 = vld [vmem:[#allocation72_spill] sm:$0xff] }
 0xd0f   :  { %v3903_v0 = vpop.f32.mrf.mxu0  ;;  %v3974_v36 = vpop.f32.mrf.mxu1 }
 0xd10   :  { %v4890_v37 = vmul.f32 -1.442695, %v3977_v32  ;;  %v3978_v54 = vadd.f32 %v3903_v0, %v2631_v45  ;;  %v3980_v46 = vadd.f32 %v3974_v36, %v2744_v40 }
 0xd12   :  { %5160 = vpow2.f32 %v4890_v37  ;;  %v4891_v39 = vmul.f32 -1.442695, %v3978_v54  ;;  %v4892_v33 = vmul.f32 -1.442695, %v3980_v46 }
 0xd14   :  { %5162 = vpow2.f32 %v4891_v39 }
 0xd15   :  { %5164 = vtanh.f32 %v3979_v61 }
 0xd16   :  { %5166 = vpow2.f32 %v4892_v33 }
 0xd1f   :  { %v5161_v47 = vpop.eup %5160 }
 0xd20   :  { %v3984_v21 = vadd.f32 1.0, %v5161_v47 }
 0xd21   :  { %v5163_v41 = vpop.eup %5162 }
 0xd22   :  { %5168 = vrcp.f32 %v3984_v21  ;;  %v3990_v0 = vadd.f32 1.0, %v5163_v41  ;;  %v5165_v54 = vpop.eup %5164  ;;  %v2750_v21 = vadd.f32 %v7948_v35, %v7849_v18  ;;  %v4556_v35 = vld [vmem:[#allocation14 + $0x1d8] sm:$0xff] }
 0xd23   :  { %v5167_v45 = vpop.eup %5166 }
 0xd24   :  { %5170 = vrcp.f32 %v3990_v0  ;;  %v3997_v32 = vadd.f32 1.0, %v5167_v45  ;;  %v7949_v0 = vld [vmem:[#allocation67_spill] sm:$0xff] }
 0xd26   :  { %5172 = vrcp.f32 %v3997_v32 }
 0xd2f   :  { %v5169_v37 = vpop.eup %5168 }
 0xd30   :  { %v4002_v39 = vmul.f32 %v5169_v37, %v5165_v54  ;;  %v2748_v54 = vadd.f32 %v7949_v0, %v6770_v13  ;;  %v4550_v0 = vld [vmem:[#allocation14 + $0x1a8] sm:$0xff] }
 0xd31   :  { %v5171_v52 = vpop.eup %5170 }
 0xd32   :  { %v4001_v40 = vmul.f32 %v5171_v52, %v7135_v42 }
 0xd33   :  { %v5173_v47 = vpop.eup %5172 }
 0xd34   :  { %v7213_v36 = vadd.f32 %v4002_v39, %v4001_v40 }
 0xd36   :  { %5174 = vtanh.f32 %v7213_v36 }
 0xd43   :  { %v5175_v34 = vpop.eup %5174 }
 0xd44   :  { %v4005_v48 = vmul.f32 %v5175_v34, %v5173_v47 }
 0xd46   :  { %4142 = vmatmul.mubr.f32.vlgmr.msra.gmra.mxu0 %v4005_v48  ;;  %4213 = vmatmul.mubr.f32.vlgmr.msra.gmra.mxu1 %v4005_v48 }
 0xd47   :  { %4320 = vmatpush1.msra.mxu0 %v6860_v24  ;;  %4391 = vmatpush1.msra.mxu1 %v6862_v16  ;;  %v7924_v24 = vld [vmem:[#allocation24_spill] sm:$0xff]  ;;  %v7925_v16 = vld [vmem:[#allocation25_spill] sm:$0xff] }
 0xd48   :  { %4321 = vmatprep.subr.mxu0 %v6866_v6  ;;  %4392 = vmatprep.subr.mxu1 %v6868_v25  ;;  %v7926_v6 = vld [vmem:[#allocation56_spill] sm:$0xff]  ;;  %v7927_v25 = vld [vmem:[#allocation58_spill] sm:$0xff] }
 0xd49   :  { %4322 = vmatpush1.msra.mxu0 %v6872_v44  ;;  %4393 = vmatpush1.msra.mxu1 %v6874_v9  ;;  %v7928_v44 = vld [vmem:[#allocation59_spill] sm:$0xff]  ;;  %v7929_v9 = vld [vmem:[#allocation57_spill] sm:$0xff] }
 0xd4a   :  { %4323 = vmatprep.subr.mxu0 %v6878_v14  ;;  %4394 = vmatprep.subr.mxu1 %v6880_v22  ;;  %v7930_v14 = vld [vmem:[#allocation26_spill] sm:$0xff]  ;;  %v7931_v22 = vld [vmem:[#allocation27_spill] sm:$0xff] }
 0xd4b   :  { %4324 = vmatpush1.msra.mxu0 %v6884_v58  ;;  %4395 = vmatpush1.msra.mxu1 %v6886_v15  ;;  %v7932_v58 = vld [vmem:[#allocation28_spill] sm:$0xff]  ;;  %v7933_v15 = vld [vmem:[#allocation29_spill] sm:$0xff] }
 0xd4c   :  { %4325 = vmatprep.subr.mxu0 %v6890_v23  ;;  %4396 = vmatprep.subr.mxu1 %v6892_v7  ;;  %v7934_v23 = vld [vmem:[#allocation30_spill] sm:$0xff]  ;;  %v7935_v7 = vld [vmem:[#allocation31_spill] sm:$0xff] }
 0xd4d   :  { %4326 = vmatpush1.msra.mxu0 %v6896_v19  ;;  %4397 = vmatpush1.msra.mxu1 %v6898_v8  ;;  %v7936_v19 = vld [vmem:[#allocation32_spill] sm:$0xff]  ;;  %v7937_v8 = vld [vmem:[#allocation34_spill] sm:$0xff] }
 0xd4e   :  { %4327 = vmatprep.subr.mxu0 %v6902_v12  ;;  %4398 = vmatprep.subr.mxu1 %v6904_v5  ;;  %v7938_v12 = vld [vmem:[#allocation44_spill] sm:$0xff]  ;;  %v7939_v5 = vld [vmem:[#allocation35_spill] sm:$0xff] }
 0xd4f   :  { %4328 = vmatpush1.msra.mxu0 %v6908_v10  ;;  %4399 = vmatpush1.msra.mxu1 %v7863_v50  ;;  %v7940_v10 = vld [vmem:[#allocation33_spill] sm:$0xff] }
 0xd50   :  { %4329 = vmatprep.subr.mxu0 %v7864_v49  ;;  %4400 = vmatprep.subr.mxu1 %v7865_v51  ;;  %v7947_v49 = vld [vmem:[#allocation65_spill] sm:$0xff] }
 0xd51   :  { %4330 = vmatpush1.msra.mxu0 %v7866_v55  ;;  %4401 = vmatpush1.msra.mxu1 %v7867_v29  ;;  %v2637_v51 = vadd.f32 %v7947_v49, %v6753_v62 }
 0xd52   :  { %4331 = vmatprep.subr.mxu0 %v6926_v59  ;;  %4402 = vmatprep.subr.mxu1 %v6928_v11  ;;  %v7946_v59 = vld [vmem:[#allocation66_spill] sm:$0xff] }
 0xd53   :  { %4332 = vmatpush1.msra.mxu0 %v6932_v27  ;;  %4403 = vmatpush1.msra.mxu1 %v6934_v1  ;;  %v7923_v27 = vld [vmem:[#allocation53_spill] sm:$0xff]  ;;  %v7942_v1 = vld [vmem:[#allocation38_spill] sm:$0xff] }
 0xd54   :  { %4333 = vmatprep.subr.mxu0 %v6936_v38  ;;  %4404 = vmatprep.subr.mxu1 %v6940_v20  ;;  %v7943_v38 = vmov 0.0   ;;  %v7944_v20 = vld [vmem:[#allocation39_spill] sm:$0xff] }
 0xd55   :  { %4334 = vmatpush1.msra.mxu0 %v6942_v2  ;;  %4405 = vmatpush1.msra.mxu1 %v6944_v53  ;;  %v7941_v53 = vld [vmem:[#allocation36_spill] sm:$0xff] }
 0xd56   :  { %4335 = vmatprep.subr.mxu0 %v7028_v57  ;;  %4406 = vmatprep.subr.mxu1 %v7030_v56  ;;  %v7945_v2 = vld [vmem:[#allocation68_spill] sm:$0xff] }
 0xd57   :  { %4336 = vmatpush1.msra.mxu0 %v7032_v60  ;;  %4407 = vmatpush1.msra.mxu1 %v7036_v3  ;;  %v2635_v11 = vadd.f32 %v7946_v59, %v7945_v2 }
 0xd58   :  { %4337 = vmatprep.subr.mxu0 %v7038_v4  ;;  %4408 = vmatprep.subr.mxu1 %v7040_v63 }
 0xd59   :  { %4338 = vmatpush1.msra.mxu0 %v7044_v26  ;;  %4409 = vmatpush1.msra.mxu1 %v7046_v17 }
 0xd5a   :  { %4339 = vmatprep.subr.mxu0 %v7048_v28  ;;  %4410 = vmatprep.subr.mxu1 %v7052_v30 }
 0xd5b   :  { %4340 = vmatpush1.msra.mxu0 %v7054_v31  ;;  %4411 = vmatpush1.msra.mxu1 %v7923_v27 }
 0xd5c   :  { %4341 = vmatprep.subr.mxu0 %v7924_v24  ;;  %4412 = vmatprep.subr.mxu1 %v7925_v16 }
 0xd5d   :  { %4342 = vmatpush1.msra.mxu0 %v7926_v6  ;;  %4413 = vmatpush1.msra.mxu1 %v7927_v25 }
 0xd5e   :  { %4343 = vmatprep.subr.mxu0 %v7928_v44  ;;  %4414 = vmatprep.subr.mxu1 %v7929_v9 }
 0xd5f   :  { %4344 = vmatpush1.msra.mxu0 %v7930_v14  ;;  %4415 = vmatpush1.msra.mxu1 %v7931_v22 }
 0xd60   :  { %4345 = vmatprep.subr.mxu0 %v7932_v58  ;;  %4416 = vmatprep.subr.mxu1 %v7933_v15 }
 0xd61   :  { %4346 = vmatpush1.msra.mxu0 %v7934_v23  ;;  %4417 = vmatpush1.msra.mxu1 %v7935_v7 }
 0xd62   :  { %4347 = vmatprep.subr.mxu0 %v7936_v19  ;;  %4418 = vmatprep.subr.mxu1 %v7937_v8 }
 0xd63   :  { %4348 = vmatpush1.msra.mxu0 %v7938_v12  ;;  %4419 = vmatpush1.msra.mxu1 %v7939_v5 }
 0xd64   :  { %4349 = vmatprep.subr.mxu0 %v7940_v10  ;;  %4420 = vmatprep.subr.mxu1 %v7941_v53 }
 0xd65   :  { %4350 = vmatpush1.msra.mxu0 %v7942_v1  ;;  %4383 = vmatprep.mubr.f32.mxu0 %v7943_v38 }
 0xd66   :  { %4421 = vmatpush1.msra.mxu1 %v7944_v20  ;;  %4454 = vmatprep.mubr.f32.mxu1 %v7943_v38 }
 0xe06   :  { %v4143_v50 = vpop.f32.mrf.mxu0  ;;  %v4214_v61 = vpop.f32.mrf.mxu1 }
 0xe07   :  { %v4219_v55 = vadd.f32 %v4143_v50, %v2635_v11  ;;  %v4221_v45 = vadd.f32 %v4214_v61, %v2748_v54  ;;  %v4560_v61 = vld [vmem:[#allocation14 + $0x1f8] sm:$0xff] }
 0xe08   :  { %v4145_v29 = vpop.f32.mrf.mxu0  ;;  %v4216_v46 = vpop.f32.mrf.mxu1  ;;  %4632 = vmatprep.subr.mxu1 %v4560_v61  ;;  %v4552_v54 = vld [vmem:[#allocation14 + $0x1b8] sm:$0xff]  ;;  %v4535_v61 = vld [vmem:[#allocation14 + $0x130] sm:$0xff] }
 0xe09   :  { %v4893_v42 = vmul.f32 -1.442695, %v4219_v55  ;;  %v4220_v33 = vadd.f32 %v4145_v29, %v2637_v51  ;;  %v4222_v41 = vadd.f32 %v4216_v46, %v2750_v21  ;;  %v4554_v46 = vld [vmem:[#allocation14 + $0x1c8] sm:$0xff]  ;;  %v4553_v21 = vld [vmem:[#allocation14 + $0x1c0] sm:$0xff] }
 0xe0b   :  { %5176 = vpow2.f32 %v4893_v42  ;;  %v4894_v43 = vmul.f32 -1.442695, %v4220_v33  ;;  %v4895_v37 = vmul.f32 -1.442695, %v4222_v41  ;;  %v4558_v33 = vld [vmem:[#allocation14 + $0x1e8] sm:$0xff]  ;;  %v4555_v41 = vld [vmem:[#allocation14 + $0x1d0] sm:$0xff] }
 0xe0c   :  { %4561 = vmatprep.subr.mxu0 %v4558_v33  ;;  %v4533_v33 = vld [vmem:[#allocation14 + $0x120] sm:$0xff] }
 0xe0d   :  { %5178 = vpow2.f32 %v4894_v43  ;;  %v4557_v43 = vld [vmem:[#allocation14 + $0x1e0] sm:$0xff] }
 0xe0e   :  { %5180 = vtanh.f32 %v4221_v45  ;;  %v4549_v45 = vld [vmem:[#allocation14 + $0x1a0] sm:$0xff] }
 0xe0f   :  { %5182 = vpow2.f32 %v4895_v37  ;;  %v4551_v37 = vld [vmem:[#allocation14 + $0x1b0] sm:$0xff] }
 0xe18   :  { %v5177_v39 = vpop.eup %5176 }
 0xe19   :  { %v4226_v52 = vadd.f32 1.0, %v5177_v39  ;;  %v4546_v39 = vld [vmem:[#allocation14 + $0x188] sm:$0xff] }
 0xe1a   :  { %v5179_v32 = vpop.eup %5178 }
 0xe1b   :  { %5184 = vrcp.f32 %v4226_v52  ;;  %v4232_v40 = vadd.f32 1.0, %v5179_v32  ;;  %v5181_v47 = vpop.eup %5180  ;;  %v4548_v52 = vld [vmem:[#allocation14 + $0x198] sm:$0xff]  ;;  %v4545_v32 = vld [vmem:[#allocation14 + $0x180] sm:$0xff] }
 0xe1c   :  { %v5183_v34 = vpop.eup %5182 }
 0xe1d   :  { %5186 = vrcp.f32 %v4232_v40  ;;  %v4239_v50 = vadd.f32 1.0, %v5183_v34  ;;  %v4547_v40 = vld [vmem:[#allocation14 + $0x190] sm:$0xff]  ;;  %v4544_v34 = vld [vmem:[#allocation14 + $0x178] sm:$0xff] }
 0xe1f   :  { %5188 = vrcp.f32 %v4239_v50  ;;  %v4540_v50 = vld [vmem:[#allocation14 + $0x158] sm:$0xff] }
 0xe28   :  { %v5185_v48 = vpop.eup %5184 }
 0xe29   :  { %v4244_v59 = vmul.f32 %v5185_v48, %v5181_v47  ;;  %v4542_v47 = vld [vmem:[#allocation14 + $0x168] sm:$0xff]  ;;  %v4541_v48 = vld [vmem:[#allocation14 + $0x160] sm:$0xff] }
 0xe2a   :  { %v5187_v11 = vpop.eup %5186 }
 0xe2b   :  { %v4243_v49 = vmul.f32 %v5187_v11, %v7213_v36  ;;  %v4559_v36 = vld [vmem:[#allocation14 + $0x1f0] sm:$0xff]  ;;  %v4538_v11 = vld [vmem:[#allocation14 + $0x148] sm:$0xff] }
 0xe2c   :  { %v5189_v55 = vpop.eup %5188 }
 0xe2d   :  { %v7289_v51 = vadd.f32 %v4244_v59, %v4243_v49  ;;  %v4543_v59 = vld [vmem:[#allocation14 + $0x170] sm:$0xff]  ;;  %v4537_v49 = vld [vmem:[#allocation14 + $0x140] sm:$0xff] }
 0xe2f   :  { %5190 = vtanh.f32 %v7289_v51 }
 0xe3c   :  { %v5191_v29 = vpop.eup %5190 }
 0xe3d   :  { %v4247_v42 = vmul.f32 %v5191_v29, %v5189_v55  ;;  %v4539_v55 = vld [vmem:[#allocation14 + $0x150] sm:$0xff]  ;;  %v4534_v29 = vld [vmem:[#allocation14 + $0x128] sm:$0xff] }
 0xe3f   :  { %4384 = vmatmul.mubr.f32.vlgmr.msra.gmra.mxu0 %v4247_v42  ;;  %4455 = vmatmul.mubr.f32.vlgmr.msra.gmra.mxu1 %v4247_v42  ;;  %v4536_v42 = vld [vmem:[#allocation14 + $0x138] sm:$0xff] }
 0xe40   :  { %4625 = vmatprep.mubr.f32.mxu0 %v7943_v38  ;;  %4696 = vmatprep.mubr.f32.mxu1 %v7943_v38 }
 0xe41   :  { %4562 = vmatpush1.msra.mxu0 %v4557_v43  ;;  %4633 = vmatpush1.msra.mxu1 %v4559_v36  ;;  %v4530_v43 = vld [vmem:[#allocation14 + $0x108] sm:$0xff]  ;;  %v4532_v36 = vld [vmem:[#allocation14 + $0x118] sm:$0xff] }
 0xe42   :  { %4563 = vmatprep.subr.mxu0 %v4554_v46  ;;  %4634 = vmatprep.subr.mxu1 %v4556_v35  ;;  %v4529_v46 = vld [vmem:[#allocation14 + $0x100] sm:$0xff]  ;;  %v4531_v35 = vld [vmem:[#allocation14 + $0x110] sm:$0xff] }
 0xe43   :  { %4564 = vmatpush1.msra.mxu0 %v4553_v21  ;;  %4635 = vmatpush1.msra.mxu1 %v4555_v41 }
 0xe44   :  { %4565 = vmatprep.subr.mxu0 %v4550_v0  ;;  %4636 = vmatprep.subr.mxu1 %v4552_v54  ;;  %v4750_v0 = vld [vmem:[#allocation15 + $0x78] sm:$0xff]  ;;  %v4749_v54 = vld [vmem:[#allocation15 + $0x70] sm:$0xff] }
 0xe45   :  { %4566 = vmatpush1.msra.mxu0 %v4549_v45  ;;  %4637 = vmatpush1.msra.mxu1 %v4551_v37  ;;  %v4748_v45 = vld [vmem:[#allocation15 + $0x68] sm:$0xff]  ;;  %v4746_v37 = vld [vmem:[#allocation15 + $0x58] sm:$0xff] }
 0xe46   :  { %4567 = vmatprep.subr.mxu0 %v4546_v39  ;;  %4638 = vmatprep.subr.mxu1 %v4548_v52  ;;  %v4745_v39 = vld [vmem:[#allocation15 + $0x50] sm:$0xff]  ;;  %v4744_v52 = vld [vmem:[#allocation15 + $0x48] sm:$0xff] }
 0xe47   :  { %4568 = vmatpush1.msra.mxu0 %v4545_v32  ;;  %4639 = vmatpush1.msra.mxu1 %v4547_v40  ;;  %v4743_v32 = vld [vmem:[#allocation15 + $0x40] sm:$0xff]  ;;  %v4742_v40 = vld [vmem:[#allocation15 + $0x38] sm:$0xff] }
 0xe48   :  { %4569 = vmatprep.subr.mxu0 %v4542_v47  ;;  %4640 = vmatprep.subr.mxu1 %v4544_v34  ;;  %v4741_v47 = vld [vmem:[#allocation15 + $0x30] sm:$0xff]  ;;  %v4740_v34 = vld [vmem:[#allocation15 + $0x28] sm:$0xff] }
 0xe49   :  { %4570 = vmatpush1.msra.mxu0 %v4541_v48  ;;  %4641 = vmatpush1.msra.mxu1 %v4543_v59  ;;  %v4739_v48 = vld [vmem:[#allocation15 + $0x20] sm:$0xff]  ;;  %v4738_v59 = vld [vmem:[#allocation15 + $0x18] sm:$0xff] }
 0xe4a   :  { %4571 = vmatprep.subr.mxu0 %v4538_v11  ;;  %4642 = vmatprep.subr.mxu1 %v4540_v50  ;;  %v4737_v11 = vld [vmem:[#allocation15 + $0x10] sm:$0xff]  ;;  %v4736_v50 = vld [vmem:[#allocation15 + $0x8] sm:$0xff] }
 0xe4b   :  { %4572 = vmatpush1.msra.mxu0 %v4537_v49  ;;  %4643 = vmatpush1.msra.mxu1 %v4539_v55  ;;  %v4735_v49 = vld [vmem:[#allocation15] sm:$0xff]  ;;  %v7954_v55 = vld [vmem:[#allocation71_spill] sm:$0xff] }
 0xe4c   :  { %4573 = vmatprep.subr.mxu0 %v4534_v29  ;;  %4644 = vmatprep.subr.mxu1 %v4536_v42  ;;  %v2647_v29 = vadd.f32 %v7954_v55, %v7945_v2 }
 0xe4d   :  { %4574 = vmatpush1.msra.mxu0 %v4533_v33  ;;  %4645 = vmatpush1.msra.mxu1 %v4535_v61  ;;  %v7955_v33 = vld [vmem:[#allocation47_spill] sm:$0xff] }
 0xe4e   :  { %4575 = vmatprep.subr.mxu0 %v4530_v43  ;;  %4646 = vmatprep.subr.mxu1 %v4532_v36  ;;  %v2649_v61 = vadd.f32 %v7955_v33, %v6753_v62 }
 0xe4f   :  { %4576 = vmatpush1.msra.mxu0 %v4529_v46  ;;  %4647 = vmatpush1.msra.mxu1 %v4531_v35 }
 0xe50   :  { %4577 = vmatprep.subr.mxu0 %v7028_v57  ;;  %4648 = vmatprep.subr.mxu1 %v7030_v56  ;;  %v7950_v57 = vld [vmem:[#allocation23_spill] sm:$0xff] }
 0xe51   :  { %4578 = vmatpush1.msra.mxu0 %v7032_v60  ;;  %4649 = vmatpush1.msra.mxu1 %v7036_v3  ;;  %v2641_v56 = vadd.f32 %v7950_v57, %v7945_v2  ;;  %v7951_v3 = vld [vmem:[#allocation46_spill] sm:$0xff] }
 0xe52   :  { %4579 = vmatprep.subr.mxu0 %v7038_v4  ;;  %4650 = vmatprep.subr.mxu1 %v7040_v63  ;;  %v2643_v4 = vadd.f32 %v7951_v3, %v6753_v62  ;;  %v7956_v3 = vld [vmem:[#allocation45_spill] sm:$0xff] }
 0xe53   :  { %4580 = vmatpush1.msra.mxu0 %v7044_v26  ;;  %4651 = vmatpush1.msra.mxu1 %v7046_v17 }
 0xe54   :  { %4581 = vmatprep.subr.mxu0 %v7048_v28  ;;  %4652 = vmatprep.subr.mxu1 %v7052_v30 }
 0xe55   :  { %4582 = vmatpush1.msra.mxu0 %v7054_v31  ;;  %4653 = vmatpush1.msra.mxu1 %v7923_v27 }
 0xe56   :  { %4583 = vmatprep.subr.mxu0 %v7924_v24  ;;  %4654 = vmatprep.subr.mxu1 %v7925_v16  ;;  %v7952_v24 = vld [vmem:[#allocation70_spill] sm:$0xff] }
 0xe57   :  { %4584 = vmatpush1.msra.mxu0 %v7926_v6  ;;  %4655 = vmatpush1.msra.mxu1 %v7927_v25  ;;  %v2756_v16 = vadd.f32 %v7952_v24, %v7849_v18  ;;  %v7953_v25 = vld [vmem:[#allocation43_spill] sm:$0xff] }
 0xe58   :  { %4585 = vmatprep.subr.mxu0 %v7928_v44  ;;  %4656 = vmatprep.subr.mxu1 %v7929_v9  ;;  %v2754_v44 = vadd.f32 %v7953_v25, %v6770_v13 }
 0xe59   :  { %4586 = vmatpush1.msra.mxu0 %v7930_v14  ;;  %4657 = vmatpush1.msra.mxu1 %v7931_v22 }
 0xe5a   :  { %4587 = vmatprep.subr.mxu0 %v7932_v58  ;;  %4658 = vmatprep.subr.mxu1 %v7933_v15 }
 0xe5b   :  { %4588 = vmatpush1.msra.mxu0 %v7934_v23  ;;  %4659 = vmatpush1.msra.mxu1 %v7935_v7 }
 0xe5c   :  { %4589 = vmatprep.subr.mxu0 %v7936_v19  ;;  %4660 = vmatprep.subr.mxu1 %v7937_v8 }
 0xe5d   :  { %4590 = vmatpush1.msra.mxu0 %v7938_v12  ;;  %4661 = vmatpush1.msra.mxu1 %v7939_v5 }
 0xe5e   :  { %4591 = vmatprep.subr.mxu0 %v7940_v10  ;;  %4662 = vmatprep.subr.mxu1 %v7941_v53 }
 0xe5f   :  { %4592 = vmatpush1.msra.mxu0 %v7942_v1  ;;  %4663 = vmatpush1.msra.mxu1 %v7944_v20 }
 0xe60   :  { %4920 = vmatprep.subr.mxu0 %v7943_v38 }
 0xeff   :  { %v4385_v60 = vpop.f32.mrf.mxu0  ;;  %v4456_v30 = vpop.f32.mrf.mxu1 }
 0xf00   :  { %v4461_v63 = vadd.f32 %v4385_v60, %v2641_v56  ;;  %v4463_v9 = vadd.f32 %v4456_v30, %v2754_v44 }
 0xf01   :  { %v4387_v26 = vpop.f32.mrf.mxu0  ;;  %v4458_v27 = vpop.f32.mrf.mxu1 }
 0xf02   :  { %v4896_v17 = vmul.f32 -1.442695, %v4461_v63  ;;  %v4462_v28 = vadd.f32 %v4387_v26, %v2643_v4  ;;  %v4464_v6 = vadd.f32 %v4458_v27, %v2756_v16  ;;  %v7957_v63 = vld [vmem:[#allocation69_spill] sm:$0xff] }
 0xf03   :  { %v2760_v2 = vadd.f32 %v7957_v63, %v6770_v13 }
 0xf04   :  { %5192 = vpow2.f32 %v4896_v17  ;;  %v4897_v31 = vmul.f32 -1.442695, %v4462_v28  ;;  %v4898_v14 = vmul.f32 -1.442695, %v4464_v6 }
 0xf06   :  { %5194 = vpow2.f32 %v4897_v31 }
 0xf07   :  { %5196 = vtanh.f32 %v4463_v9 }
 0xf08   :  { %5198 = vpow2.f32 %v4898_v14 }
 0xf11   :  { %v5193_v22 = vpop.eup %5192 }
 0xf12   :  { %v4468_v58 = vadd.f32 1.0, %v5193_v22 }
 0xf13   :  { %v5195_v15 = vpop.eup %5194 }
 0xf14   :  { %5200 = vrcp.f32 %v4468_v58  ;;  %v4474_v23 = vadd.f32 1.0, %v5195_v15  ;;  %v5197_v7 = vpop.eup %5196  ;;  %v4902_v58 = vld [vmem:[%s7378_s8] ss:$0 sm:$0xff] }
 0xf15   :  { %v5199_v19 = vpop.eup %5198 }
 0xf16   :  { %5202 = vrcp.f32 %v4474_v23  ;;  %v4481_v10 = vadd.f32 1.0, %v5199_v19 }
 0xf18   :  { %5204 = vrcp.f32 %v4481_v10 }
 0xf21   :  { %v5201_v8 = vpop.eup %5200 }
 0xf22   :  { %v4486_v12 = vmul.f32 %v5201_v8, %v5197_v7 }
 0xf23   :  { %v5203_v5 = vpop.eup %5202 }
 0xf24   :  { %v4485_v53 = vmul.f32 %v5203_v5, %v7289_v51  ;;  %v4747_v51 = vld [vmem:[#allocation15 + $0x60] sm:$0xff] }
 0xf25   :  { %v5205_v20 = vpop.eup %5204 }
 0xf26   :  { %v7336_v1 = vadd.f32 %v4486_v12, %v4485_v53 }
 0xf28   :  { %5206 = vtanh.f32 %v7336_v1 }
 0xf35   :  { %v5207_v21 = vpop.eup %5206 }
 0xf36   :  { %v4489_v41 = vmul.f32 %v5207_v21, %v5205_v20 }
 0xf38   :  { %4626 = vmatmul.mubr.f32.vlgmr.msra.gmra.mxu0 %v4489_v41  ;;  %4697 = vmatmul.mubr.f32.vlgmr.msra.gmra.mxu1 %v4489_v41 }
 0xf39   :  { %4921 = vmatpush3.msra.mxu0 %v4750_v0  ;;  %4952 = vmatprep.mubr.msk.f32.mxu0 %vm5385_vm0, %v7943_v38 }
 0xf3a   :  { %4922 = vmatprep.subr.mxu0 %v7943_v38 }
 0xf3b   :  { %4923 = vmatpush3.msra.mxu0 %v4749_v54 }
 0xf3c   :  { %4924 = vmatprep.subr.mxu0 %v7943_v38 }
 0xf3d   :  { %4925 = vmatpush3.msra.mxu0 %v4748_v45 }
 0xf3e   :  { %4926 = vmatprep.subr.mxu0 %v7943_v38 }
 0xf3f   :  { %4927 = vmatpush3.msra.mxu0 %v4747_v51 }
 0xf40   :  { %4928 = vmatprep.subr.mxu0 %v7943_v38 }
 0xf41   :  { %4929 = vmatpush3.msra.mxu0 %v4746_v37 }
 0xf42   :  { %4930 = vmatprep.subr.mxu0 %v7943_v38 }
 0xf43   :  { %4931 = vmatpush3.msra.mxu0 %v4745_v39 }
 0xf44   :  { %4932 = vmatprep.subr.mxu0 %v7943_v38 }
 0xf45   :  { %4933 = vmatpush3.msra.mxu0 %v4744_v52 }
 0xf46   :  { %4934 = vmatprep.subr.mxu0 %v7943_v38 }
 0xf47   :  { %4935 = vmatpush3.msra.mxu0 %v4743_v32 }
 0xf48   :  { %4936 = vmatprep.subr.mxu0 %v7943_v38 }
 0xf49   :  { %4937 = vmatpush3.msra.mxu0 %v4742_v40 }
 0xf4a   :  { %4938 = vmatprep.subr.mxu0 %v7943_v38 }
 0xf4b   :  { %4939 = vmatpush3.msra.mxu0 %v4741_v47 }
 0xf4c   :  { %4940 = vmatprep.subr.mxu0 %v7943_v38 }
 0xf4d   :  { %4941 = vmatpush3.msra.mxu0 %v4740_v34 }
 0xf4e   :  { %4942 = vmatprep.subr.mxu0 %v7943_v38 }
 0xf4f   :  { %4943 = vmatpush3.msra.mxu0 %v4739_v48 }
 0xf50   :  { %4944 = vmatprep.subr.mxu0 %v7943_v38 }
 0xf51   :  { %4945 = vmatpush3.msra.mxu0 %v4738_v59 }
 0xf52   :  { %4946 = vmatprep.subr.mxu0 %v7943_v38 }
 0xf53   :  { %4947 = vmatpush3.msra.mxu0 %v4737_v11 }
 0xf54   :  { %4948 = vmatprep.subr.mxu0 %v7943_v38 }
 0xf55   :  { %4949 = vmatpush3.msra.mxu0 %v4736_v50 }
 0xf56   :  { %4950 = vmatprep.subr.mxu0 %v7943_v38  ;;  %v2762_v38 = vadd.f32 %v7956_v3, %v7849_v18 }
 0xf57   :  { %4951 = vmatpush3.msra.mxu0 %v4735_v49 }
 0xff8   :  { %v4627_v42 = vpop.f32.mrf.mxu0  ;;  %v4698_v57 = vpop.f32.mrf.mxu1 }
 0xff9   :  { %v4703_v43 = vadd.f32 %v4627_v42, %v2647_v29  ;;  %v4705_v26 = vadd.f32 %v4698_v57, %v2760_v2 }
 0xffa   :  { %v4629_v36 = vpop.f32.mrf.mxu0  ;;  %v4700_v60 = vpop.f32.mrf.mxu1 }
 0xffb   :  { %v4899_v46 = vmul.f32 -1.442695, %v4703_v43  ;;  %v4704_v35 = vadd.f32 %v4629_v36, %v2649_v61  ;;  %v4706_v4 = vadd.f32 %v4700_v60, %v2762_v38 }
 0xffd   :  { %5208 = vpow2.f32 %v4899_v46  ;;  %v4900_v56 = vmul.f32 -1.442695, %v4704_v35  ;;  %v4901_v17 = vmul.f32 -1.442695, %v4706_v4 }
 0xfff   :  { %5210 = vpow2.f32 %v4900_v56 }
0x1000   :  { %5212 = vtanh.f32 %v4705_v26 }
0x1001   :  { %5214 = vpow2.f32 %v4901_v17 }
0x100a   :  { %v5209_v28 = vpop.eup %5208 }
0x100b   :  { %v4710_v62 = vadd.f32 1.0, %v5209_v28 }
0x100c   :  { %v5211_v30 = vpop.eup %5210 }
0x100d   :  { %5216 = vrcp.f32 %v4710_v62  ;;  %v4716_v31 = vadd.f32 1.0, %v5211_v30  ;;  %v5213_v27 = vpop.eup %5212 }
0x100e   :  { %v5215_v24 = vpop.eup %5214 }
0x100f   :  { %5218 = vrcp.f32 %v4716_v31  ;;  %v4723_v18 = vadd.f32 1.0, %v5215_v24 }
0x1011   :  { %5220 = vrcp.f32 %v4723_v18 }
0x101a   :  { %v5217_v16 = vpop.eup %5216 }
0x101b   :  { %v4728_v6 = vmul.f32 %v5217_v16, %v5213_v27 }
0x101c   :  { %v5219_v25 = vpop.eup %5218 }
0x101d   :  { %v4727_v44 = vmul.f32 %v5219_v25, %v7336_v1 }
0x101e   :  { %v5221_v13 = vpop.eup %5220 }
0x101f   :  { %v4729_v9 = vadd.f32 %v4728_v6, %v4727_v44 }
0x1021   :  { %5222 = vtanh.f32 %v4729_v9 }
0x102e   :  { %v5223_v14 = vpop.eup %5222 }
0x102f   :  { %v4731_v22 = vmul.f32 %v5223_v14, %v5221_v13 }
0x1031   :  { %4953 = vmatmul.mubr.f32.vlgmr.msra.gmra.mxu0 %v4731_v22 }
0x10f1   :  { %v4824_v15 = vpop.f32.mrf.mxu0 }
0x10f2   :  { %v4825_v23 = vadd.f32 %v4902_v58, %v4824_v15 }
0x10f3   :  { %v4954_v7 = vpop.f32.mrf.mxu0 }
0x10f4   :  { %4828 = vst [vmem:[#allocation17] sm:$0xff] %v4825_v23 }
0x10f5   :  { %5355 = shalt.err (!%p5352_p6)
}
0x10f6   :  { %4838 = dma.vmem_to_hbm [thread:$0]  %s4836_s21, 128, %s7379_s9, [#allocation8]  }
0x10f7   :  { %5372 = dma.done.wait [#allocation8], 128  }
0x10f8   :  { %5373 = vsyncadd [#allocation8], 4294967168 }
0x10f9   :  { %4842 = vsyncpa [#allocation7], 1 }
0x10fa   :  { %4843 = vsyncpa [#allocation10], 1 }
0x10fb   :  { %4844 = vsyncpa [#allocation13], 1 }
0x10fc   :  { %4845 = vsyncpa [#allocation16], 1 }
0x10fd   :  { %4846 = vsyncpa [#allocation8], 1 }

</bundles_post_ra>
